<compile_context>
chip_gen: v5e
topology: v5e:2x2
jax: 0.10.0
libtpu: 0.0.40
codegen_flags: <defaults>
</compile_context>

<pallas_src>
import numpy as np
import jax
import jax.numpy as jnp
from jax.experimental import pallas as pl
from jax.experimental.pallas import tpu as pltpu

HID = 512          # LSTM hidden / embedding dim (fixed by the module)
ENC = 2048         # encoder feature dim (fixed by the module)
TC_STEPS = 8       # timesteps per recurrent grid step (amortizes grid overhead)


def _round_up(n, m):
    return ((n + m - 1) // m) * m


def _pick_tile(n, candidates):
    for c in candidates:
        if c <= n and n % c == 0:
            return c
    return n


# --------------------------------------------------------------------------
# Generic tiled  (M,K) @ (K,N) + bias, rows scaled by a (M,1) mask.
# Used for: fused init_h/init_c, the hoisted input projection, and the
# vocab projection (where the mask zeroes inactive (b, t) rows).
# --------------------------------------------------------------------------
def _linear_kernel(a_ref, w_ref, b_ref, m_ref, o_ref):
    acc = jnp.dot(a_ref[...], w_ref[...], preferred_element_type=jnp.float32)
    o_ref[...] = (acc + b_ref[...]) * m_ref[...]


def linear(a, w, b, row_mask):
    M, K = a.shape
    N = w.shape[1]
    tm = _pick_tile(M, (256, 128, 64, 32, 16, 8))
    tn = _pick_tile(N, (512, 256, 128))
    return pl.pallas_call(
        _linear_kernel,
        out_shape=jax.ShapeDtypeStruct((M, N), jnp.float32),
        grid=(M // tm, N // tn),
        in_specs=[
            pl.BlockSpec((tm, K), lambda i, j: (i, 0)),   # activations
            pl.BlockSpec((K, tn), lambda i, j: (0, j)),   # weight tile
            pl.BlockSpec((1, tn), lambda i, j: (0, j)),   # bias tile
            pl.BlockSpec((tm, 1), lambda i, j: (i, 0)),   # row mask
        ],
        out_specs=pl.BlockSpec((tm, tn), lambda i, j: (i, j)),
        compiler_params=pltpu.CompilerParams(
            dimension_semantics=("parallel", "parallel")),
    )(a, w, b, row_mask)


# --------------------------------------------------------------------------
# Recurrent kernel: TC_STEPS LSTM-cell steps per grid step.  The input
# projection is already folded into gates_x; only h @ W_hh^T runs here.
# h / c live in VMEM scratch across the whole (sequential) time grid.
# --------------------------------------------------------------------------
def decode_kernel(bt_ref, gx_ref, h0_ref, c0_ref, whh_ref, hout_ref,
                  h_scr, c_scr):
    chunk = pl.program_id(0)

    @pl.when(chunk == 0)
    def _():
        h_scr[...] = h0_ref[...]
        c_scr[...] = c0_ref[...]

    B_pad = h_scr.shape[0]
    row_ids = jax.lax.broadcasted_iota(jnp.int32, (B_pad, 1), 0)
    whh = whh_ref[...]                       # loop-invariant, hoisted

    for i in range(TC_STEPS):                # static unroll of the chunk
        t = chunk * TC_STEPS + i
        bt = bt_ref[t]                       # batch_size_t (SMEM scalar)
        h = h_scr[...]
        c = c_scr[...]

        gates = gx_ref[i] + jnp.dot(h.astype(whh.dtype), whh,
                                    preferred_element_type=jnp.float32)
        i_g = jax.nn.sigmoid(gates[:, 0 * HID:1 * HID])
        f_g = jax.nn.sigmoid(gates[:, 1 * HID:2 * HID])
        g_g = jnp.tanh(gates[:, 2 * HID:3 * HID])
        o_g = jax.nn.sigmoid(gates[:, 3 * HID:4 * HID])

        c_new = f_g * c + i_g * g_g
        h_new = o_g * jnp.tanh(c_new)

        # captions sorted by length desc => active rows are exactly [0, bt)
        mask = row_ids < bt
        h_scr[...] = jnp.where(mask, h_new, h)
        c_scr[...] = jnp.where(mask, c_new, c)
        hout_ref[i] = h_new                  # dense (B_pad, HID) slab store


def decode_steps(bt_arr, gates_x_tm, h0, c0, w_hh_t):
    T_pad, B_pad, G = gates_x_tm.shape
    n_chunks = T_pad // TC_STEPS
    return pl.pallas_call(
        decode_kernel,
        out_shape=jax.ShapeDtypeStruct((T_pad, B_pad, HID), jnp.float32),
        grid_spec=pltpu.PrefetchScalarGridSpec(
            num_scalar_prefetch=1,
            grid=(n_chunks,),
            in_specs=[
                pl.BlockSpec((TC_STEPS, B_pad, G), lambda c, bt: (c, 0, 0)),
                pl.BlockSpec((B_pad, HID), lambda c, bt: (0, 0)),   # h0
                pl.BlockSpec((B_pad, HID), lambda c, bt: (0, 0)),   # c0
                pl.BlockSpec((HID, G), lambda c, bt: (0, 0)),       # W_hh^T
                # NOTE: W_hh^T has a constant index_map; pipeline_mode=
                # pl.Buffered(1) would halve its VMEM residency if needed.
            ],
            out_specs=pl.BlockSpec((TC_STEPS, B_pad, HID),
                                   lambda c, bt: (c, 0, 0)),
            scratch_shapes=[pltpu.VMEM((B_pad, HID), jnp.float32),  # h carry
                            pltpu.VMEM((B_pad, HID), jnp.float32)], # c carry
        ),
        compiler_params=pltpu.CompilerParams(
            dimension_semantics=("arbitrary",)),   # sequential time carry
    )(bt_arr, gates_x_tm, h0, c0, w_hh_t)


# --------------------------------------------------------------------------
# Full Decoder.forward
# --------------------------------------------------------------------------
def decoder_forward(enc_out, captions, caplens, params,
                    weight_dtype=jnp.float32):
    # --- host glue: sort by caption length, descending (like torch.sort) ---
    # TODO(synk): host-side argsort + dynamic t_max prevents jit-wrapping the
    # whole forward (inherent to the module's data-dependent loop bound).
    cl = np.asarray(caplens)[:, 0].astype(np.int32)
    sort_idx = np.argsort(-cl, kind="stable")
    cl_sorted = cl[sort_idx]
    enc_out = jnp.asarray(enc_out)[sort_idx]
    captions = jnp.asarray(captions)[sort_idx]
    caplens_m1 = cl_sorted - 1
    t_max = int(caplens_m1.max())

    B = int(enc_out.shape[0])
    B_pad = _round_up(B, 8)                       # f32 sublane granularity
    T_pad = _round_up(max(t_max, 1), TC_STEPS)

    if B_pad > B:
        enc_out_p = jnp.pad(enc_out, ((0, B_pad - B), (0, 0)))
        captions_p = jnp.pad(captions, ((0, B_pad - B), (0, 0)))
        cl_pad = np.concatenate([cl_sorted,
                                 np.zeros(B_pad - B, cl_sorted.dtype)])
    else:
        enc_out_p, captions_p, cl_pad = enc_out, captions, cl_sorted

    # per-step active batch size (rows are length-sorted descending)
    ts = np.arange(T_pad)
    active = (cl_pad[:, None] - 1) > ts[None, :]          # (B_pad, T_pad) bool
    bt_arr = jnp.asarray(np.sum(active, axis=0).astype(np.int32))

    wd = weight_dtype

    # --- fused init_h / init_c: single (ENC, 2*HID) matmul ------------------
    w_init = jnp.concatenate([params["wh_t"], params["wc_t"]], axis=1).astype(wd)
    b_init = jnp.concatenate([params["bh"], params["bc"]], axis=1)
    hc0 = linear(enc_out_p.astype(wd), w_init, b_init,
                 jnp.ones((B_pad, 1), jnp.float32))
    h0, c0 = hc0[:, :HID], hc0[:, HID:]

    # --- embedding lookup + hoisted input projection over all timesteps -----
    emb = params["emb"][captions_p]                       # (B_pad, T, HID) gather
    emb_tm = jnp.transpose(emb, (1, 0, 2))                # (T, B_pad, HID) small
    T_have = emb_tm.shape[0]
    if T_have >= T_pad:
        emb_tm = emb_tm[:T_pad]
    else:
        emb_tm = jnp.pad(emb_tm, ((0, T_pad - T_have), (0, 0), (0, 0)))
    emb_flat = emb_tm.reshape(T_pad * B_pad, HID)
    gates_x = linear(emb_flat.astype(wd), params["w_ih_t"].astype(wd),
                     params["bias"],
                     jnp.ones((T_pad * B_pad, 1), jnp.float32))
    gates_x = gates_x.reshape(T_pad, B_pad, 4 * HID)

    # --- recurrent LSTM-cell kernel (only h @ W_hh on the critical path) ----
    h_out = decode_steps(bt_arr, gates_x, h0, c0, params["w_hh_t"].astype(wd))

    # --- vocab projection as one big tiled matmul, mask fused, output laid
    #     out directly in (B, T, V) row order --------------------------------
    h_bt = jnp.transpose(h_out, (1, 0, 2)).reshape(B_pad * T_pad, HID)
    act_mask = jnp.asarray(active.astype(np.float32).reshape(B_pad * T_pad, 1))
    V = int(params["w_fc_t"].shape[1])
    V_pad = _round_up(V, 128)
    w_fc = params["w_fc_t"].astype(wd)
    b_fc = params["b_fc"]
    if V_pad > V:
        w_fc = jnp.pad(w_fc, ((0, 0), (0, V_pad - V)))
        b_fc = jnp.pad(b_fc, ((0, 0), (0, V_pad - V)))
    preds = linear(h_bt.astype(wd), w_fc, b_fc, act_mask)  # (B_pad*T_pad, V_pad)
    predictions = preds.reshape(B_pad, T_pad, V_pad)[:B, :t_max, :V]

    return predictions, captions, jnp.asarray(caplens_m1), sort_idx


# --------------------------------------------------------------------------
# Pure NumPy reference (mirrors the PyTorch loop exactly)
# --------------------------------------------------------------------------
def reference_forward(enc_out, captions, caplens, p):
    sig = lambda x: 1.0 / (1.0 + np.exp(-x))
    enc = np.asarray(enc_out); cap = np.asarray(captions)
    cl = np.asarray(caplens)[:, 0]
    sort_idx = np.argsort(-cl, kind="stable")
    cl = cl[sort_idx]; enc = enc[sort_idx]; cap = cap[sort_idx]

    h = enc @ np.asarray(p["wh_t"]) + np.asarray(p["bh"])
    c = enc @ np.asarray(p["wc_t"]) + np.asarray(p["bc"])
    emb = np.asarray(p["emb"])[cap]                       # (B, T, HID)
    w_ih_t = np.asarray(p["w_ih_t"]); w_hh_t = np.asarray(p["w_hh_t"])
    bias = np.asarray(p["bias"]); w_fc_t = np.asarray(p["w_fc_t"])
    b_fc = np.asarray(p["b_fc"])

    cl1 = cl - 1
    t_max = int(cl1.max())
    B = enc.shape[0]; V = w_fc_t.shape[1]
    preds_out = np.zeros((B, t_max, V), np.float32)
    for t in range(t_max):
        bt = int(np.sum(cl1 > t))
        x = emb[:bt, t]
        gates = x @ w_ih_t + h[:bt] @ w_hh_t + bias
        i, f, g, o = np.split(gates, 4, axis=1)
        i, f, o, g = sig(i), sig(f), sig(o), np.tanh(g)
        c_new = f * c[:bt] + i * g
        h_new = o * np.tanh(c_new)
        h = np.concatenate([h_new, h[bt:]], 0)
        c = np.concatenate([c_new, c[bt:]], 0)
        preds_out[:bt, t] = h_new @ w_fc_t + b_fc[0]
    return preds_out


# --------------------------------------------------------------------------
if __name__ == "__main__":
    B, T, V = 4, 8, 128          # small synthetic vocab / batch / seq

    key = jax.random.PRNGKey(0)
    ks = jax.random.split(key, 16)

    def lin_w(k, out_d, in_d):
        return (jax.random.normal(k, (out_d, in_d), jnp.float32)
                / np.sqrt(in_d)).astype(jnp.float32)

    def lin_b(k, out_d):
        return (0.01 * jax.random.normal(k, (1, out_d), jnp.float32)).astype(jnp.float32)

    # nn.Embedding(V, 512), nn.LSTMCell(512, 512), nn.Linear(512, V),
    # nn.Linear(2048, 512) x2 -- weights pre-transposed for row-major matmuls.
    params = {
        "emb":    (0.1 * jax.random.normal(ks[0], (V, HID), jnp.float32)),
        "w_ih_t": jnp.transpose(lin_w(ks[1], 4 * HID, HID)),     # (HID, 4*HID)
        "w_hh_t": jnp.transpose(lin_w(ks[2], 4 * HID, HID)),     # (HID, 4*HID)
        "bias":   lin_b(ks[3], 4 * HID) + lin_b(ks[4], 4 * HID), # b_ih + b_hh
        "w_fc_t": jnp.transpose(lin_w(ks[5], V, HID)),           # (HID, V)
        "b_fc":   lin_b(ks[6], V),
        "wh_t":   jnp.transpose(lin_w(ks[7], HID, ENC)),         # (ENC, HID)
        "bh":     lin_b(ks[8], HID),
        "wc_t":   jnp.transpose(lin_w(ks[9], HID, ENC)),         # (ENC, HID)
        "bc":     lin_b(ks[10], HID),
    }

    enc_out = jax.random.normal(ks[11], (B, ENC), jnp.float32)
    captions = jax.random.randint(ks[12], (B, T), 0, V, jnp.int32)
    caplens = jnp.array([[5], [8], [3], [6]], jnp.int32)         # distinct lengths

    # f32 weights here so the tolerance check against the NumPy reference is
    # strict; pass weight_dtype=jnp.bfloat16 on v6e/v7x for halved weight
    # DMA/VMEM with f32 accumulation and f32 h/c carry.
    predictions, caps_sorted, caplens_m1, sort_idx = decoder_forward(
        enc_out, captions, caplens, params, weight_dtype=jnp.float32)
    predictions = jax.block_until_ready(predictions)

    ref = reference_forward(enc_out, captions, caplens, params)
    assert predictions.shape == ref.shape, (predictions.shape, ref.shape)
    np.testing.assert_allclose(np.asarray(predictions), ref, rtol=2e-2, atol=2e-2)

    print("KERNEL_OK")
</pallas_src>

<mosaic_0001>
module attributes {stable_mosaic.version = 11 : i64} {
  func.func @_linear_kernel(%arg0: i32, %arg1: i32, %arg2: memref<8x2048xf32, #tpu.memory_space<vmem>>, %arg3: memref<2048x512xf32, #tpu.memory_space<vmem>>, %arg4: memref<1x512xf32, #tpu.memory_space<vmem>>, %arg5: memref<8x1xf32, #tpu.memory_space<vmem>>, %arg6: memref<8x512xf32, #tpu.memory_space<vmem>>) attributes {dimension_semantics = [#tpu.dimension_semantics<parallel>, #tpu.dimension_semantics<parallel>], iteration_bounds = array<i64: 1, 2>, scalar_prefetch = 0 : i64, scratch_operands = 0 : i64, tpu.core_type = #tpu.core_type<tc>, window_params = [{transform_indices = @transform_0, window_bounds = array<i64: 8, 2048>}, {transform_indices = @transform_1, window_bounds = array<i64: 2048, 512>}, {transform_indices = @transform_2, window_bounds = array<i64: 1, 512>}, {transform_indices = @transform_3, window_bounds = array<i64: 8, 1>}, {transform_indices = @transform_4, window_bounds = array<i64: 8, 512>}]} {
    %c0 = arith.constant 0 : index
    %c0_0 = arith.constant 0 : index
    %0 = vector.load %arg2[%c0, %c0_0] : memref<8x2048xf32, #tpu.memory_space<vmem>>, vector<8x2048xf32>
    %c0_1 = arith.constant 0 : index
    %c0_2 = arith.constant 0 : index
    %1 = vector.load %arg3[%c0_1, %c0_2] : memref<2048x512xf32, #tpu.memory_space<vmem>>, vector<2048x512xf32>
    %cst = arith.constant dense<0.000000e+00> : vector<8x512xf32>
    %2 = tpu.matmul %0, %1, %cst {dimension_numbers = #tpu.dot_dimension_numbers<[1], [0], [0], [1], [0, 0, 1, 1], [], []>} : vector<8x2048xf32>, vector<2048x512xf32>, vector<8x512xf32> -> vector<8x512xf32>
    %c0_3 = arith.constant 0 : index
    %c0_4 = arith.constant 0 : index
    %3 = vector.load %arg4[%c0_3, %c0_4] : memref<1x512xf32, #tpu.memory_space<vmem>>, vector<1x512xf32>
    %4 = vector.broadcast %3 : vector<1x512xf32> to vector<8x512xf32>
    %5 = arith.addf %2, %4 : vector<8x512xf32>
    %c0_5 = arith.constant 0 : index
    %c0_6 = arith.constant 0 : index
    %6 = vector.load %arg5[%c0_5, %c0_6] : memref<8x1xf32, #tpu.memory_space<vmem>>, vector<8x1xf32>
    %7 = vector.broadcast %6 : vector<8x1xf32> to vector<8x512xf32>
    %8 = arith.mulf %5, %7 : vector<8x512xf32>
    %c0_7 = arith.constant 0 : index
    %c0_8 = arith.constant 0 : index
    %9 = vector.load %arg6[%c0_7, %c0_8] : memref<8x512xf32, #tpu.memory_space<vmem>>, vector<8x512xf32>
    tpu.vector_store %arg6[%c0_7, %c0_8], %8 {strides = array<i32>} : memref<8x512xf32, #tpu.memory_space<vmem>>, vector<8x512xf32>,
    return
  }
  func.func @transform_0(%arg0: i32, %arg1: i32) -> (i32, i32) {
    %c0_i32 = arith.constant 0 : i32
    %c0_i32_0 = arith.constant 0 : i32
    return %arg0, %c0_i32 : i32, i32
  }
  func.func @transform_1(%arg0: i32, %arg1: i32) -> (i32, i32) {
    %c0_i32 = arith.constant 0 : i32
    %c0_i32_0 = arith.constant 0 : i32
    return %c0_i32, %arg1 : i32, i32
  }
  func.func @transform_2(%arg0: i32, %arg1: i32) -> (i32, i32) {
    %c0_i32 = arith.constant 0 : i32
    %c0_i32_0 = arith.constant 0 : i32
    return %c0_i32, %arg1 : i32, i32
  }
  func.func @transform_3(%arg0: i32, %arg1: i32) -> (i32, i32) {
    %c0_i32 = arith.constant 0 : i32
    %c0_i32_0 = arith.constant 0 : i32
    return %arg0, %c0_i32 : i32, i32
  }
  func.func @transform_4(%arg0: i32, %arg1: i32) -> (i32, i32) {
    %c0_i32 = arith.constant 0 : i32
    return %arg0, %arg1 : i32, i32
  }
}

</mosaic_0001>

<bundles_post_ra>
// kernel: tpu_custom_call.1
= control target key start
LH: loop header
LB: loop body
LE: loop exit
PB: predicated region body
PF: predicated region fallthrough
CT: control target
= control target key end

     0   :  { %s4393_s0 = inlined_call_operand.hbm [shape: f32[8,2048], index: 0, kind: input, shape index: {}]   ;;  %s4394_s1 = inlined_call_operand.hbm [shape: f32[2048,1024], index: 1, kind: input, shape index: {}]   ;;  %s4395_s2 = inlined_call_operand.hbm [shape: f32[1,1024], index: 2, kind: input, shape index: {}]   ;;  %s4396_s3 = inlined_call_operand.vmem [shape: f32[8,1], index: 3, kind: input, shape index: {}]   ;;  %s4397_s4 = inlined_call_operand.hbm [shape: f32[8,1024], index: 4, kind: output, shape index: {}]  }
   0x1   :  { %4398 = sst [smem:[#allocation12_spill]] %s4393_s0 }
   0x2   :  { %9 = vsyncpa [#allocation3], 0 }
   0x3   :  { %10 = vsyncpa [#allocation6], 0 }
   0x4   :  { %12 = vsyncpa [#allocation6 + $0x1], 0 }
   0x5   :  { %13 = vsyncpa [#allocation4], 0 }
   0x6   :  { %15 = vsyncpa [#allocation4 + $0x1], 0  ;;  %s3168_s15 = smov 0   ;;  %s3170_s16 = smov 0  }
   0x7   :  { %s3172_s17 = smov 0   ;;  %s3174_s18 = smov 0  }
   0x8   :  { %s3176_s19 = smov 0   ;;  %s3178_s20 = smov 0  }
   0x9 LB: > { %s30_s21 = sadd.s32 1, %s3132_s19  ;;  %s66_s22 = sadd.s32 1, %s3124_s17  ;;  %s3136_s20 = sphi %s3178_s20, %s21_s20   ;;  %s3132_s19 = sphi %s3176_s19, %s4410_s19   ;;  %s3128_s18 = sphi %s3174_s18, %s4409_s18   ;;  %s3124_s17 = sphi %s3172_s17, %s4408_s17   ;;  %s3120_s16 = sphi %s3170_s16, %s4407_s16   ;;  %s3116_s15 = sphi %s3168_s15, %s4406_s15  }
   0xa   : > { %p31_p0 = scmp.ge.s32.totalorder %s30_s21, 2  ;;  %p73_p1 = scmp.ne.s32.totalorder %s3124_s17, %s3120_s16 }
   0xb   : > { %p74_p2 = scmp.eq.s32.totalorder %s3136_s20, 0  ;;  %p2809_p3 = scmp.ge.s32.totalorder %s3136_s20, 2 }
   0xc   : > { %s4412_s21 = smov (%p31_p0, %s30_s21), 0  ;;  %p2853_p5 = scmp.lt.s32.totalorder %s3136_s20, 2 }
   0xd   : > { %p3209_p4 = por %p74_p2, %p73_p1  ;;  %s63_s24 = ssub.s32 %s3132_s19, %s4412_s21 }
   0xe   : > { %s205_s25 = sand.u32 1, %s3136_s20   ;;  %p64_p6 = scmp.eq.s32.totalorder %s63_s24, 0 }
   0xf   : > { %s207_s26 = sand.u32 1, %s3124_s17   ;;  %s2825_s27 = sshll.u32 %s3132_s19, 5 }
  0x10   : > { %s3220_s28 = scalar_select %p64_p6, %s3124_s17, %s66_s22  }
  0x11   : > { %s2810_s29 = sshll.u32 %s207_s26, 13  ;;  %s214_s6 = scalar_lea.hbm %s4394_s1, %s2825_s27 }
  0x12   : > { %s215_s7 = sshll.u32 %s214_s6, 4  ;;  %s209_s8 = scalar_lea.vmem [#allocation5], %s2810_s29  ;;  %s216_s7 = int_to_ptr.hbm [resolvable:$true] %s215_s7 }
  0x13   : > { %s217_s9 = sshll.u32 %s209_s8, 4  ;;  %p3231_p7 = pnand %p2853_p5, %p3209_p4  ;;  %s218_s9 = int_to_ptr.vmem [resolvable:$true] %s217_s9 }
  0x14   : > { %s3235_s11 = scalar_lea.sflag [#allocation6], %s205_s25  ;;  %s3138_s12 = smov 1024  }
  0x15   : > { %s3139_s13 = smov 512   ;;  %s3140_s14 = smov 32  }
  0x16   : > { %2844 = dma.hbm_to_vmem [thread:$0]  (!%p3231_p7), %s216_s7, 131072, %s218_s9, %s3235_s11, %s3138_s12, %s3139_s13, %s3140_s14  }
  0x17   : > { %s3241_s22 = sadd.s32 4294967295, %s3136_s20   ;;  %s2805_s23 = sadd.s32 4294967294, %s3136_s20  }
  0x18   : > { %p79_p8 = scmp.ne.s32.totalorder %s3120_s16, %s3116_s15  ;;  %p80_p9 = scmp.eq.s32.totalorder %s3241_s22, 0 }
  0x19   : > { %p157_p10 = scmp.eq.s32.totalorder %s3241_s22, 1  ;;  %p163_p11 = scmp.eq.s32.totalorder %s2805_s23, 1 }
  0x1a   : > { %p3250_p12 = por %p80_p9, %p79_p8  ;;  %p2806_p13 = scmp.ge.s32.totalorder %s3136_s20, 1 }
  0x1b   : > { %p3258_p0 = por %p157_p10, %p73_p1  ;;  %p3262_p2 = por %p163_p11, %p79_p8 }
  0x1c   : > { %p170_p4 = scmp.lt.s32.totalorder %s3136_s20, 3  ;;  %s4404_s0 = sld [smem:[#allocation12_spill]] }
  0x1d   : > { %s3141_s7 = smov [#allocation2]   ;;  %s2813_s9 = sshll.u32 %s207_s26, 2 }
  0x1e   : > { %p3270_p5 = pnand %p2806_p13, %p170_p4  ;;  %s187_s8 = sshll.u32 %s3141_s7, 4  ;;  %s188_s8 = int_to_ptr.vmem [resolvable:$true] %s187_s8 }
  0x1f   : > { %s2814_s12 = sshll.u32 %s3132_s19, 2  ;;  %s231_s30 = scalar_lea.vmem [#allocation7], %s2813_s9 }
  0x20   : > { %p2837_p1 = pneg %p3270_p5  ;;  %s235_s23 = scalar_lea.hbm %s4395_s2, %s2814_s12 }
  0x21   : > { %s237_s29 = sshll.u32 %s235_s23, 4  ;;  %248 = sbr.rel (%p3270_p5) target bundleno = 1047 (0x417), region = 36  ;;  %s238_s29 = int_to_ptr.hbm [resolvable:$true] %s237_s29 }
  0x22   : > { %s185_s5 = sshll.u32 %s4404_s0, 4  ;;  %p2838_p6 = pnand %p2837_p1, %p80_p9  ;;  %s186_s5 = int_to_ptr.hbm [resolvable:$true] %s185_s5 }
  0x23   : > { %s239_s0 = sshll.u32 %s231_s30, 4  ;;  %s240_s0 = int_to_ptr.vmem [resolvable:$true] %s239_s0 }
  0x24   : > { %2840 = dma.hbm_to_vmem [thread:$0]  (!%p2838_p6), %s186_s5, 2048, %s188_s8, [#allocation3]  }
  0x25   : > { %2847 = dma.hbm_to_vmem [thread:$0]  (!%p3231_p7), %s238_s29, 64, %s240_s0, %s3235_s11  }
  0x26   : > { %3103 = dma.done.wait (%p80_p9), [#allocation3], 2048  }
  0x27   : > { %3105 = vsyncadd (%p80_p9), [#allocation3], 4294965248  ;;  %s255_s26 = sand.u32 1, %s3241_s22   ;;  %s3295_s7 = sand.u32 1, %s3120_s16  }
  0x28   : > { %s2817_s5 = sshll.u32 %s3295_s7, 13  ;;  %s256_s8 = scalar_lea.sflag [#allocation6], %s255_s26 }
  0x29   : > { %s3298_s10 = scalar_lea.vmem [#allocation5], %s2817_s5 }
  0x2a   : > { %3107 = dma.done.wait (%p3250_p12), %s256_s8, 131136  }
  0x2b   : > { %3109 = vsyncadd (%p3250_p12), %s256_s8, 4294836160  ;;  %v387_v0 = vld [vmem:[%s3298_s10 + $0x1e0] sm:$0xff]  ;;  %s2818_s22 = sshll.u32 %s3295_s7, 2  ;;  %s2819_s6 = sshll.u32 %s3295_s7, 5 }
  0x2c   : > { %v515_v1 = vld [vmem:[%s3298_s10 + $0x5e0] sm:$0xff]  ;;  %1361 = vmatpush.msra.mxu0 %v387_v0  ;;  %s3710_s24 = scalar_lea.vmem [#allocation7], %s2818_s22  ;;  %s3837_s9 = scalar_lea.vmem [#allocation8], %s2819_s6 }
  0x2d   : > { %v383_v2 = vld [vmem:[%s3298_s10 + $0x1c0] sm:$0xff]  ;;  %1401 = vmatpush.msra.mxu2 %v515_v1  ;;  %s2826_s12 = sshll.u32 %s3128_s18, 5  ;;  %s2671_s29 = sshll.u32 %s3837_s9, 4  ;;  %s2672_s29 = int_to_ptr.vmem [resolvable:$true] %s2671_s29 }
  0x2e   : > { %v451_v3 = vld [vmem:[%s3298_s10 + $0x3e0] sm:$0xff]  ;;  %1362 = vmatpush.msra.mxu0 %v383_v2  ;;  %s2669_s23 = scalar_lea.hbm %s4397_s4, %s2826_s12  ;;  %s2656_s26 = scalar_lea.sflag [#allocation4], %s3295_s7 }
  0x2f   : > { %v511_v4 = vld [vmem:[%s3298_s10 + $0x5c0] sm:$0xff]  ;;  %1381 = vmatpush.msra.mxu1 %v451_v3  ;;  %s2673_s30 = sshll.u32 %s2669_s23, 4  ;;  %s3070_s0 = scalar_lea.hbm %s4397_s4, 64  ;;  %s2674_s30 = int_to_ptr.hbm [resolvable:$true] %s2673_s30 }
  0x30   : > { %v579_v5 = vld [vmem:[%s3298_s10 + $0x7e0] sm:$0xff]  ;;  %1402 = vmatpush.msra.mxu2 %v511_v4  ;;  %s3064_s5 = sshra.s32 %s2674_s30, 4  ;;  %s3065_s5 = int_to_ptr.hbm [resolvable:$true] %s3064_s5 }
  0x31   : > { %1421 = vmatpush.msra.mxu3 %v579_v5  ;;  %v379_v6 = vld [vmem:[%s3298_s10 + $0x1a0] sm:$0xff]  ;;  %s3066_s18 = scalar_lea.hbm %s3065_s5, 32  ;;  %p3071_p10 = scmp.lt.s32.totalorder %s3065_s5, %s4397_s4 }
  0x32   : > { %v447_v7 = vld [vmem:[%s3298_s10 + $0x3c0] sm:$0xff]  ;;  %1363 = vmatpush.msra.mxu0 %v379_v6  ;;  %p3067_p7 = scmp.ne.s32.totalorder %s3065_s5, %s3066_s18  ;;  %p3072_p11 = scmp.lt.s32.totalorder %s3070_s0, %s3066_s18 }
  0x33   : > { %v507_v8 = vld [vmem:[%s3298_s10 + $0x5a0] sm:$0xff]  ;;  %1382 = vmatpush.msra.mxu1 %v447_v7 }
  0x34   : > { %v575_v9 = vld [vmem:[%s3298_s10 + $0x7c0] sm:$0xff]  ;;  %1403 = vmatpush.msra.mxu2 %v507_v8  ;;  %p3068_p8 = pnand %p3067_p7, %p3258_p0  ;;  %p3073_p12 = por %p3072_p11, %p3071_p10 }
  0x35   : > { %v443_v10 = vld [vmem:[%s3298_s10 + $0x3a0] sm:$0xff]  ;;  %1422 = vmatpush.msra.mxu3 %v575_v9 }
  0x36   : > { %v375_v11 = vld [vmem:[%s3298_s10 + $0x180] sm:$0xff]  ;;  %1383 = vmatpush.msra.mxu1 %v443_v10  ;;  %p3069_p9 = pneg %p3068_p8 }
  0x37   : > { %v503_v12 = vld [vmem:[%s3298_s10 + $0x580] sm:$0xff]  ;;  %1364 = vmatpush.msra.mxu0 %v375_v11 }
  0x38   : > { %v571_v13 = vld [vmem:[%s3298_s10 + $0x7a0] sm:$0xff]  ;;  %1404 = vmatpush.msra.mxu2 %v503_v12  ;;  %p3074_p13 = pnand %p3073_p12, %p3069_p9 }
  0x39   : > { %v439_v14 = vld [vmem:[%s3298_s10 + $0x380] sm:$0xff]  ;;  %1423 = vmatpush.msra.mxu3 %v571_v13 }
  0x3a   : > { %v567_v15 = vld [vmem:[%s3298_s10 + $0x780] sm:$0xff]  ;;  %1384 = vmatpush.msra.mxu1 %v439_v14 }
  0x3b   : > { %v371_v16 = vld [vmem:[%s3298_s10 + $0x160] sm:$0xff]  ;;  %1424 = vmatpush.msra.mxu3 %v567_v15 }
  0x3c   : > { %v499_v17 = vld [vmem:[%s3298_s10 + $0x560] sm:$0xff]  ;;  %1365 = vmatpush.msra.mxu0 %v371_v16 }
  0x3d   : > { %v435_v18 = vld [vmem:[%s3298_s10 + $0x360] sm:$0xff]  ;;  %1405 = vmatpush.msra.mxu2 %v499_v17 }
  0x3e   : > { %v563_v19 = vld [vmem:[%s3298_s10 + $0x760] sm:$0xff]  ;;  %1385 = vmatpush.msra.mxu1 %v435_v18 }
  0x3f   : > { %v367_v20 = vld [vmem:[%s3298_s10 + $0x140] sm:$0xff]  ;;  %1425 = vmatpush.msra.mxu3 %v563_v19 }
  0x40   : > { %v495_v21 = vld [vmem:[%s3298_s10 + $0x540] sm:$0xff]  ;;  %1366 = vmatpush.msra.mxu0 %v367_v20 }
  0x41   : > { %v431_v22 = vld [vmem:[%s3298_s10 + $0x340] sm:$0xff]  ;;  %1406 = vmatpush.msra.mxu2 %v495_v21 }
  0x42   : > { %v559_v23 = vld [vmem:[%s3298_s10 + $0x740] sm:$0xff]  ;;  %1386 = vmatpush.msra.mxu1 %v431_v22 }
  0x43   : > { %v363_v24 = vld [vmem:[%s3298_s10 + $0x120] sm:$0xff]  ;;  %1426 = vmatpush.msra.mxu3 %v559_v23 }
  0x44   : > { %v491_v25 = vld [vmem:[%s3298_s10 + $0x520] sm:$0xff]  ;;  %1367 = vmatpush.msra.mxu0 %v363_v24 }
  0x45   : > { %v427_v26 = vld [vmem:[%s3298_s10 + $0x320] sm:$0xff]  ;;  %1407 = vmatpush.msra.mxu2 %v491_v25 }
  0x46   : > { %v555_v27 = vld [vmem:[%s3298_s10 + $0x720] sm:$0xff]  ;;  %1387 = vmatpush.msra.mxu1 %v427_v26 }
  0x47   : > { %v359_v28 = vld [vmem:[%s3298_s10 + $0x100] sm:$0xff]  ;;  %1427 = vmatpush.msra.mxu3 %v555_v27 }
  0x48   : > { %v487_v29 = vld [vmem:[%s3298_s10 + $0x500] sm:$0xff]  ;;  %1368 = vmatpush.msra.mxu0 %v359_v28 }
  0x49   : > { %v423_v30 = vld [vmem:[%s3298_s10 + $0x300] sm:$0xff]  ;;  %1408 = vmatpush.msra.mxu2 %v487_v29 }
  0x4a   : > { %v551_v31 = vld [vmem:[%s3298_s10 + $0x700] sm:$0xff]  ;;  %1388 = vmatpush.msra.mxu1 %v423_v30 }
  0x4b   : > { %v355_v32 = vld [vmem:[%s3298_s10 + $0xe0] sm:$0xff]  ;;  %1428 = vmatpush.msra.mxu3 %v551_v31 }
  0x4c   : > { %v483_v33 = vld [vmem:[%s3298_s10 + $0x4e0] sm:$0xff]  ;;  %1369 = vmatpush.msra.mxu0 %v355_v32 }
  0x4d   : > { %v419_v34 = vld [vmem:[%s3298_s10 + $0x2e0] sm:$0xff]  ;;  %1409 = vmatpush.msra.mxu2 %v483_v33 }
  0x4e   : > { %v547_v35 = vld [vmem:[%s3298_s10 + $0x6e0] sm:$0xff]  ;;  %1389 = vmatpush.msra.mxu1 %v419_v34 }
  0x4f   : > { %v351_v36 = vld [vmem:[%s3298_s10 + $0xc0] sm:$0xff]  ;;  %1429 = vmatpush.msra.mxu3 %v547_v35 }
  0x50   : > { %v479_v37 = vld [vmem:[%s3298_s10 + $0x4c0] sm:$0xff]  ;;  %1370 = vmatpush.msra.mxu0 %v351_v36 }
  0x51   : > { %v415_v38 = vld [vmem:[%s3298_s10 + $0x2c0] sm:$0xff]  ;;  %1410 = vmatpush.msra.mxu2 %v479_v37 }
  0x52   : > { %v543_v39 = vld [vmem:[%s3298_s10 + $0x6c0] sm:$0xff]  ;;  %1390 = vmatpush.msra.mxu1 %v415_v38 }
  0x53   : > { %v347_v40 = vld [vmem:[%s3298_s10 + $0xa0] sm:$0xff]  ;;  %1430 = vmatpush.msra.mxu3 %v543_v39 }
  0x54   : > { %v475_v41 = vld [vmem:[%s3298_s10 + $0x4a0] sm:$0xff]  ;;  %1371 = vmatpush.msra.mxu0 %v347_v40 }
  0x55   : > { %v411_v42 = vld [vmem:[%s3298_s10 + $0x2a0] sm:$0xff]  ;;  %1411 = vmatpush.msra.mxu2 %v475_v41 }
  0x56   : > { %v539_v43 = vld [vmem:[%s3298_s10 + $0x6a0] sm:$0xff]  ;;  %1391 = vmatpush.msra.mxu1 %v411_v42 }
  0x57   : > { %v343_v44 = vld [vmem:[%s3298_s10 + $0x80] sm:$0xff]  ;;  %1431 = vmatpush.msra.mxu3 %v539_v43 }
  0x58   : > { %v471_v45 = vld [vmem:[%s3298_s10 + $0x480] sm:$0xff]  ;;  %1372 = vmatpush.msra.mxu0 %v343_v44 }
  0x59   : > { %v407_v46 = vld [vmem:[%s3298_s10 + $0x280] sm:$0xff]  ;;  %1412 = vmatpush.msra.mxu2 %v471_v45 }
  0x5a   : > { %v535_v47 = vld [vmem:[%s3298_s10 + $0x680] sm:$0xff]  ;;  %1392 = vmatpush.msra.mxu1 %v407_v46 }
  0x5b   : > { %v339_v48 = vld [vmem:[%s3298_s10 + $0x60] sm:$0xff]  ;;  %1432 = vmatpush.msra.mxu3 %v535_v47 }
  0x5c   : > { %v467_v49 = vld [vmem:[%s3298_s10 + $0x460] sm:$0xff]  ;;  %1373 = vmatpush.msra.mxu0 %v339_v48 }
  0x5d   : > { %v403_v50 = vld [vmem:[%s3298_s10 + $0x260] sm:$0xff]  ;;  %1413 = vmatpush.msra.mxu2 %v467_v49 }
  0x5e   : > { %v531_v51 = vld [vmem:[%s3298_s10 + $0x660] sm:$0xff]  ;;  %1393 = vmatpush.msra.mxu1 %v403_v50 }
  0x5f   : > { %v335_v52 = vld [vmem:[%s3298_s10 + $0x40] sm:$0xff]  ;;  %1433 = vmatpush.msra.mxu3 %v531_v51 }
  0x60   : > { %v463_v53 = vld [vmem:[%s3298_s10 + $0x440] sm:$0xff]  ;;  %1374 = vmatpush.msra.mxu0 %v335_v52 }
  0x61   : > { %v399_v54 = vld [vmem:[%s3298_s10 + $0x240] sm:$0xff]  ;;  %1414 = vmatpush.msra.mxu2 %v463_v53 }
  0x62   : > { %v527_v55 = vld [vmem:[%s3298_s10 + $0x640] sm:$0xff]  ;;  %1394 = vmatpush.msra.mxu1 %v399_v54 }
  0x63   : > { %v331_v56 = vld [vmem:[%s3298_s10 + $0x20] sm:$0xff]  ;;  %1434 = vmatpush.msra.mxu3 %v527_v55 }
  0x64   : > { %v459_v57 = vld [vmem:[%s3298_s10 + $0x420] sm:$0xff]  ;;  %1375 = vmatpush.msra.mxu0 %v331_v56 }
  0x65   : > { %v395_v58 = vld [vmem:[%s3298_s10 + $0x220] sm:$0xff]  ;;  %1415 = vmatpush.msra.mxu2 %v459_v57 }
  0x66   : > { %v523_v59 = vld [vmem:[%s3298_s10 + $0x620] sm:$0xff]  ;;  %1395 = vmatpush.msra.mxu1 %v395_v58 }
  0x67   : > { %v327_v60 = vld [vmem:[%s3298_s10] sm:$0xff]  ;;  %1435 = vmatpush.msra.mxu3 %v523_v59 }
  0x68   : > { %v455_v61 = vld [vmem:[%s3298_s10 + $0x400] sm:$0xff]  ;;  %1376 = vmatpush.msra.mxu0 %v327_v60 }
  0x69   : > { %v643_v62 = vld [vmem:[%s3298_s10 + $0x9e0] sm:$0xff]  ;;  %1416 = vmatpush.msra.mxu2 %v455_v61 }
  0x6a   : > { %v771_v63 = vld [vmem:[%s3298_s10 + $0xde0] sm:$0xff]  ;;  %1441 = vmatpush.msrb.mxu0 %v643_v62 }
  0x6b   : > { %v391_v0 = vld [vmem:[%s3298_s10 + $0x200] sm:$0xff]  ;;  %1481 = vmatpush.msrb.mxu2 %v771_v63  ;;  %v313_v63 = vld [vmem:[#allocation2 + $0x10] sm:$0xff] }
  0x6c   : > { %v519_v1 = vld [vmem:[%s3298_s10 + $0x600] sm:$0xff]  ;;  %1396 = vmatpush.msra.mxu1 %v391_v0  ;;  %1417 = vmatmul.f32.vlgmr.msra.gmra.mxu2 %v313_v63 }
  0x6d   : > { %v639_v2 = vld [vmem:[%s3298_s10 + $0x9c0] sm:$0xff]  ;;  %1436 = vmatpush.msra.mxu3 %v519_v1 }
  0x6e   : > { %v707_v3 = vld [vmem:[%s3298_s10 + $0xbe0] sm:$0xff]  ;;  %1442 = vmatpush.msrb.mxu0 %v639_v2 }
  0x6f   : > { %v767_v4 = vld [vmem:[%s3298_s10 + $0xdc0] sm:$0xff]  ;;  %1461 = vmatpush.msrb.mxu1 %v707_v3 }
  0x70   : > { %v835_v5 = vld [vmem:[%s3298_s10 + $0xfe0] sm:$0xff]  ;;  %1482 = vmatpush.msrb.mxu2 %v767_v4  ;;  %v312_v4 = vld [vmem:[#allocation2 + $0x8] sm:$0xff] }
  0x71   : > { %v635_v6 = vld [vmem:[%s3298_s10 + $0x9a0] sm:$0xff]  ;;  %1501 = vmatpush.msrb.mxu3 %v835_v5  ;;  %v314_v5 = vld [vmem:[#allocation2 + $0x18] sm:$0xff]  ;;  %1397 = vmatmul.f32.vlgmr.msra.gmra.mxu1 %v312_v4 }
  0x72   : > { %v703_v7 = vld [vmem:[%s3298_s10 + $0xbc0] sm:$0xff]  ;;  %1443 = vmatpush.msrb.mxu0 %v635_v6  ;;  %1437 = vmatmul.f32.vlgmr.msra.gmra.mxu3 %v314_v5 }
  0x73   : > { %v763_v8 = vld [vmem:[%s3298_s10 + $0xda0] sm:$0xff]  ;;  %1462 = vmatpush.msrb.mxu1 %v703_v7 }
  0x74   : > { %v831_v9 = vld [vmem:[%s3298_s10 + $0xfc0] sm:$0xff]  ;;  %1483 = vmatpush.msrb.mxu2 %v763_v8 }
  0x75   : > { %v631_v10 = vld [vmem:[%s3298_s10 + $0x980] sm:$0xff]  ;;  %1502 = vmatpush.msrb.mxu3 %v831_v9 }
  0x76   : > { %v699_v11 = vld [vmem:[%s3298_s10 + $0xba0] sm:$0xff]  ;;  %1444 = vmatpush.msrb.mxu0 %v631_v10 }
  0x77   : > { %v759_v12 = vld [vmem:[%s3298_s10 + $0xd80] sm:$0xff]  ;;  %1463 = vmatpush.msrb.mxu1 %v699_v11 }
  0x78   : > { %v827_v13 = vld [vmem:[%s3298_s10 + $0xfa0] sm:$0xff]  ;;  %1484 = vmatpush.msrb.mxu2 %v759_v12 }
  0x79   : > { %v627_v14 = vld [vmem:[%s3298_s10 + $0x960] sm:$0xff]  ;;  %1503 = vmatpush.msrb.mxu3 %v827_v13 }
  0x7a   : > { %v695_v15 = vld [vmem:[%s3298_s10 + $0xb80] sm:$0xff]  ;;  %1445 = vmatpush.msrb.mxu0 %v627_v14 }
  0x7b   : > { %v755_v16 = vld [vmem:[%s3298_s10 + $0xd60] sm:$0xff]  ;;  %1464 = vmatpush.msrb.mxu1 %v695_v15 }
  0x7c   : > { %v823_v17 = vld [vmem:[%s3298_s10 + $0xf80] sm:$0xff]  ;;  %1485 = vmatpush.msrb.mxu2 %v755_v16 }
  0x7d   : > { %v623_v18 = vld [vmem:[%s3298_s10 + $0x940] sm:$0xff]  ;;  %1504 = vmatpush.msrb.mxu3 %v823_v17 }
  0x7e   : > { %v691_v19 = vld [vmem:[%s3298_s10 + $0xb60] sm:$0xff]  ;;  %1446 = vmatpush.msrb.mxu0 %v623_v18  ;;  %v317_v18 = vld [vmem:[#allocation2 + $0x30] sm:$0xff] }
  0x7f   : > { %v751_v20 = vld [vmem:[%s3298_s10 + $0xd40] sm:$0xff]  ;;  %1465 = vmatpush.msrb.mxu1 %v691_v19 }
  0x80   : > { %v819_v21 = vld [vmem:[%s3298_s10 + $0xf60] sm:$0xff]  ;;  %1486 = vmatpush.msrb.mxu2 %v751_v20 }
  0x81   : > { %v619_v22 = vld [vmem:[%s3298_s10 + $0x920] sm:$0xff]  ;;  %1505 = vmatpush.msrb.mxu3 %v819_v21 }
  0x82   : > { %v687_v23 = vld [vmem:[%s3298_s10 + $0xb40] sm:$0xff]  ;;  %1447 = vmatpush.msrb.mxu0 %v619_v22 }
  0x83   : > { %v747_v24 = vld [vmem:[%s3298_s10 + $0xd20] sm:$0xff]  ;;  %1466 = vmatpush.msrb.mxu1 %v687_v23 }
  0x84   : > { %v815_v25 = vld [vmem:[%s3298_s10 + $0xf40] sm:$0xff]  ;;  %1487 = vmatpush.msrb.mxu2 %v747_v24  ;;  %v318_v24 = vld [vmem:[#allocation2 + $0x38] sm:$0xff] }
  0x85   : > { %v615_v26 = vld [vmem:[%s3298_s10 + $0x900] sm:$0xff]  ;;  %1506 = vmatpush.msrb.mxu3 %v815_v25 }
  0x86   : > { %v683_v27 = vld [vmem:[%s3298_s10 + $0xb20] sm:$0xff]  ;;  %1448 = vmatpush.msrb.mxu0 %v615_v26 }
  0x87   : > { %v743_v28 = vld [vmem:[%s3298_s10 + $0xd00] sm:$0xff]  ;;  %1467 = vmatpush.msrb.mxu1 %v683_v27 }
  0x88   : > { %v811_v29 = vld [vmem:[%s3298_s10 + $0xf20] sm:$0xff]  ;;  %1488 = vmatpush.msrb.mxu2 %v743_v28 }
  0x89   : > { %v611_v30 = vld [vmem:[%s3298_s10 + $0x8e0] sm:$0xff]  ;;  %1507 = vmatpush.msrb.mxu3 %v811_v29  ;;  %v316_v29 = vld [vmem:[#allocation2 + $0x28] sm:$0xff] }
  0x8a   : > { %v679_v31 = vld [vmem:[%s3298_s10 + $0xb00] sm:$0xff]  ;;  %1449 = vmatpush.msrb.mxu0 %v611_v30 }
  0x8b   : > { %v739_v32 = vld [vmem:[%s3298_s10 + $0xce0] sm:$0xff]  ;;  %1468 = vmatpush.msrb.mxu1 %v679_v31 }
  0x8c   : > { %v807_v33 = vld [vmem:[%s3298_s10 + $0xf00] sm:$0xff]  ;;  %1489 = vmatpush.msrb.mxu2 %v739_v32 }
  0x8d   : > { %v607_v34 = vld [vmem:[%s3298_s10 + $0x8c0] sm:$0xff]  ;;  %1508 = vmatpush.msrb.mxu3 %v807_v33 }
  0x8e   : > { %v675_v35 = vld [vmem:[%s3298_s10 + $0xae0] sm:$0xff]  ;;  %1450 = vmatpush.msrb.mxu0 %v607_v34 }
  0x8f   : > { %v735_v36 = vld [vmem:[%s3298_s10 + $0xcc0] sm:$0xff]  ;;  %1469 = vmatpush.msrb.mxu1 %v675_v35 }
  0x90   : > { %v803_v37 = vld [vmem:[%s3298_s10 + $0xee0] sm:$0xff]  ;;  %1490 = vmatpush.msrb.mxu2 %v735_v36 }
  0x91   : > { %v603_v38 = vld [vmem:[%s3298_s10 + $0x8a0] sm:$0xff]  ;;  %1509 = vmatpush.msrb.mxu3 %v803_v37 }
  0x92   : > { %v671_v39 = vld [vmem:[%s3298_s10 + $0xac0] sm:$0xff]  ;;  %1451 = vmatpush.msrb.mxu0 %v603_v38 }
  0x93   : > { %v731_v40 = vld [vmem:[%s3298_s10 + $0xca0] sm:$0xff]  ;;  %1470 = vmatpush.msrb.mxu1 %v671_v39 }
  0x94   : > { %v799_v41 = vld [vmem:[%s3298_s10 + $0xec0] sm:$0xff]  ;;  %1491 = vmatpush.msrb.mxu2 %v731_v40 }
  0x95   : > { %v599_v42 = vld [vmem:[%s3298_s10 + $0x880] sm:$0xff]  ;;  %1510 = vmatpush.msrb.mxu3 %v799_v41 }
  0x96   : > { %v667_v43 = vld [vmem:[%s3298_s10 + $0xaa0] sm:$0xff]  ;;  %1452 = vmatpush.msrb.mxu0 %v599_v42 }
  0x97   : > { %v727_v44 = vld [vmem:[%s3298_s10 + $0xc80] sm:$0xff]  ;;  %1471 = vmatpush.msrb.mxu1 %v667_v43 }
  0x98   : > { %v795_v45 = vld [vmem:[%s3298_s10 + $0xea0] sm:$0xff]  ;;  %1492 = vmatpush.msrb.mxu2 %v727_v44 }
  0x99   : > { %v595_v46 = vld [vmem:[%s3298_s10 + $0x860] sm:$0xff]  ;;  %1511 = vmatpush.msrb.mxu3 %v795_v45 }
  0x9a   : > { %v663_v47 = vld [vmem:[%s3298_s10 + $0xa80] sm:$0xff]  ;;  %1453 = vmatpush.msrb.mxu0 %v595_v46 }
  0x9b   : > { %v723_v48 = vld [vmem:[%s3298_s10 + $0xc60] sm:$0xff]  ;;  %1472 = vmatpush.msrb.mxu1 %v663_v47 }
  0x9c   : > { %v791_v49 = vld [vmem:[%s3298_s10 + $0xe80] sm:$0xff]  ;;  %1493 = vmatpush.msrb.mxu2 %v723_v48 }
  0x9d   : > { %v591_v50 = vld [vmem:[%s3298_s10 + $0x840] sm:$0xff]  ;;  %1512 = vmatpush.msrb.mxu3 %v791_v49 }
  0x9e   : > { %v659_v51 = vld [vmem:[%s3298_s10 + $0xa60] sm:$0xff]  ;;  %1454 = vmatpush.msrb.mxu0 %v591_v50 }
  0x9f   : > { %v719_v52 = vld [vmem:[%s3298_s10 + $0xc40] sm:$0xff]  ;;  %1473 = vmatpush.msrb.mxu1 %v659_v51 }
  0xa0   : > { %v787_v53 = vld [vmem:[%s3298_s10 + $0xe60] sm:$0xff]  ;;  %1494 = vmatpush.msrb.mxu2 %v719_v52 }
  0xa1   : > { %v587_v54 = vld [vmem:[%s3298_s10 + $0x820] sm:$0xff]  ;;  %1513 = vmatpush.msrb.mxu3 %v787_v53 }
  0xa2   : > { %v655_v55 = vld [vmem:[%s3298_s10 + $0xa40] sm:$0xff]  ;;  %1455 = vmatpush.msrb.mxu0 %v587_v54 }
  0xa3   : > { %v715_v56 = vld [vmem:[%s3298_s10 + $0xc20] sm:$0xff]  ;;  %1474 = vmatpush.msrb.mxu1 %v655_v55 }
  0xa4   : > { %v783_v57 = vld [vmem:[%s3298_s10 + $0xe40] sm:$0xff]  ;;  %1495 = vmatpush.msrb.mxu2 %v715_v56 }
  0xa5   : > { %v583_v58 = vld [vmem:[%s3298_s10 + $0x800] sm:$0xff]  ;;  %1514 = vmatpush.msrb.mxu3 %v783_v57 }
  0xa6   : > { %v651_v59 = vld [vmem:[%s3298_s10 + $0xa20] sm:$0xff]  ;;  %1456 = vmatpush.msrb.mxu0 %v583_v58 }
  0xa7   : > { %v711_v60 = vld [vmem:[%s3298_s10 + $0xc00] sm:$0xff]  ;;  %1475 = vmatpush.msrb.mxu1 %v651_v59 }
  0xa8   : > { %v779_v61 = vld [vmem:[%s3298_s10 + $0xe20] sm:$0xff]  ;;  %1496 = vmatpush.msrb.mxu2 %v711_v60 }
  0xa9   : > { %v311_v62 = vld [vmem:[#allocation2] sm:$0xff]  ;;  %1515 = vmatpush.msrb.mxu3 %v779_v61  ;;  %1497 = vmatmul.f32.vlgmr.msrb.gmra.mxu2 %v317_v18 }
  0xaa   : > { %v899_v0 = vld [vmem:[%s3298_s10 + $0x11e0] sm:$0xff]  ;;  %1377 = vmatmul.f32.vlgmr.msra.gmra.mxu0 %v311_v62 }
  0xab   : > { %v1027_v1 = vld [vmem:[%s3298_s10 + $0x15e0] sm:$0xff]  ;;  %1521 = vmatpush.msra.mxu0 %v899_v0 }
  0xac   : > { %v647_v2 = vld [vmem:[%s3298_s10 + $0xa00] sm:$0xff]  ;;  %1561 = vmatpush.msra.mxu2 %v1027_v1 }
  0xad   : > { %v775_v3 = vld [vmem:[%s3298_s10 + $0xe00] sm:$0xff]  ;;  %1476 = vmatpush.msrb.mxu1 %v647_v2 }
  0xae   : > { %v895_v6 = vld [vmem:[%s3298_s10 + $0x11c0] sm:$0xff]  ;;  %1516 = vmatpush.msrb.mxu3 %v775_v3  ;;  %1477 = vmatmul.f32.vlgmr.msrb.gmra.mxu1 %v316_v29 }
  0xaf   : > { %v963_v7 = vld [vmem:[%s3298_s10 + $0x13e0] sm:$0xff]  ;;  %1522 = vmatpush.msra.mxu0 %v895_v6  ;;  %1517 = vmatmul.f32.vlgmr.msrb.gmra.mxu3 %v318_v24 }
  0xb0   : > { %v1023_v8 = vld [vmem:[%s3298_s10 + $0x15c0] sm:$0xff]  ;;  %1541 = vmatpush.msra.mxu1 %v963_v7  ;;  %v321_v7 = vld [vmem:[#allocation2 + $0x50] sm:$0xff] }
  0xb1   : > { %v1091_v9 = vld [vmem:[%s3298_s10 + $0x17e0] sm:$0xff]  ;;  %1562 = vmatpush.msra.mxu2 %v1023_v8 }
  0xb2   : > { %v891_v10 = vld [vmem:[%s3298_s10 + $0x11a0] sm:$0xff]  ;;  %1581 = vmatpush.msra.mxu3 %v1091_v9 }
  0xb3   : > { %v959_v11 = vld [vmem:[%s3298_s10 + $0x13c0] sm:$0xff]  ;;  %1523 = vmatpush.msra.mxu0 %v891_v10 }
  0xb4   : > { %v1019_v12 = vld [vmem:[%s3298_s10 + $0x15a0] sm:$0xff]  ;;  %1542 = vmatpush.msra.mxu1 %v959_v11 }
  0xb5   : > { %v1087_v13 = vld [vmem:[%s3298_s10 + $0x17c0] sm:$0xff]  ;;  %1563 = vmatpush.msra.mxu2 %v1019_v12  ;;  %v320_v12 = vld [vmem:[#allocation2 + $0x48] sm:$0xff] }
  0xb6   : > { %v887_v14 = vld [vmem:[%s3298_s10 + $0x1180] sm:$0xff]  ;;  %1582 = vmatpush.msra.mxu3 %v1087_v13  ;;  %v322_v13 = vld [vmem:[#allocation2 + $0x58] sm:$0xff] }
  0xb7   : > { %v955_v15 = vld [vmem:[%s3298_s10 + $0x13a0] sm:$0xff]  ;;  %1524 = vmatpush.msra.mxu0 %v887_v14 }
  0xb8   : > { %v1015_v16 = vld [vmem:[%s3298_s10 + $0x1580] sm:$0xff]  ;;  %1543 = vmatpush.msra.mxu1 %v955_v15 }
  0xb9   : > { %v1083_v17 = vld [vmem:[%s3298_s10 + $0x17a0] sm:$0xff]  ;;  %1564 = vmatpush.msra.mxu2 %v1015_v16 }
  0xba   : > { %v883_v19 = vld [vmem:[%s3298_s10 + $0x1160] sm:$0xff]  ;;  %1583 = vmatpush.msra.mxu3 %v1083_v17 }
  0xbb   : > { %v951_v20 = vld [vmem:[%s3298_s10 + $0x1380] sm:$0xff]  ;;  %1525 = vmatpush.msra.mxu0 %v883_v19 }
  0xbc   : > { %v1011_v21 = vld [vmem:[%s3298_s10 + $0x1560] sm:$0xff]  ;;  %1544 = vmatpush.msra.mxu1 %v951_v20 }
  0xbd   : > { %v1079_v22 = vld [vmem:[%s3298_s10 + $0x1780] sm:$0xff]  ;;  %1565 = vmatpush.msra.mxu2 %v1011_v21 }
  0xbe   : > { %v315_v23 = vld [vmem:[#allocation2 + $0x20] sm:$0xff]  ;;  %1584 = vmatpush.msra.mxu3 %v1079_v22 }
  0xbf   : > { %v879_v25 = vld [vmem:[%s3298_s10 + $0x1140] sm:$0xff]  ;;  %1457 = vmatmul.f32.vlgmr.msrb.gmra.mxu0 %v315_v23 }
  0xc0   : > { %v947_v26 = vld [vmem:[%s3298_s10 + $0x1360] sm:$0xff]  ;;  %1526 = vmatpush.msra.mxu0 %v879_v25 }
  0xc1   : > { %v1007_v27 = vld [vmem:[%s3298_s10 + $0x1540] sm:$0xff]  ;;  %1545 = vmatpush.msra.mxu1 %v947_v26 }
  0xc2   : > { %v1075_v28 = vld [vmem:[%s3298_s10 + $0x1760] sm:$0xff]  ;;  %1566 = vmatpush.msra.mxu2 %v1007_v27 }
  0xc3   : > { %v875_v30 = vld [vmem:[%s3298_s10 + $0x1120] sm:$0xff]  ;;  %1585 = vmatpush.msra.mxu3 %v1075_v28 }
  0xc4   : > { %v943_v31 = vld [vmem:[%s3298_s10 + $0x1340] sm:$0xff]  ;;  %1527 = vmatpush.msra.mxu0 %v875_v30 }
  0xc5   : > { %v1003_v32 = vld [vmem:[%s3298_s10 + $0x1520] sm:$0xff]  ;;  %1546 = vmatpush.msra.mxu1 %v943_v31 }
  0xc6   : > { %v1071_v33 = vld [vmem:[%s3298_s10 + $0x1740] sm:$0xff]  ;;  %1567 = vmatpush.msra.mxu2 %v1003_v32 }
  0xc7   : > { %v871_v34 = vld [vmem:[%s3298_s10 + $0x1100] sm:$0xff]  ;;  %1586 = vmatpush.msra.mxu3 %v1071_v33 }
  0xc8   : > { %v939_v35 = vld [vmem:[%s3298_s10 + $0x1320] sm:$0xff]  ;;  %1528 = vmatpush.msra.mxu0 %v871_v34 }
  0xc9   : > { %v999_v36 = vld [vmem:[%s3298_s10 + $0x1500] sm:$0xff]  ;;  %1547 = vmatpush.msra.mxu1 %v939_v35 }
  0xca   : > { %v1067_v37 = vld [vmem:[%s3298_s10 + $0x1720] sm:$0xff]  ;;  %1568 = vmatpush.msra.mxu2 %v999_v36 }
  0xcb   : > { %v867_v38 = vld [vmem:[%s3298_s10 + $0x10e0] sm:$0xff]  ;;  %1587 = vmatpush.msra.mxu3 %v1067_v37 }
  0xcc   : > { %v935_v39 = vld [vmem:[%s3298_s10 + $0x1300] sm:$0xff]  ;;  %1529 = vmatpush.msra.mxu0 %v867_v38 }
  0xcd   : > { %v995_v40 = vld [vmem:[%s3298_s10 + $0x14e0] sm:$0xff]  ;;  %1548 = vmatpush.msra.mxu1 %v935_v39 }
  0xce   : > { %v1063_v41 = vld [vmem:[%s3298_s10 + $0x1700] sm:$0xff]  ;;  %1569 = vmatpush.msra.mxu2 %v995_v40 }
  0xcf   : > { %v863_v42 = vld [vmem:[%s3298_s10 + $0x10c0] sm:$0xff]  ;;  %1588 = vmatpush.msra.mxu3 %v1063_v41 }
  0xd0   : > { %v931_v43 = vld [vmem:[%s3298_s10 + $0x12e0] sm:$0xff]  ;;  %1530 = vmatpush.msra.mxu0 %v863_v42 }
  0xd1   : > { %v991_v44 = vld [vmem:[%s3298_s10 + $0x14c0] sm:$0xff]  ;;  %1549 = vmatpush.msra.mxu1 %v931_v43 }
  0xd2   : > { %v1059_v45 = vld [vmem:[%s3298_s10 + $0x16e0] sm:$0xff]  ;;  %1570 = vmatpush.msra.mxu2 %v991_v44 }
  0xd3   : > { %v859_v46 = vld [vmem:[%s3298_s10 + $0x10a0] sm:$0xff]  ;;  %1589 = vmatpush.msra.mxu3 %v1059_v45 }
  0xd4   : > { %v927_v47 = vld [vmem:[%s3298_s10 + $0x12c0] sm:$0xff]  ;;  %1531 = vmatpush.msra.mxu0 %v859_v46 }
  0xd5   : > { %v987_v48 = vld [vmem:[%s3298_s10 + $0x14a0] sm:$0xff]  ;;  %1550 = vmatpush.msra.mxu1 %v927_v47 }
  0xd6   : > { %v1055_v49 = vld [vmem:[%s3298_s10 + $0x16c0] sm:$0xff]  ;;  %1571 = vmatpush.msra.mxu2 %v987_v48 }
  0xd7   : > { %v855_v50 = vld [vmem:[%s3298_s10 + $0x1080] sm:$0xff]  ;;  %1590 = vmatpush.msra.mxu3 %v1055_v49 }
  0xd8   : > { %v923_v51 = vld [vmem:[%s3298_s10 + $0x12a0] sm:$0xff]  ;;  %1532 = vmatpush.msra.mxu0 %v855_v50 }
  0xd9   : > { %v983_v52 = vld [vmem:[%s3298_s10 + $0x1480] sm:$0xff]  ;;  %1551 = vmatpush.msra.mxu1 %v923_v51 }
  0xda   : > { %v1051_v53 = vld [vmem:[%s3298_s10 + $0x16a0] sm:$0xff]  ;;  %1572 = vmatpush.msra.mxu2 %v983_v52 }
  0xdb   : > { %v851_v54 = vld [vmem:[%s3298_s10 + $0x1060] sm:$0xff]  ;;  %1591 = vmatpush.msra.mxu3 %v1051_v53 }
  0xdc   : > { %v919_v55 = vld [vmem:[%s3298_s10 + $0x1280] sm:$0xff]  ;;  %1533 = vmatpush.msra.mxu0 %v851_v54 }
  0xdd   : > { %v979_v56 = vld [vmem:[%s3298_s10 + $0x1460] sm:$0xff]  ;;  %1552 = vmatpush.msra.mxu1 %v919_v55 }
  0xde   : > { %v1047_v57 = vld [vmem:[%s3298_s10 + $0x1680] sm:$0xff]  ;;  %1573 = vmatpush.msra.mxu2 %v979_v56 }
  0xdf   : > { %v847_v58 = vld [vmem:[%s3298_s10 + $0x1040] sm:$0xff]  ;;  %1592 = vmatpush.msra.mxu3 %v1047_v57 }
  0xe0   : > { %v915_v59 = vld [vmem:[%s3298_s10 + $0x1260] sm:$0xff]  ;;  %1534 = vmatpush.msra.mxu0 %v847_v58 }
  0xe1   : > { %v975_v60 = vld [vmem:[%s3298_s10 + $0x1440] sm:$0xff]  ;;  %1553 = vmatpush.msra.mxu1 %v915_v59 }
  0xe2   : > { %v1043_v61 = vld [vmem:[%s3298_s10 + $0x1660] sm:$0xff]  ;;  %1574 = vmatpush.msra.mxu2 %v975_v60 }
  0xe3   : > { %v843_v62 = vld [vmem:[%s3298_s10 + $0x1020] sm:$0xff]  ;;  %1593 = vmatpush.msra.mxu3 %v1043_v61 }
  0xe4   : > { %v911_v63 = vld [vmem:[%s3298_s10 + $0x1240] sm:$0xff]  ;;  %1535 = vmatpush.msra.mxu0 %v843_v62 }
  0xe5   : > { %v971_v0 = vld [vmem:[%s3298_s10 + $0x1420] sm:$0xff]  ;;  %1554 = vmatpush.msra.mxu1 %v911_v63 }
  0xe6   : > { %v1039_v1 = vld [vmem:[%s3298_s10 + $0x1640] sm:$0xff]  ;;  %1575 = vmatpush.msra.mxu2 %v971_v0 }
  0xe7   : > { %v839_v2 = vld [vmem:[%s3298_s10 + $0x1000] sm:$0xff]  ;;  %1594 = vmatpush.msra.mxu3 %v1039_v1 }
  0xe8   : > { %v907_v3 = vld [vmem:[%s3298_s10 + $0x1220] sm:$0xff]  ;;  %1536 = vmatpush.msra.mxu0 %v839_v2 }
  0xe9   : > { %v967_v4 = vld [vmem:[%s3298_s10 + $0x1400] sm:$0xff]  ;;  %1555 = vmatpush.msra.mxu1 %v907_v3 }
  0xea   : > { %v1035_v5 = vld [vmem:[%s3298_s10 + $0x1620] sm:$0xff]  ;;  %1576 = vmatpush.msra.mxu2 %v967_v4 }
  0xeb   : > { %v319_v6 = vld [vmem:[#allocation2 + $0x40] sm:$0xff]  ;;  %1595 = vmatpush.msra.mxu3 %v1035_v5  ;;  %1577 = vmatmul.f32.vlgmr.msra.gmra.mxu2 %v321_v7 }
  0xec   : > { %v1155_v8 = vld [vmem:[%s3298_s10 + $0x19e0] sm:$0xff]  ;;  %1537 = vmatmul.f32.vlgmr.msra.gmra.mxu0 %v319_v6 }
  0xed   : > { %v1283_v9 = vld [vmem:[%s3298_s10 + $0x1de0] sm:$0xff]  ;;  %1601 = vmatpush.msrb.mxu0 %v1155_v8 }
  0xee   : > { %v903_v10 = vld [vmem:[%s3298_s10 + $0x1200] sm:$0xff]  ;;  %1641 = vmatpush.msrb.mxu2 %v1283_v9 }
  0xef   : > { %v1031_v11 = vld [vmem:[%s3298_s10 + $0x1600] sm:$0xff]  ;;  %1556 = vmatpush.msra.mxu1 %v903_v10 }
  0xf0   : > { %v1151_v14 = vld [vmem:[%s3298_s10 + $0x19c0] sm:$0xff]  ;;  %1596 = vmatpush.msra.mxu3 %v1031_v11  ;;  %1557 = vmatmul.f32.vlgmr.msra.gmra.mxu1 %v320_v12  ;;  %v325_v11 = vld [vmem:[#allocation2 + $0x70] sm:$0xff]  ;;  %v388_v12 = vld [vmem:[%s3298_s10 + $0x1e8] sm:$0xff] }
  0xf1   : > { %v1219_v15 = vld [vmem:[%s3298_s10 + $0x1be0] sm:$0xff]  ;;  %1597 = vmatmul.f32.vlgmr.msra.gmra.mxu3 %v322_v13  ;;  %1602 = vmatpush.msrb.mxu0 %v1151_v14  ;;  %v516_v13 = vld [vmem:[%s3298_s10 + $0x5e8] sm:$0xff] }
  0xf2   : > { %v1279_v16 = vld [vmem:[%s3298_s10 + $0x1dc0] sm:$0xff]  ;;  %1621 = vmatpush.msrb.mxu1 %v1219_v15 }
  0xf3   : > { %v1347_v17 = vld [vmem:[%s3298_s10 + $0x1fe0] sm:$0xff]  ;;  %1642 = vmatpush.msrb.mxu2 %v1279_v16  ;;  %v324_v16 = vld [vmem:[#allocation2 + $0x68] sm:$0xff] }
  0xf4   : > { %v1147_v18 = vld [vmem:[%s3298_s10 + $0x19a0] sm:$0xff]  ;;  %1661 = vmatpush.msrb.mxu3 %v1347_v17  ;;  %v326_v17 = vld [vmem:[#allocation2 + $0x78] sm:$0xff] }
  0xf5   : > { %v1215_v19 = vld [vmem:[%s3298_s10 + $0x1bc0] sm:$0xff]  ;;  %1603 = vmatpush.msrb.mxu0 %v1147_v18  ;;  %v384_v18 = vld [vmem:[%s3298_s10 + $0x1c8] sm:$0xff] }
  0xf6   : > { %v1275_v20 = vld [vmem:[%s3298_s10 + $0x1da0] sm:$0xff]  ;;  %1622 = vmatpush.msrb.mxu1 %v1215_v19  ;;  %v452_v19 = vld [vmem:[%s3298_s10 + $0x3e8] sm:$0xff] }
  0xf7   : > { %v1343_v21 = vld [vmem:[%s3298_s10 + $0x1fc0] sm:$0xff]  ;;  %1643 = vmatpush.msrb.mxu2 %v1275_v20  ;;  %v512_v20 = vld [vmem:[%s3298_s10 + $0x5c8] sm:$0xff] }
  0xf8   : > { %v1143_v22 = vld [vmem:[%s3298_s10 + $0x1980] sm:$0xff]  ;;  %1662 = vmatpush.msrb.mxu3 %v1343_v21  ;;  %v580_v21 = vld [vmem:[%s3298_s10 + $0x7e8] sm:$0xff] }
  0xf9   : > { %v1211_v23 = vld [vmem:[%s3298_s10 + $0x1ba0] sm:$0xff]  ;;  %1604 = vmatpush.msrb.mxu0 %v1143_v22  ;;  %v380_v22 = vld [vmem:[%s3298_s10 + $0x1a8] sm:$0xff] }
  0xfa   : > { %v1271_v24 = vld [vmem:[%s3298_s10 + $0x1d80] sm:$0xff]  ;;  %1623 = vmatpush.msrb.mxu1 %v1211_v23  ;;  %v448_v23 = vld [vmem:[%s3298_s10 + $0x3c8] sm:$0xff] }
  0xfb   : > { %v1339_v25 = vld [vmem:[%s3298_s10 + $0x1fa0] sm:$0xff]  ;;  %1644 = vmatpush.msrb.mxu2 %v1271_v24  ;;  %v508_v24 = vld [vmem:[%s3298_s10 + $0x5a8] sm:$0xff] }
  0xfc   : > { %v1139_v26 = vld [vmem:[%s3298_s10 + $0x1960] sm:$0xff]  ;;  %1663 = vmatpush.msrb.mxu3 %v1339_v25  ;;  %v576_v25 = vld [vmem:[%s3298_s10 + $0x7c8] sm:$0xff] }
  0xfd   : > { %v1207_v27 = vld [vmem:[%s3298_s10 + $0x1b80] sm:$0xff]  ;;  %1605 = vmatpush.msrb.mxu0 %v1139_v26  ;;  %v376_v26 = vld [vmem:[%s3298_s10 + $0x188] sm:$0xff] }
  0xfe   : > { %v1267_v28 = vld [vmem:[%s3298_s10 + $0x1d60] sm:$0xff]  ;;  %1624 = vmatpush.msrb.mxu1 %v1207_v27  ;;  %v444_v27 = vld [vmem:[%s3298_s10 + $0x3a8] sm:$0xff] }
  0xff   : > { %v1335_v29 = vld [vmem:[%s3298_s10 + $0x1f80] sm:$0xff]  ;;  %1645 = vmatpush.msrb.mxu2 %v1267_v28  ;;  %v504_v28 = vld [vmem:[%s3298_s10 + $0x588] sm:$0xff] }
 0x100   : > { %v1135_v30 = vld [vmem:[%s3298_s10 + $0x1940] sm:$0xff]  ;;  %1664 = vmatpush.msrb.mxu3 %v1335_v29  ;;  %v572_v29 = vld [vmem:[%s3298_s10 + $0x7a8] sm:$0xff] }
 0x101   : > { %v1203_v31 = vld [vmem:[%s3298_s10 + $0x1b60] sm:$0xff]  ;;  %1606 = vmatpush.msrb.mxu0 %v1135_v30  ;;  %v372_v30 = vld [vmem:[%s3298_s10 + $0x168] sm:$0xff] }
 0x102   : > { %v1263_v32 = vld [vmem:[%s3298_s10 + $0x1d40] sm:$0xff]  ;;  %1625 = vmatpush.msrb.mxu1 %v1203_v31  ;;  %v440_v31 = vld [vmem:[%s3298_s10 + $0x388] sm:$0xff] }
 0x103   : > { %v1331_v33 = vld [vmem:[%s3298_s10 + $0x1f60] sm:$0xff]  ;;  %1646 = vmatpush.msrb.mxu2 %v1263_v32  ;;  %v500_v32 = vld [vmem:[%s3298_s10 + $0x568] sm:$0xff] }
 0x104   : > { %v1131_v34 = vld [vmem:[%s3298_s10 + $0x1920] sm:$0xff]  ;;  %1665 = vmatpush.msrb.mxu3 %v1331_v33  ;;  %v568_v33 = vld [vmem:[%s3298_s10 + $0x788] sm:$0xff] }
 0x105   : > { %v1199_v35 = vld [vmem:[%s3298_s10 + $0x1b40] sm:$0xff]  ;;  %1607 = vmatpush.msrb.mxu0 %v1131_v34  ;;  %v368_v34 = vld [vmem:[%s3298_s10 + $0x148] sm:$0xff] }
 0x106   : > { %v1259_v36 = vld [vmem:[%s3298_s10 + $0x1d20] sm:$0xff]  ;;  %1626 = vmatpush.msrb.mxu1 %v1199_v35  ;;  %v436_v35 = vld [vmem:[%s3298_s10 + $0x368] sm:$0xff] }
 0x107   : > { %v1327_v37 = vld [vmem:[%s3298_s10 + $0x1f40] sm:$0xff]  ;;  %1647 = vmatpush.msrb.mxu2 %v1259_v36  ;;  %v496_v36 = vld [vmem:[%s3298_s10 + $0x548] sm:$0xff] }
 0x108   : > { %v1127_v38 = vld [vmem:[%s3298_s10 + $0x1900] sm:$0xff]  ;;  %1666 = vmatpush.msrb.mxu3 %v1327_v37  ;;  %v564_v37 = vld [vmem:[%s3298_s10 + $0x768] sm:$0xff] }
 0x109   : > { %v1195_v39 = vld [vmem:[%s3298_s10 + $0x1b20] sm:$0xff]  ;;  %1608 = vmatpush.msrb.mxu0 %v1127_v38  ;;  %v364_v38 = vld [vmem:[%s3298_s10 + $0x128] sm:$0xff] }
 0x10a   : > { %v1255_v40 = vld [vmem:[%s3298_s10 + $0x1d00] sm:$0xff]  ;;  %1627 = vmatpush.msrb.mxu1 %v1195_v39  ;;  %v432_v39 = vld [vmem:[%s3298_s10 + $0x348] sm:$0xff] }
 0x10b   : > { %v1323_v41 = vld [vmem:[%s3298_s10 + $0x1f20] sm:$0xff]  ;;  %1648 = vmatpush.msrb.mxu2 %v1255_v40  ;;  %v492_v40 = vld [vmem:[%s3298_s10 + $0x528] sm:$0xff] }
 0x10c   : > { %v1123_v42 = vld [vmem:[%s3298_s10 + $0x18e0] sm:$0xff]  ;;  %1667 = vmatpush.msrb.mxu3 %v1323_v41  ;;  %v560_v41 = vld [vmem:[%s3298_s10 + $0x748] sm:$0xff] }
 0x10d   : > { %v1191_v43 = vld [vmem:[%s3298_s10 + $0x1b00] sm:$0xff]  ;;  %1609 = vmatpush.msrb.mxu0 %v1123_v42  ;;  %v360_v42 = vld [vmem:[%s3298_s10 + $0x108] sm:$0xff] }
 0x10e   : > { %v1251_v44 = vld [vmem:[%s3298_s10 + $0x1ce0] sm:$0xff]  ;;  %1628 = vmatpush.msrb.mxu1 %v1191_v43  ;;  %v428_v43 = vld [vmem:[%s3298_s10 + $0x328] sm:$0xff] }
 0x10f   : > { %v1319_v45 = vld [vmem:[%s3298_s10 + $0x1f00] sm:$0xff]  ;;  %1649 = vmatpush.msrb.mxu2 %v1251_v44  ;;  %v488_v44 = vld [vmem:[%s3298_s10 + $0x508] sm:$0xff] }
 0x110   : > { %v1119_v46 = vld [vmem:[%s3298_s10 + $0x18c0] sm:$0xff]  ;;  %1668 = vmatpush.msrb.mxu3 %v1319_v45  ;;  %v556_v45 = vld [vmem:[%s3298_s10 + $0x728] sm:$0xff] }
 0x111   : > { %v1187_v47 = vld [vmem:[%s3298_s10 + $0x1ae0] sm:$0xff]  ;;  %1610 = vmatpush.msrb.mxu0 %v1119_v46  ;;  %v356_v46 = vld [vmem:[%s3298_s10 + $0xe8] sm:$0xff] }
 0x112   : > { %v1247_v48 = vld [vmem:[%s3298_s10 + $0x1cc0] sm:$0xff]  ;;  %1629 = vmatpush.msrb.mxu1 %v1187_v47  ;;  %v424_v47 = vld [vmem:[%s3298_s10 + $0x308] sm:$0xff] }
 0x113   : > { %v1315_v49 = vld [vmem:[%s3298_s10 + $0x1ee0] sm:$0xff]  ;;  %1650 = vmatpush.msrb.mxu2 %v1247_v48  ;;  %v484_v48 = vld [vmem:[%s3298_s10 + $0x4e8] sm:$0xff] }
 0x114   : > { %v1115_v50 = vld [vmem:[%s3298_s10 + $0x18a0] sm:$0xff]  ;;  %1669 = vmatpush.msrb.mxu3 %v1315_v49  ;;  %v552_v49 = vld [vmem:[%s3298_s10 + $0x708] sm:$0xff] }
 0x115   : > { %v1183_v51 = vld [vmem:[%s3298_s10 + $0x1ac0] sm:$0xff]  ;;  %1611 = vmatpush.msrb.mxu0 %v1115_v50  ;;  %v352_v50 = vld [vmem:[%s3298_s10 + $0xc8] sm:$0xff] }
 0x116   : > { %v1243_v52 = vld [vmem:[%s3298_s10 + $0x1ca0] sm:$0xff]  ;;  %1630 = vmatpush.msrb.mxu1 %v1183_v51  ;;  %v420_v51 = vld [vmem:[%s3298_s10 + $0x2e8] sm:$0xff] }
 0x117   : > { %v1311_v53 = vld [vmem:[%s3298_s10 + $0x1ec0] sm:$0xff]  ;;  %1651 = vmatpush.msrb.mxu2 %v1243_v52  ;;  %v480_v52 = vld [vmem:[%s3298_s10 + $0x4c8] sm:$0xff] }
 0x118   : > { %v1111_v54 = vld [vmem:[%s3298_s10 + $0x1880] sm:$0xff]  ;;  %1670 = vmatpush.msrb.mxu3 %v1311_v53  ;;  %v548_v53 = vld [vmem:[%s3298_s10 + $0x6e8] sm:$0xff] }
 0x119   : > { %v1179_v55 = vld [vmem:[%s3298_s10 + $0x1aa0] sm:$0xff]  ;;  %1612 = vmatpush.msrb.mxu0 %v1111_v54  ;;  %v348_v54 = vld [vmem:[%s3298_s10 + $0xa8] sm:$0xff] }
 0x11a   : > { %v1239_v56 = vld [vmem:[%s3298_s10 + $0x1c80] sm:$0xff]  ;;  %1631 = vmatpush.msrb.mxu1 %v1179_v55  ;;  %v416_v55 = vld [vmem:[%s3298_s10 + $0x2c8] sm:$0xff] }
 0x11b   : > { %v1307_v57 = vld [vmem:[%s3298_s10 + $0x1ea0] sm:$0xff]  ;;  %1652 = vmatpush.msrb.mxu2 %v1239_v56  ;;  %v476_v56 = vld [vmem:[%s3298_s10 + $0x4a8] sm:$0xff] }
 0x11c   : > { %v1107_v58 = vld [vmem:[%s3298_s10 + $0x1860] sm:$0xff]  ;;  %1671 = vmatpush.msrb.mxu3 %v1307_v57  ;;  %v544_v57 = vld [vmem:[%s3298_s10 + $0x6c8] sm:$0xff] }
 0x11d   : > { %v1175_v59 = vld [vmem:[%s3298_s10 + $0x1a80] sm:$0xff]  ;;  %1613 = vmatpush.msrb.mxu0 %v1107_v58 }
 0x11e   : > { %v1235_v60 = vld [vmem:[%s3298_s10 + $0x1c60] sm:$0xff]  ;;  %1632 = vmatpush.msrb.mxu1 %v1175_v59  ;;  %v3142_v59 = vmov 0  }
 0x11f   : > { %v1303_v61 = vld [vmem:[%s3298_s10 + $0x1e80] sm:$0xff]  ;;  %1653 = vmatpush.msrb.mxu2 %v1235_v60  ;;  %2909 = vset.pattern.permute.xlu0 %v3142_v59  ;;  %v344_v60 = vld [vmem:[%s3298_s10 + $0x88] sm:$0xff] }
 0x120   : > { %v1103_v62 = vld [vmem:[%s3298_s10 + $0x1840] sm:$0xff]  ;;  %1672 = vmatpush.msrb.mxu3 %v1303_v61  ;;  %v412_v61 = vld [vmem:[%s3298_s10 + $0x2a8] sm:$0xff] }
 0x121   : > { %v1171_v63 = vld [vmem:[%s3298_s10 + $0x1a60] sm:$0xff]  ;;  %1614 = vmatpush.msrb.mxu0 %v1103_v62  ;;  %v472_v62 = vld [vmem:[%s3298_s10 + $0x488] sm:$0xff] }
 0x122   : > { %v1231_v0 = vld [vmem:[%s3298_s10 + $0x1c40] sm:$0xff]  ;;  %1633 = vmatpush.msrb.mxu1 %v1171_v63  ;;  %v540_v63 = vld [vmem:[%s3298_s10 + $0x6a8] sm:$0xff] }
 0x123   : > { %v1299_v1 = vld [vmem:[%s3298_s10 + $0x1e60] sm:$0xff]  ;;  %1654 = vmatpush.msrb.mxu2 %v1231_v0  ;;  %v340_v0 = vld [vmem:[%s3298_s10 + $0x68] sm:$0xff] }
 0x124   : > { %v1099_v2 = vld [vmem:[%s3298_s10 + $0x1820] sm:$0xff]  ;;  %1673 = vmatpush.msrb.mxu3 %v1299_v1  ;;  %v408_v1 = vld [vmem:[%s3298_s10 + $0x288] sm:$0xff] }
 0x125   : > { %v1167_v3 = vld [vmem:[%s3298_s10 + $0x1a40] sm:$0xff]  ;;  %1615 = vmatpush.msrb.mxu0 %v1099_v2  ;;  %v468_v2 = vld [vmem:[%s3298_s10 + $0x468] sm:$0xff] }
 0x126   : > { %v1227_v4 = vld [vmem:[%s3298_s10 + $0x1c20] sm:$0xff]  ;;  %1634 = vmatpush.msrb.mxu1 %v1167_v3  ;;  %v536_v3 = vld [vmem:[%s3298_s10 + $0x688] sm:$0xff] }
 0x127   : > { %v1295_v5 = vld [vmem:[%s3298_s10 + $0x1e40] sm:$0xff]  ;;  %1655 = vmatpush.msrb.mxu2 %v1227_v4  ;;  %v336_v4 = vld [vmem:[%s3298_s10 + $0x48] sm:$0xff] }
 0x128   : > { %v1095_v6 = vld [vmem:[%s3298_s10 + $0x1800] sm:$0xff]  ;;  %1674 = vmatpush.msrb.mxu3 %v1295_v5  ;;  %v404_v5 = vld [vmem:[%s3298_s10 + $0x268] sm:$0xff] }
 0x129   : > { %v1163_v7 = vld [vmem:[%s3298_s10 + $0x1a20] sm:$0xff]  ;;  %1616 = vmatpush.msrb.mxu0 %v1095_v6  ;;  %v464_v6 = vld [vmem:[%s3298_s10 + $0x448] sm:$0xff] }
 0x12a   : > { %v1223_v8 = vld [vmem:[%s3298_s10 + $0x1c00] sm:$0xff]  ;;  %1635 = vmatpush.msrb.mxu1 %v1163_v7  ;;  %v532_v7 = vld [vmem:[%s3298_s10 + $0x668] sm:$0xff] }
 0x12b   : > { %v1291_v9 = vld [vmem:[%s3298_s10 + $0x1e20] sm:$0xff]  ;;  %1656 = vmatpush.msrb.mxu2 %v1223_v8  ;;  %1681 = vmatpush.msra.mxu0 %v388_v12  ;;  %v332_v8 = vld [vmem:[%s3298_s10 + $0x28] sm:$0xff] }
 0x12c   : > { %v323_v10 = vld [vmem:[#allocation2 + $0x60] sm:$0xff]  ;;  %1675 = vmatpush.msrb.mxu3 %v1291_v9  ;;  %1657 = vmatmul.f32.vlgmr.msrb.gmra.mxu2 %v325_v11  ;;  %v400_v9 = vld [vmem:[%s3298_s10 + $0x248] sm:$0xff] }
 0x12d   : > { %v1159_v14 = vld [vmem:[%s3298_s10 + $0x1a00] sm:$0xff]  ;;  %1617 = vmatmul.f32.vlgmr.msrb.gmra.mxu0 %v323_v10  ;;  %1721 = vmatpush.msra.mxu2 %v516_v13  ;;  %v460_v10 = vld [vmem:[%s3298_s10 + $0x428] sm:$0xff] }
 0x12e   : > { %v1287_v15 = vld [vmem:[%s3298_s10 + $0x1e00] sm:$0xff]  ;;  %1636 = vmatpush.msrb.mxu1 %v1159_v14  ;;  %1682 = vmatpush.msra.mxu0 %v384_v18  ;;  %v528_v11 = vld [vmem:[%s3298_s10 + $0x648] sm:$0xff] }
 0x12f   : > { %1676 = vmatpush.msrb.mxu3 %v1287_v15  ;;  %1637 = vmatmul.f32.vlgmr.msrb.gmra.mxu1 %v324_v16  ;;  %v2641_v58 = vld [vmem:[%s4396_s3] sm:$0xff]  ;;  %v328_v12 = vld [vmem:[%s3298_s10 + $0x8] sm:$0xff] }
 0x130   : > { %1677 = vmatmul.f32.vlgmr.msrb.gmra.mxu3 %v326_v17  ;;  %1701 = vmatpush.msra.mxu1 %v452_v19  ;;  %v396_v13 = vld [vmem:[%s3298_s10 + $0x228] sm:$0xff] }
 0x131   : > { %1722 = vmatpush.msra.mxu2 %v512_v20  ;;  %1741 = vmatpush.msra.mxu3 %v580_v21  ;;  %v456_v14 = vld [vmem:[%s3298_s10 + $0x408] sm:$0xff] }
 0x132   : > { %1683 = vmatpush.msra.mxu0 %v380_v22  ;;  %1702 = vmatpush.msra.mxu1 %v448_v23  ;;  %v524_v15 = vld [vmem:[%s3298_s10 + $0x628] sm:$0xff] }
 0x133   : > { %1723 = vmatpush.msra.mxu2 %v508_v24  ;;  %1742 = vmatpush.msra.mxu3 %v576_v25  ;;  %v644_v16 = vld [vmem:[%s3298_s10 + $0x9e8] sm:$0xff] }
 0x134   : > { %1684 = vmatpush.msra.mxu0 %v376_v26  ;;  %1703 = vmatpush.msra.mxu1 %v444_v27  ;;  %v772_v17 = vld [vmem:[%s3298_s10 + $0xde8] sm:$0xff] }
 0x135   : > { %1724 = vmatpush.msra.mxu2 %v504_v28  ;;  %1743 = vmatpush.msra.mxu3 %v572_v29  ;;  %v392_v18 = vld [vmem:[%s3298_s10 + $0x208] sm:$0xff] }
 0x136   : > { %1685 = vmatpush.msra.mxu0 %v372_v30  ;;  %1704 = vmatpush.msra.mxu1 %v440_v31  ;;  %v520_v19 = vld [vmem:[%s3298_s10 + $0x608] sm:$0xff] }
 0x137   : > { %1725 = vmatpush.msra.mxu2 %v500_v32  ;;  %1744 = vmatpush.msra.mxu3 %v568_v33  ;;  %v640_v20 = vld [vmem:[%s3298_s10 + $0x9c8] sm:$0xff] }
 0x138   : > { %1686 = vmatpush.msra.mxu0 %v368_v34  ;;  %1705 = vmatpush.msra.mxu1 %v436_v35  ;;  %v708_v21 = vld [vmem:[%s3298_s10 + $0xbe8] sm:$0xff] }
 0x139   : > { %1726 = vmatpush.msra.mxu2 %v496_v36  ;;  %1745 = vmatpush.msra.mxu3 %v564_v37  ;;  %v768_v22 = vld [vmem:[%s3298_s10 + $0xdc8] sm:$0xff] }
 0x13a   : > { %1687 = vmatpush.msra.mxu0 %v364_v38  ;;  %1706 = vmatpush.msra.mxu1 %v432_v39  ;;  %v836_v23 = vld [vmem:[%s3298_s10 + $0xfe8] sm:$0xff] }
 0x13b   : > { %1727 = vmatpush.msra.mxu2 %v492_v40  ;;  %1746 = vmatpush.msra.mxu3 %v560_v41  ;;  %v636_v24 = vld [vmem:[%s3298_s10 + $0x9a8] sm:$0xff] }
 0x13c   : > { %1688 = vmatpush.msra.mxu0 %v360_v42  ;;  %1707 = vmatpush.msra.mxu1 %v428_v43  ;;  %v704_v25 = vld [vmem:[%s3298_s10 + $0xbc8] sm:$0xff] }
 0x13d   : > { %1728 = vmatpush.msra.mxu2 %v488_v44  ;;  %1747 = vmatpush.msra.mxu3 %v556_v45  ;;  %v764_v26 = vld [vmem:[%s3298_s10 + $0xda8] sm:$0xff] }
 0x13e   : > { %1689 = vmatpush.msra.mxu0 %v356_v46  ;;  %1708 = vmatpush.msra.mxu1 %v424_v47  ;;  %v832_v27 = vld [vmem:[%s3298_s10 + $0xfc8] sm:$0xff] }
 0x13f   : > { %1729 = vmatpush.msra.mxu2 %v484_v48  ;;  %1748 = vmatpush.msra.mxu3 %v552_v49  ;;  %v632_v28 = vld [vmem:[%s3298_s10 + $0x988] sm:$0xff] }
 0x140   : > { %1690 = vmatpush.msra.mxu0 %v352_v50  ;;  %1709 = vmatpush.msra.mxu1 %v420_v51  ;;  %v700_v29 = vld [vmem:[%s3298_s10 + $0xba8] sm:$0xff] }
 0x141   : > { %1730 = vmatpush.msra.mxu2 %v480_v52  ;;  %1749 = vmatpush.msra.mxu3 %v548_v53  ;;  %v760_v30 = vld [vmem:[%s3298_s10 + $0xd88] sm:$0xff] }
 0x142   : > { %1691 = vmatpush.msra.mxu0 %v348_v54  ;;  %1710 = vmatpush.msra.mxu1 %v416_v55  ;;  %v828_v31 = vld [vmem:[%s3298_s10 + $0xfa8] sm:$0xff] }
 0x143   : > { %1731 = vmatpush.msra.mxu2 %v476_v56  ;;  %1750 = vmatpush.msra.mxu3 %v544_v57  ;;  %v628_v32 = vld [vmem:[%s3298_s10 + $0x968] sm:$0xff] }
 0x144   : > { %2644 = vperm.xlu0 %2909, %v2641_v58   ;;  %1692 = vmatpush.msra.mxu0 %v344_v60  ;;  %v696_v33 = vld [vmem:[%s3298_s10 + $0xb88] sm:$0xff] }
 0x145   : > { %1711 = vmatpush.msra.mxu1 %v412_v61  ;;  %1732 = vmatpush.msra.mxu2 %v472_v62  ;;  %v756_v34 = vld [vmem:[%s3298_s10 + $0xd68] sm:$0xff] }
 0x146   : > { %1751 = vmatpush.msra.mxu3 %v540_v63  ;;  %1693 = vmatpush.msra.mxu0 %v340_v0  ;;  %v824_v35 = vld [vmem:[%s3298_s10 + $0xf88] sm:$0xff] }
 0x147   : > { %1712 = vmatpush.msra.mxu1 %v408_v1  ;;  %1733 = vmatpush.msra.mxu2 %v468_v2  ;;  %v624_v36 = vld [vmem:[%s3298_s10 + $0x948] sm:$0xff] }
 0x148   : > { %1752 = vmatpush.msra.mxu3 %v536_v3  ;;  %1694 = vmatpush.msra.mxu0 %v336_v4  ;;  %v692_v37 = vld [vmem:[%s3298_s10 + $0xb68] sm:$0xff] }
 0x149   : > { %1713 = vmatpush.msra.mxu1 %v404_v5  ;;  %1734 = vmatpush.msra.mxu2 %v464_v6  ;;  %v752_v38 = vld [vmem:[%s3298_s10 + $0xd48] sm:$0xff] }
 0x14a   : > { %1753 = vmatpush.msra.mxu3 %v532_v7  ;;  %1695 = vmatpush.msra.mxu0 %v332_v8  ;;  %v820_v39 = vld [vmem:[%s3298_s10 + $0xf68] sm:$0xff] }
 0x14b   : > { %1714 = vmatpush.msra.mxu1 %v400_v9  ;;  %1735 = vmatpush.msra.mxu2 %v460_v10  ;;  %v620_v40 = vld [vmem:[%s3298_s10 + $0x928] sm:$0xff] }
 0x14c   : > { %1754 = vmatpush.msra.mxu3 %v528_v11  ;;  %1696 = vmatpush.msra.mxu0 %v328_v12  ;;  %v688_v41 = vld [vmem:[%s3298_s10 + $0xb48] sm:$0xff] }
 0x14d   : > { %1715 = vmatpush.msra.mxu1 %v396_v13  ;;  %1736 = vmatpush.msra.mxu2 %v456_v14  ;;  %v748_v42 = vld [vmem:[%s3298_s10 + $0xd28] sm:$0xff] }
 0x14e   : > { %1755 = vmatpush.msra.mxu3 %v524_v15  ;;  %1761 = vmatpush.msrb.mxu0 %v644_v16  ;;  %v816_v43 = vld [vmem:[%s3298_s10 + $0xf48] sm:$0xff] }
 0x14f   : > { %1801 = vmatpush.msrb.mxu2 %v772_v17  ;;  %1716 = vmatpush.msra.mxu1 %v392_v18  ;;  %v616_v44 = vld [vmem:[%s3298_s10 + $0x908] sm:$0xff] }
 0x150   : > { %1756 = vmatpush.msra.mxu3 %v520_v19  ;;  %1762 = vmatpush.msrb.mxu0 %v640_v20  ;;  %v684_v45 = vld [vmem:[%s3298_s10 + $0xb28] sm:$0xff]  ;;  %v2910_v20 = vld [vmem:[#allocation2] sm:$0xff] }
 0x151   : > { %1781 = vmatpush.msrb.mxu1 %v708_v21  ;;  %1802 = vmatpush.msrb.mxu2 %v768_v22  ;;  %v744_v46 = vld [vmem:[%s3298_s10 + $0xd08] sm:$0xff]  ;;  %v2911_v21 = vld [vmem:[#allocation2 + $0x10] sm:$0xff] }
 0x152   : > { %1821 = vmatpush.msrb.mxu3 %v836_v23  ;;  %1763 = vmatpush.msrb.mxu0 %v636_v24  ;;  %v812_v47 = vld [vmem:[%s3298_s10 + $0xf28] sm:$0xff] }
 0x153   : > { %1782 = vmatpush.msrb.mxu1 %v704_v25  ;;  %1803 = vmatpush.msrb.mxu2 %v764_v26  ;;  %v612_v48 = vld [vmem:[%s3298_s10 + $0x8e8] sm:$0xff] }
 0x154   : > { %1822 = vmatpush.msrb.mxu3 %v832_v27  ;;  %1764 = vmatpush.msrb.mxu0 %v632_v28  ;;  %v680_v49 = vld [vmem:[%s3298_s10 + $0xb08] sm:$0xff]  ;;  %v2913_v27 = vld [vmem:[#allocation2 + $0x18] sm:$0xff] }
 0x155   : > { %1783 = vmatpush.msrb.mxu1 %v700_v29  ;;  %1804 = vmatpush.msrb.mxu2 %v760_v30  ;;  %v740_v50 = vld [vmem:[%s3298_s10 + $0xce8] sm:$0xff] }
 0x156   : > { %1823 = vmatpush.msrb.mxu3 %v828_v31  ;;  %1765 = vmatpush.msrb.mxu0 %v628_v32  ;;  %v808_v51 = vld [vmem:[%s3298_s10 + $0xf08] sm:$0xff] }
 0x157   : > { %1784 = vmatpush.msrb.mxu1 %v696_v33  ;;  %1805 = vmatpush.msrb.mxu2 %v756_v34  ;;  %v608_v52 = vld [vmem:[%s3298_s10 + $0x8c8] sm:$0xff] }
 0x158   : > { %1824 = vmatpush.msrb.mxu3 %v824_v35  ;;  %1766 = vmatpush.msrb.mxu0 %v624_v36  ;;  %v676_v53 = vld [vmem:[%s3298_s10 + $0xae8] sm:$0xff] }
 0x159   : > { %1785 = vmatpush.msrb.mxu1 %v692_v37  ;;  %1806 = vmatpush.msrb.mxu2 %v752_v38  ;;  %v736_v54 = vld [vmem:[%s3298_s10 + $0xcc8] sm:$0xff] }
 0x15a   : > { %1825 = vmatpush.msrb.mxu3 %v820_v39  ;;  %1767 = vmatpush.msrb.mxu0 %v620_v40  ;;  %v804_v55 = vld [vmem:[%s3298_s10 + $0xee8] sm:$0xff]  ;;  %v1351_v40 = vld [vmem:[%s3710_s24] sm:$0xf] }
 0x15b   : > { %1786 = vmatpush.msrb.mxu1 %v688_v41  ;;  %1807 = vmatpush.msrb.mxu2 %v748_v42  ;;  %v604_v56 = vld [vmem:[%s3298_s10 + $0x8a8] sm:$0xff]  ;;  %v2914_v41 = vld [vmem:[#allocation2 + $0x30] sm:$0xff] }
 0x15c   : > { %1826 = vmatpush.msrb.mxu3 %v816_v43  ;;  %1768 = vmatpush.msrb.mxu0 %v616_v44  ;;  %v672_v57 = vld [vmem:[%s3298_s10 + $0xac8] sm:$0xff] }
 0x15d   : > { %1787 = vmatpush.msrb.mxu1 %v684_v45  ;;  %1808 = vmatpush.msrb.mxu2 %v744_v46  ;;  %v732_v58 = vld [vmem:[%s3298_s10 + $0xca8] sm:$0xff]  ;;  %v2915_v45 = vld [vmem:[#allocation2 + $0x20] sm:$0xff] }
 0x15e   : > { %1827 = vmatpush.msrb.mxu3 %v812_v47  ;;  %1769 = vmatpush.msrb.mxu0 %v612_v48  ;;  %v800_v59 = vld [vmem:[%s3298_s10 + $0xec8] sm:$0xff]  ;;  %v1353_v47 = vperm.slane %v1351_v40, 0  ;;  %v2916_v48 = vld [vmem:[#allocation2 + $0x38] sm:$0xff] }
 0x15f   : > { %1788 = vmatpush.msrb.mxu1 %v680_v49  ;;  %1809 = vmatpush.msrb.mxu2 %v740_v50  ;;  %v600_v60 = vld [vmem:[%s3298_s10 + $0x888] sm:$0xff] }
 0x160   : > { %1828 = vmatpush.msrb.mxu3 %v808_v51  ;;  %1770 = vmatpush.msrb.mxu0 %v608_v52  ;;  %v668_v61 = vld [vmem:[%s3298_s10 + $0xaa8] sm:$0xff]  ;;  %v1378_v51 = vpop.f32.mrf.mxu0 }
 0x161   : > { %1789 = vmatpush.msrb.mxu1 %v676_v53  ;;  %1810 = vmatpush.msrb.mxu2 %v736_v54  ;;  %v728_v62 = vld [vmem:[%s3298_s10 + $0xc88] sm:$0xff] }
 0x162   : > { %1829 = vmatpush.msrb.mxu3 %v804_v55  ;;  %1771 = vmatpush.msrb.mxu0 %v604_v56  ;;  %v796_v63 = vld [vmem:[%s3298_s10 + $0xea8] sm:$0xff] }
 0x163   : > { %1790 = vmatpush.msrb.mxu1 %v672_v57  ;;  %1811 = vmatpush.msrb.mxu2 %v732_v58  ;;  %v596_v0 = vld [vmem:[%s3298_s10 + $0x868] sm:$0xff] }
 0x164   : > { %1830 = vmatpush.msrb.mxu3 %v800_v59  ;;  %v664_v1 = vld [vmem:[%s3298_s10 + $0xa88] sm:$0xff]  ;;  %1772 = vmatpush.msrb.mxu0 %v600_v60  ;;  %v1379_v59 = vadd.f32 %v1378_v51, %v1353_v47 }
 0x165   : > { %1791 = vmatpush.msrb.mxu1 %v668_v61  ;;  %v724_v2 = vld [vmem:[%s3298_s10 + $0xc68] sm:$0xff]  ;;  %1812 = vmatpush.msrb.mxu2 %v728_v62  ;;  %v1398_v62 = vpop.f32.mrf.mxu1 }
 0x166   : > { %v792_v3 = vld [vmem:[%s3298_s10 + $0xe88] sm:$0xff]  ;;  %1831 = vmatpush.msrb.mxu3 %v796_v63  ;;  %1773 = vmatpush.msrb.mxu0 %v596_v0 }
 0x167   : > { %v592_v4 = vld [vmem:[%s3298_s10 + $0x848] sm:$0xff]  ;;  %1792 = vmatpush.msrb.mxu1 %v664_v1  ;;  %1813 = vmatpush.msrb.mxu2 %v724_v2 }
 0x168   : > { %v660_v5 = vld [vmem:[%s3298_s10 + $0xa68] sm:$0xff]  ;;  %1832 = vmatpush.msrb.mxu3 %v792_v3  ;;  %1774 = vmatpush.msrb.mxu0 %v592_v4 }
 0x169   : > { %v720_v6 = vld [vmem:[%s3298_s10 + $0xc48] sm:$0xff]  ;;  %1793 = vmatpush.msrb.mxu1 %v660_v5  ;;  %1697 = vmatmul.f32.vlgmr.msra.gmra.mxu0 %v2910_v20  ;;  %v1399_v5 = vadd.f32 %v1398_v62, %v1379_v59 }
 0x16a   : > { %v788_v7 = vld [vmem:[%s3298_s10 + $0xe68] sm:$0xff]  ;;  %1814 = vmatpush.msrb.mxu2 %v720_v6  ;;  %1757 = vmatmul.f32.vlgmr.msra.gmra.mxu3 %v2913_v27 }
 0x16b   : > { %v588_v8 = vld [vmem:[%s3298_s10 + $0x828] sm:$0xff]  ;;  %1833 = vmatpush.msrb.mxu3 %v788_v7  ;;  %1737 = vmatmul.f32.vlgmr.msra.gmra.mxu2 %v2911_v21 }
 0x16c   : > { %v656_v9 = vld [vmem:[%s3298_s10 + $0xa48] sm:$0xff]  ;;  %1775 = vmatpush.msrb.mxu0 %v588_v8  ;;  %v1418_v8 = vpop.f32.mrf.mxu2 }
 0x16d   : > { %v716_v10 = vld [vmem:[%s3298_s10 + $0xc28] sm:$0xff]  ;;  %1794 = vmatpush.msrb.mxu1 %v656_v9 }
 0x16e   : > { %v784_v11 = vld [vmem:[%s3298_s10 + $0xe48] sm:$0xff]  ;;  %1815 = vmatpush.msrb.mxu2 %v716_v10 }
 0x16f   : > { %v584_v12 = vld [vmem:[%s3298_s10 + $0x808] sm:$0xff]  ;;  %1834 = vmatpush.msrb.mxu3 %v784_v11 }
 0x170   : > { %v652_v13 = vld [vmem:[%s3298_s10 + $0xa28] sm:$0xff]  ;;  %1776 = vmatpush.msrb.mxu0 %v584_v12 }
 0x171   : > { %v712_v14 = vld [vmem:[%s3298_s10 + $0xc08] sm:$0xff]  ;;  %1795 = vmatpush.msrb.mxu1 %v652_v13  ;;  %1777 = vmatmul.f32.vlgmr.msrb.gmra.mxu0 %v2915_v45 }
 0x172   : > { %v780_v15 = vld [vmem:[%s3298_s10 + $0xe28] sm:$0xff]  ;;  %1816 = vmatpush.msrb.mxu2 %v712_v14 }
 0x173   : > { %v900_v16 = vld [vmem:[%s3298_s10 + $0x11e8] sm:$0xff]  ;;  %1835 = vmatpush.msrb.mxu3 %v780_v15  ;;  %1817 = vmatmul.f32.vlgmr.msrb.gmra.mxu2 %v2914_v41  ;;  %v1419_v15 = vadd.f32 %v1418_v8, %v1399_v5  ;;  %v2918_v41 = vld [vmem:[#allocation2 + $0x40] sm:$0xff] }
 0x174   : > { %v1028_v17 = vld [vmem:[%s3298_s10 + $0x15e8] sm:$0xff]  ;;  %1841 = vmatpush.msra.mxu0 %v900_v16 }
 0x175   : > { %v648_v18 = vld [vmem:[%s3298_s10 + $0xa08] sm:$0xff]  ;;  %1881 = vmatpush.msra.mxu2 %v1028_v17 }
 0x176   : > { %v776_v19 = vld [vmem:[%s3298_s10 + $0xe08] sm:$0xff]  ;;  %1796 = vmatpush.msrb.mxu1 %v648_v18  ;;  %v1438_v18 = vpop.f32.mrf.mxu3 }
 0x177   : > { %v896_v22 = vld [vmem:[%s3298_s10 + $0x11c8] sm:$0xff]  ;;  %1836 = vmatpush.msrb.mxu3 %v776_v19 }
 0x178   : > { %v964_v23 = vld [vmem:[%s3298_s10 + $0x13e8] sm:$0xff]  ;;  %1842 = vmatpush.msra.mxu0 %v896_v22  ;;  %1837 = vmatmul.f32.vlgmr.msrb.gmra.mxu3 %v2916_v48 }
 0x179   : > { %v1024_v24 = vld [vmem:[%s3298_s10 + $0x15c8] sm:$0xff] }
 0x17a   : > { %v1092_v25 = vld [vmem:[%s3298_s10 + $0x17e8] sm:$0xff]  ;;  %1882 = vmatpush.msra.mxu2 %v1024_v24 }
 0x17b   : > { %v2912_v26 = vld [vmem:[#allocation2 + $0x8] sm:$0xff]  ;;  %1901 = vmatpush.msra.mxu3 %v1092_v25  ;;  %v1439_v25 = vadd.f32 %v1438_v18, %v1419_v15 }
 0x17c   : > { %1717 = vmatmul.f32.vlgmr.msra.gmra.mxu1 %v2912_v26  ;;  %v892_v28 = vld [vmem:[%s3298_s10 + $0x11a8] sm:$0xff] }
 0x17d   : > { %v960_v29 = vld [vmem:[%s3298_s10 + $0x13c8] sm:$0xff]  ;;  %1861 = vmatpush.msra.mxu1 %v964_v23  ;;  %1843 = vmatpush.msra.mxu0 %v892_v28  ;;  %v1458_v28 = vpop.f32.mrf.mxu0 }
 0x17e   : > { %v1020_v30 = vld [vmem:[%s3298_s10 + $0x15a8] sm:$0xff] }
 0x17f   : > { %v1088_v31 = vld [vmem:[%s3298_s10 + $0x17c8] sm:$0xff]  ;;  %1862 = vmatpush.msra.mxu1 %v960_v29  ;;  %1883 = vmatpush.msra.mxu2 %v1020_v30 }
 0x180   : > { %v888_v32 = vld [vmem:[%s3298_s10 + $0x1188] sm:$0xff]  ;;  %1902 = vmatpush.msra.mxu3 %v1088_v31 }
 0x181   : > { %v956_v33 = vld [vmem:[%s3298_s10 + $0x13a8] sm:$0xff]  ;;  %1844 = vmatpush.msra.mxu0 %v888_v32 }
 0x182   : > { %v1016_v34 = vld [vmem:[%s3298_s10 + $0x1588] sm:$0xff]  ;;  %1863 = vmatpush.msra.mxu1 %v956_v33 }
 0x183   : > { %v1084_v35 = vld [vmem:[%s3298_s10 + $0x17a8] sm:$0xff]  ;;  %1884 = vmatpush.msra.mxu2 %v1016_v34 }
 0x184   : > { %v884_v36 = vld [vmem:[%s3298_s10 + $0x1168] sm:$0xff]  ;;  %1903 = vmatpush.msra.mxu3 %v1084_v35  ;;  %v1459_v35 = vadd.f32 %v1458_v28, %v1439_v25 }
 0x185   : > { %v952_v37 = vld [vmem:[%s3298_s10 + $0x1388] sm:$0xff]  ;;  %1845 = vmatpush.msra.mxu0 %v884_v36  ;;  %v1478_v36 = vpop.f32.mrf.mxu1 }
 0x186   : > { %v1012_v38 = vld [vmem:[%s3298_s10 + $0x1568] sm:$0xff]  ;;  %1864 = vmatpush.msra.mxu1 %v952_v37 }
 0x187   : > { %v1080_v39 = vld [vmem:[%s3298_s10 + $0x1788] sm:$0xff]  ;;  %1885 = vmatpush.msra.mxu2 %v1012_v38 }
 0x188   : > { %v880_v42 = vld [vmem:[%s3298_s10 + $0x1148] sm:$0xff]  ;;  %1904 = vmatpush.msra.mxu3 %v1080_v39 }
 0x189   : > { %v948_v43 = vld [vmem:[%s3298_s10 + $0x1368] sm:$0xff]  ;;  %1846 = vmatpush.msra.mxu0 %v880_v42  ;;  %v2919_v42 = vld [vmem:[#allocation2 + $0x50] sm:$0xff] }
 0x18a   : > { %v1008_v44 = vld [vmem:[%s3298_s10 + $0x1548] sm:$0xff]  ;;  %1865 = vmatpush.msra.mxu1 %v948_v43  ;;  %v1479_v43 = vadd.f32 %v1478_v36, %v1459_v35 }
 0x18b   : > { %v1076_v46 = vld [vmem:[%s3298_s10 + $0x1768] sm:$0xff]  ;;  %1886 = vmatpush.msra.mxu2 %v1008_v44 }
 0x18c   : > { %v876_v49 = vld [vmem:[%s3298_s10 + $0x1128] sm:$0xff]  ;;  %1905 = vmatpush.msra.mxu3 %v1076_v46  ;;  %v1498_v46 = vpop.f32.mrf.mxu2 }
 0x18d   : > { %v944_v50 = vld [vmem:[%s3298_s10 + $0x1348] sm:$0xff]  ;;  %1847 = vmatpush.msra.mxu0 %v876_v49 }
 0x18e   : > { %v1004_v52 = vld [vmem:[%s3298_s10 + $0x1528] sm:$0xff]  ;;  %1866 = vmatpush.msra.mxu1 %v944_v50  ;;  %v2921_v50 = vld [vmem:[#allocation2 + $0x58] sm:$0xff] }
 0x18f   : > { %v1072_v53 = vld [vmem:[%s3298_s10 + $0x1748] sm:$0xff]  ;;  %1887 = vmatpush.msra.mxu2 %v1004_v52 }
 0x190   : > { %v2917_v54 = vld [vmem:[#allocation2 + $0x28] sm:$0xff]  ;;  %1906 = vmatpush.msra.mxu3 %v1072_v53 }
 0x191   : > { %1797 = vmatmul.f32.vlgmr.msrb.gmra.mxu1 %v2917_v54  ;;  %v872_v55 = vld [vmem:[%s3298_s10 + $0x1108] sm:$0xff] }
 0x192   : > { %v940_v56 = vld [vmem:[%s3298_s10 + $0x1328] sm:$0xff]  ;;  %1848 = vmatpush.msra.mxu0 %v872_v55  ;;  %v1499_v55 = vadd.f32 %v1498_v46, %v1479_v43 }
 0x193   : > { %v1000_v57 = vld [vmem:[%s3298_s10 + $0x1508] sm:$0xff]  ;;  %1867 = vmatpush.msra.mxu1 %v940_v56 }
 0x194   : > { %v1068_v58 = vld [vmem:[%s3298_s10 + $0x1728] sm:$0xff]  ;;  %1888 = vmatpush.msra.mxu2 %v1000_v57  ;;  %v1578_v15 = vpop.f32.mrf.mxu2 }
 0x195   : > { %v868_v60 = vld [vmem:[%s3298_s10 + $0x10e8] sm:$0xff]  ;;  %1907 = vmatpush.msra.mxu3 %v1068_v58  ;;  %v1518_v58 = vpop.f32.mrf.mxu3 }
 0x196   : > { %v936_v61 = vld [vmem:[%s3298_s10 + $0x1308] sm:$0xff]  ;;  %1849 = vmatpush.msra.mxu0 %v868_v60 }
 0x197   : > { %v996_v63 = vld [vmem:[%s3298_s10 + $0x14e8] sm:$0xff]  ;;  %1868 = vmatpush.msra.mxu1 %v936_v61 }
 0x198   : > { %v1064_v0 = vld [vmem:[%s3298_s10 + $0x1708] sm:$0xff]  ;;  %1889 = vmatpush.msra.mxu2 %v996_v63  ;;  %v1538_v63 = vpop.f32.mrf.mxu0 }
 0x199   : > { %v864_v1 = vld [vmem:[%s3298_s10 + $0x10c8] sm:$0xff]  ;;  %1908 = vmatpush.msra.mxu3 %v1064_v0 }
 0x19a   : > { %v932_v2 = vld [vmem:[%s3298_s10 + $0x12e8] sm:$0xff]  ;;  %1850 = vmatpush.msra.mxu0 %v864_v1 }
 0x19b   : > { %v992_v3 = vld [vmem:[%s3298_s10 + $0x14c8] sm:$0xff]  ;;  %1869 = vmatpush.msra.mxu1 %v932_v2  ;;  %v1519_v2 = vadd.f32 %v1518_v58, %v1499_v55 }
 0x19c   : > { %v1060_v4 = vld [vmem:[%s3298_s10 + $0x16e8] sm:$0xff]  ;;  %1890 = vmatpush.msra.mxu2 %v992_v3 }
 0x19d   : > { %v860_v6 = vld [vmem:[%s3298_s10 + $0x10a8] sm:$0xff]  ;;  %1909 = vmatpush.msra.mxu3 %v1060_v4 }
 0x19e   : > { %v928_v7 = vld [vmem:[%s3298_s10 + $0x12c8] sm:$0xff]  ;;  %1851 = vmatpush.msra.mxu0 %v860_v6 }
 0x19f   : > { %v988_v9 = vld [vmem:[%s3298_s10 + $0x14a8] sm:$0xff]  ;;  %1870 = vmatpush.msra.mxu1 %v928_v7  ;;  %v1539_v7 = vadd.f32 %v1538_v63, %v1519_v2  ;;  %v2922_v2 = vld [vmem:[#allocation2 + $0x60] sm:$0xff] }
 0x1a0   : > { %v1056_v10 = vld [vmem:[%s3298_s10 + $0x16c8] sm:$0xff]  ;;  %1891 = vmatpush.msra.mxu2 %v988_v9 }
 0x1a1   : > { %v856_v11 = vld [vmem:[%s3298_s10 + $0x1088] sm:$0xff]  ;;  %1910 = vmatpush.msra.mxu3 %v1056_v10  ;;  %v1558_v10 = vpop.f32.mrf.mxu1 }
 0x1a2   : > { %v924_v12 = vld [vmem:[%s3298_s10 + $0x12a8] sm:$0xff]  ;;  %1852 = vmatpush.msra.mxu0 %v856_v11  ;;  %v1559_v18 = vadd.f32 %v1558_v10, %v1539_v7  ;;  %v513_v7 = vld [vmem:[%s3298_s10 + $0x5d0] sm:$0xff] }
 0x1a3   : > { %v984_v13 = vld [vmem:[%s3298_s10 + $0x1488] sm:$0xff]  ;;  %1871 = vmatpush.msra.mxu1 %v924_v12 }
 0x1a4   : > { %v1052_v14 = vld [vmem:[%s3298_s10 + $0x16a8] sm:$0xff]  ;;  %1892 = vmatpush.msra.mxu2 %v984_v13 }
 0x1a5   : > { %v852_v16 = vld [vmem:[%s3298_s10 + $0x1068] sm:$0xff]  ;;  %1911 = vmatpush.msra.mxu3 %v1052_v14 }
 0x1a6   : > { %v920_v17 = vld [vmem:[%s3298_s10 + $0x1288] sm:$0xff]  ;;  %1853 = vmatpush.msra.mxu0 %v852_v16 }
 0x1a7   : > { %v980_v19 = vld [vmem:[%s3298_s10 + $0x1468] sm:$0xff]  ;;  %1872 = vmatpush.msra.mxu1 %v920_v17 }
 0x1a8   : > { %v1048_v20 = vld [vmem:[%s3298_s10 + $0x1688] sm:$0xff]  ;;  %1893 = vmatpush.msra.mxu2 %v980_v19 }
 0x1a9   : > { %v848_v21 = vld [vmem:[%s3298_s10 + $0x1048] sm:$0xff]  ;;  %1912 = vmatpush.msra.mxu3 %v1048_v20 }
 0x1aa   : > { %v916_v22 = vld [vmem:[%s3298_s10 + $0x1268] sm:$0xff]  ;;  %1854 = vmatpush.msra.mxu0 %v848_v21 }
 0x1ab   : > { %v976_v23 = vld [vmem:[%s3298_s10 + $0x1448] sm:$0xff]  ;;  %1873 = vmatpush.msra.mxu1 %v916_v22 }
 0x1ac   : > { %v1044_v24 = vld [vmem:[%s3298_s10 + $0x1668] sm:$0xff]  ;;  %1894 = vmatpush.msra.mxu2 %v976_v23  ;;  %v1579_v23 = vadd.f32 %v1578_v15, %v1559_v18  ;;  %v1638_v46 = vpop.f32.mrf.mxu1  ;;  %v577_v15 = vld [vmem:[%s3298_s10 + $0x7d0] sm:$0xff] }
 0x1ad   : > { %v844_v26 = vld [vmem:[%s3298_s10 + $0x1028] sm:$0xff]  ;;  %1913 = vmatpush.msra.mxu3 %v1044_v24  ;;  %v505_v18 = vld [vmem:[%s3298_s10 + $0x590] sm:$0xff] }
 0x1ae   : > { %v912_v27 = vld [vmem:[%s3298_s10 + $0x1248] sm:$0xff]  ;;  %1855 = vmatpush.msra.mxu0 %v844_v26  ;;  %v1598_v26 = vpop.f32.mrf.mxu3 }
 0x1af   : > { %v972_v29 = vld [vmem:[%s3298_s10 + $0x1428] sm:$0xff]  ;;  %1874 = vmatpush.msra.mxu1 %v912_v27 }
 0x1b0   : > { %v1040_v30 = vld [vmem:[%s3298_s10 + $0x1648] sm:$0xff]  ;;  %1895 = vmatpush.msra.mxu2 %v972_v29 }
 0x1b1   : > { %v840_v31 = vld [vmem:[%s3298_s10 + $0x1008] sm:$0xff]  ;;  %1914 = vmatpush.msra.mxu3 %v1040_v30 }
 0x1b2   : > { %v908_v32 = vld [vmem:[%s3298_s10 + $0x1228] sm:$0xff]  ;;  %1856 = vmatpush.msra.mxu0 %v840_v31 }
 0x1b3   : > { %v968_v33 = vld [vmem:[%s3298_s10 + $0x1408] sm:$0xff]  ;;  %1875 = vmatpush.msra.mxu1 %v908_v32  ;;  %1857 = vmatmul.f32.vlgmr.msra.gmra.mxu0 %v2918_v41 }
 0x1b4   : > { %v1036_v34 = vld [vmem:[%s3298_s10 + $0x1628] sm:$0xff]  ;;  %1896 = vmatpush.msra.mxu2 %v968_v33  ;;  %v1599_v33 = vadd.f32 %v1598_v26, %v1579_v23  ;;  %v569_v23 = vld [vmem:[%s3298_s10 + $0x790] sm:$0xff] }
 0x1b5   : > { %v1156_v37 = vld [vmem:[%s3298_s10 + $0x19e8] sm:$0xff]  ;;  %1915 = vmatpush.msra.mxu3 %v1036_v34  ;;  %1897 = vmatmul.f32.vlgmr.msra.gmra.mxu2 %v2919_v42  ;;  %v497_v26 = vld [vmem:[%s3298_s10 + $0x550] sm:$0xff] }
 0x1b6   : > { %v1284_v38 = vld [vmem:[%s3298_s10 + $0x1de8] sm:$0xff]  ;;  %1921 = vmatpush.msrb.mxu0 %v1156_v37 }
 0x1b7   : > { %v904_v39 = vld [vmem:[%s3298_s10 + $0x1208] sm:$0xff]  ;;  %1961 = vmatpush.msrb.mxu2 %v1284_v38  ;;  %v1618_v38 = vpop.f32.mrf.mxu0 }
 0x1b8   : > { %v1032_v40 = vld [vmem:[%s3298_s10 + $0x1608] sm:$0xff]  ;;  %1876 = vmatpush.msra.mxu1 %v904_v39  ;;  %v1619_v41 = vadd.f32 %v1618_v38, %v1599_v33  ;;  %v429_v33 = vld [vmem:[%s3298_s10 + $0x330] sm:$0xff] }
 0x1b9   : > { %v1152_v44 = vld [vmem:[%s3298_s10 + $0x19c8] sm:$0xff]  ;;  %1916 = vmatpush.msra.mxu3 %v1032_v40  ;;  %v485_v38 = vld [vmem:[%s3298_s10 + $0x4f0] sm:$0xff] }
 0x1ba   : > { %v1220_v45 = vld [vmem:[%s3298_s10 + $0x1be8] sm:$0xff]  ;;  %1917 = vmatmul.f32.vlgmr.msra.gmra.mxu3 %v2921_v50  ;;  %1922 = vmatpush.msrb.mxu0 %v1152_v44 }
 0x1bb   : > { %v1280_v47 = vld [vmem:[%s3298_s10 + $0x1dc8] sm:$0xff]  ;;  %1941 = vmatpush.msrb.mxu1 %v1220_v45 }
 0x1bc   : > { %v1348_v48 = vld [vmem:[%s3298_s10 + $0x1fe8] sm:$0xff]  ;;  %1962 = vmatpush.msrb.mxu2 %v1280_v47 }
 0x1bd   : > { %v2920_v49 = vld [vmem:[#allocation2 + $0x48] sm:$0xff]  ;;  %1981 = vmatpush.msrb.mxu3 %v1348_v48 }
 0x1be   : > { %1877 = vmatmul.f32.vlgmr.msra.gmra.mxu1 %v2920_v49  ;;  %v1148_v51 = vld [vmem:[%s3298_s10 + $0x19a8] sm:$0xff] }
 0x1bf   : > { %v1216_v52 = vld [vmem:[%s3298_s10 + $0x1bc8] sm:$0xff]  ;;  %1923 = vmatpush.msrb.mxu0 %v1148_v51  ;;  %v1639_v51 = vadd.f32 %v1638_v46, %v1619_v41  ;;  %v421_v41 = vld [vmem:[%s3298_s10 + $0x2f0] sm:$0xff] }
 0x1c0   : > { %v1276_v53 = vld [vmem:[%s3298_s10 + $0x1da8] sm:$0xff]  ;;  %1942 = vmatpush.msrb.mxu1 %v1216_v52  ;;  %v477_v46 = vld [vmem:[%s3298_s10 + $0x4b0] sm:$0xff] }
 0x1c1   : > { %v1344_v54 = vld [vmem:[%s3298_s10 + $0x1fc8] sm:$0xff]  ;;  %1963 = vmatpush.msrb.mxu2 %v1276_v53 }
 0x1c2   : > { %v1144_v56 = vld [vmem:[%s3298_s10 + $0x1988] sm:$0xff]  ;;  %1982 = vmatpush.msrb.mxu3 %v1344_v54  ;;  %v1658_v54 = vpop.f32.mrf.mxu2 }
 0x1c3   : > { %v1212_v57 = vld [vmem:[%s3298_s10 + $0x1ba8] sm:$0xff]  ;;  %1924 = vmatpush.msrb.mxu0 %v1144_v56 }
 0x1c4   : > { %v1272_v59 = vld [vmem:[%s3298_s10 + $0x1d88] sm:$0xff]  ;;  %1943 = vmatpush.msrb.mxu1 %v1212_v57  ;;  %v1659_v57 = vadd.f32 %v1658_v54, %v1639_v51  ;;  %v541_v51 = vld [vmem:[%s3298_s10 + $0x6b0] sm:$0xff] }
 0x1c5   : > { %v1340_v60 = vld [vmem:[%s3298_s10 + $0x1fa8] sm:$0xff]  ;;  %1964 = vmatpush.msrb.mxu2 %v1272_v59  ;;  %v469_v54 = vld [vmem:[%s3298_s10 + $0x470] sm:$0xff] }
 0x1c6   : > { %v1140_v61 = vld [vmem:[%s3298_s10 + $0x1968] sm:$0xff]  ;;  %1983 = vmatpush.msrb.mxu3 %v1340_v60  ;;  %v1678_v60 = vpop.f32.mrf.mxu3 }
 0x1c7   : > { %v1208_v62 = vld [vmem:[%s3298_s10 + $0x1b88] sm:$0xff]  ;;  %1925 = vmatpush.msrb.mxu0 %v1140_v61  ;;  %v389_v61 = vld [vmem:[%s3298_s10 + $0x1f0] sm:$0xff]  ;;  %v1679_v63 = vadd.f32 %v1678_v60, %v1659_v57 }
 0x1c8   : > { %v1268_v0 = vld [vmem:[%s3298_s10 + $0x1d68] sm:$0xff]  ;;  %1944 = vmatpush.msrb.mxu1 %v1208_v62  ;;  %v517_v62 = vld [vmem:[%s3298_s10 + $0x5f0] sm:$0xff] }
 0x1c9   : > { %v1336_v1 = vld [vmem:[%s3298_s10 + $0x1f88] sm:$0xff]  ;;  %1965 = vmatpush.msrb.mxu2 %v1268_v0  ;;  %v405_v57 = vld [vmem:[%s3298_s10 + $0x270] sm:$0xff] }
 0x1ca   : > { %v1136_v3 = vld [vmem:[%s3298_s10 + $0x1948] sm:$0xff]  ;;  %1984 = vmatpush.msrb.mxu3 %v1336_v1  ;;  %v333_v60 = vld [vmem:[%s3298_s10 + $0x30] sm:$0xff] }
 0x1cb   : > { %v1204_v4 = vld [vmem:[%s3298_s10 + $0x1b68] sm:$0xff]  ;;  %1926 = vmatpush.msrb.mxu0 %v1136_v3  ;;  %v2923_v3 = vld [vmem:[#allocation2 + $0x70] sm:$0xff] }
 0x1cc   : > { %v1264_v5 = vld [vmem:[%s3298_s10 + $0x1d48] sm:$0xff]  ;;  %1945 = vmatpush.msrb.mxu1 %v1204_v4  ;;  %v385_v4 = vld [vmem:[%s3298_s10 + $0x1d0] sm:$0xff] }
 0x1cd   : > { %v1332_v6 = vld [vmem:[%s3298_s10 + $0x1f68] sm:$0xff]  ;;  %1966 = vmatpush.msrb.mxu2 %v1264_v5  ;;  %v453_v5 = vld [vmem:[%s3298_s10 + $0x3f0] sm:$0xff] }
 0x1ce   : > { %v1132_v8 = vld [vmem:[%s3298_s10 + $0x1928] sm:$0xff]  ;;  %1985 = vmatpush.msrb.mxu3 %v1332_v6  ;;  %v3828_v6 = vpop.permute.xlu0 %2644 }
 0x1cf   : > { %v1200_v9 = vld [vmem:[%s3298_s10 + $0x1b48] sm:$0xff]  ;;  %1927 = vmatpush.msrb.mxu0 %v1132_v8  ;;  %v581_v8 = vld [vmem:[%s3298_s10 + $0x7f0] sm:$0xff] }
 0x1d0   : > { %v1260_v11 = vld [vmem:[%s3298_s10 + $0x1d28] sm:$0xff]  ;;  %1946 = vmatpush.msrb.mxu1 %v1200_v9  ;;  %v2647_v9 = vmul.f32 %v3828_v6, %v1679_v63  ;;  %v529_v63 = vld [vmem:[%s3298_s10 + $0x650] sm:$0xff] }
 0x1d1   : > { %v1328_v12 = vld [vmem:[%s3298_s10 + $0x1f48] sm:$0xff]  ;;  %1967 = vmatpush.msrb.mxu2 %v1260_v11  ;;  %v2925_v11 = vld [vmem:[#allocation2 + $0x78] sm:$0xff] }
 0x1d2   : > { %v1128_v13 = vld [vmem:[%s3298_s10 + $0x1908] sm:$0xff]  ;;  %1986 = vmatpush.msrb.mxu3 %v1328_v12  ;;  %v381_v12 = vld [vmem:[%s3298_s10 + $0x1b0] sm:$0xff]  ;;  %2651 = vst [vmem:[%s3837_s9] sm:$0xff] %v2647_v9 }
 0x1d3   : > { %v1196_v14 = vld [vmem:[%s3298_s10 + $0x1b28] sm:$0xff]  ;;  %1928 = vmatpush.msrb.mxu0 %v1128_v13  ;;  %v449_v13 = vld [vmem:[%s3298_s10 + $0x3d0] sm:$0xff] }
 0x1d4   : > { %v1256_v16 = vld [vmem:[%s3298_s10 + $0x1d08] sm:$0xff]  ;;  %1947 = vmatpush.msrb.mxu1 %v1196_v14  ;;  %v509_v14 = vld [vmem:[%s3298_s10 + $0x5b0] sm:$0xff] }
 0x1d5   : > { %v1324_v17 = vld [vmem:[%s3298_s10 + $0x1f28] sm:$0xff]  ;;  %1968 = vmatpush.msrb.mxu2 %v1256_v16  ;;  %v377_v16 = vld [vmem:[%s3298_s10 + $0x190] sm:$0xff] }
 0x1d6   : > { %v1124_v19 = vld [vmem:[%s3298_s10 + $0x18e8] sm:$0xff]  ;;  %1987 = vmatpush.msrb.mxu3 %v1324_v17  ;;  %v445_v17 = vld [vmem:[%s3298_s10 + $0x3b0] sm:$0xff] }
 0x1d7   : > { %v1192_v20 = vld [vmem:[%s3298_s10 + $0x1b08] sm:$0xff]  ;;  %1929 = vmatpush.msrb.mxu0 %v1124_v19  ;;  %v573_v19 = vld [vmem:[%s3298_s10 + $0x7b0] sm:$0xff] }
 0x1d8   : > { %v1252_v21 = vld [vmem:[%s3298_s10 + $0x1ce8] sm:$0xff]  ;;  %1948 = vmatpush.msrb.mxu1 %v1192_v20  ;;  %v373_v20 = vld [vmem:[%s3298_s10 + $0x170] sm:$0xff] }
 0x1d9   : > { %v1320_v22 = vld [vmem:[%s3298_s10 + $0x1f08] sm:$0xff]  ;;  %1969 = vmatpush.msrb.mxu2 %v1252_v21  ;;  %v441_v21 = vld [vmem:[%s3298_s10 + $0x390] sm:$0xff] }
 0x1da   : > { %v1120_v24 = vld [vmem:[%s3298_s10 + $0x18c8] sm:$0xff]  ;;  %1988 = vmatpush.msrb.mxu3 %v1320_v22  ;;  %v501_v22 = vld [vmem:[%s3298_s10 + $0x570] sm:$0xff] }
 0x1db   : > { %v1188_v25 = vld [vmem:[%s3298_s10 + $0x1ae8] sm:$0xff]  ;;  %1930 = vmatpush.msrb.mxu0 %v1120_v24  ;;  %v369_v24 = vld [vmem:[%s3298_s10 + $0x150] sm:$0xff] }
 0x1dc   : > { %v1248_v27 = vld [vmem:[%s3298_s10 + $0x1cc8] sm:$0xff]  ;;  %1949 = vmatpush.msrb.mxu1 %v1188_v25  ;;  %v437_v25 = vld [vmem:[%s3298_s10 + $0x370] sm:$0xff] }
 0x1dd   : > { %v1316_v28 = vld [vmem:[%s3298_s10 + $0x1ee8] sm:$0xff]  ;;  %1970 = vmatpush.msrb.mxu2 %v1248_v27  ;;  %v565_v27 = vld [vmem:[%s3298_s10 + $0x770] sm:$0xff] }
 0x1de   : > { %v1116_v29 = vld [vmem:[%s3298_s10 + $0x18a8] sm:$0xff]  ;;  %1989 = vmatpush.msrb.mxu3 %v1316_v28  ;;  %v365_v28 = vld [vmem:[%s3298_s10 + $0x130] sm:$0xff] }
 0x1df   : > { %v1184_v30 = vld [vmem:[%s3298_s10 + $0x1ac8] sm:$0xff]  ;;  %1931 = vmatpush.msrb.mxu0 %v1116_v29  ;;  %v433_v29 = vld [vmem:[%s3298_s10 + $0x350] sm:$0xff] }
 0x1e0   : > { %v1244_v31 = vld [vmem:[%s3298_s10 + $0x1ca8] sm:$0xff]  ;;  %1950 = vmatpush.msrb.mxu1 %v1184_v30  ;;  %v493_v30 = vld [vmem:[%s3298_s10 + $0x530] sm:$0xff] }
 0x1e1   : > { %v1312_v32 = vld [vmem:[%s3298_s10 + $0x1ec8] sm:$0xff]  ;;  %1971 = vmatpush.msrb.mxu2 %v1244_v31  ;;  %v561_v31 = vld [vmem:[%s3298_s10 + $0x750] sm:$0xff] }
 0x1e2   : > { %v1112_v34 = vld [vmem:[%s3298_s10 + $0x1888] sm:$0xff]  ;;  %1990 = vmatpush.msrb.mxu3 %v1312_v32  ;;  %v361_v32 = vld [vmem:[%s3298_s10 + $0x110] sm:$0xff] }
 0x1e3   : > { %v1180_v35 = vld [vmem:[%s3298_s10 + $0x1aa8] sm:$0xff]  ;;  %1932 = vmatpush.msrb.mxu0 %v1112_v34  ;;  %v489_v34 = vld [vmem:[%s3298_s10 + $0x510] sm:$0xff] }
 0x1e4   : > { %v1240_v36 = vld [vmem:[%s3298_s10 + $0x1c88] sm:$0xff]  ;;  %1951 = vmatpush.msrb.mxu1 %v1180_v35  ;;  %v557_v35 = vld [vmem:[%s3298_s10 + $0x730] sm:$0xff] }
 0x1e5   : > { %v1308_v37 = vld [vmem:[%s3298_s10 + $0x1ea8] sm:$0xff]  ;;  %1972 = vmatpush.msrb.mxu2 %v1240_v36  ;;  %v357_v36 = vld [vmem:[%s3298_s10 + $0xf0] sm:$0xff] }
 0x1e6   : > { %v1108_v39 = vld [vmem:[%s3298_s10 + $0x1868] sm:$0xff]  ;;  %1991 = vmatpush.msrb.mxu3 %v1308_v37  ;;  %v425_v37 = vld [vmem:[%s3298_s10 + $0x310] sm:$0xff] }
 0x1e7   : > { %v1176_v40 = vld [vmem:[%s3298_s10 + $0x1a88] sm:$0xff]  ;;  %1933 = vmatpush.msrb.mxu0 %v1108_v39  ;;  %v553_v39 = vld [vmem:[%s3298_s10 + $0x710] sm:$0xff] }
 0x1e8   : > { %v1236_v42 = vld [vmem:[%s3298_s10 + $0x1c68] sm:$0xff]  ;;  %1952 = vmatpush.msrb.mxu1 %v1176_v40  ;;  %v353_v40 = vld [vmem:[%s3298_s10 + $0xd0] sm:$0xff] }
 0x1e9   : > { %v1304_v43 = vld [vmem:[%s3298_s10 + $0x1e88] sm:$0xff]  ;;  %1973 = vmatpush.msrb.mxu2 %v1236_v42  ;;  %v481_v42 = vld [vmem:[%s3298_s10 + $0x4d0] sm:$0xff] }
 0x1ea   : > { %v1104_v44 = vld [vmem:[%s3298_s10 + $0x1848] sm:$0xff]  ;;  %1992 = vmatpush.msrb.mxu3 %v1304_v43  ;;  %v549_v43 = vld [vmem:[%s3298_s10 + $0x6f0] sm:$0xff] }
 0x1eb   : > { %v1172_v45 = vld [vmem:[%s3298_s10 + $0x1a68] sm:$0xff]  ;;  %1934 = vmatpush.msrb.mxu0 %v1104_v44  ;;  %v349_v44 = vld [vmem:[%s3298_s10 + $0xb0] sm:$0xff] }
 0x1ec   : > { %v1232_v47 = vld [vmem:[%s3298_s10 + $0x1c48] sm:$0xff]  ;;  %1953 = vmatpush.msrb.mxu1 %v1172_v45  ;;  %v417_v45 = vld [vmem:[%s3298_s10 + $0x2d0] sm:$0xff] }
 0x1ed   : > { %v1300_v48 = vld [vmem:[%s3298_s10 + $0x1e68] sm:$0xff]  ;;  %1974 = vmatpush.msrb.mxu2 %v1232_v47  ;;  %v545_v47 = vld [vmem:[%s3298_s10 + $0x6d0] sm:$0xff] }
 0x1ee   : > { %v1100_v49 = vld [vmem:[%s3298_s10 + $0x1828] sm:$0xff]  ;;  %1993 = vmatpush.msrb.mxu3 %v1300_v48  ;;  %v345_v48 = vld [vmem:[%s3298_s10 + $0x90] sm:$0xff] }
 0x1ef   : > { %v1168_v50 = vld [vmem:[%s3298_s10 + $0x1a48] sm:$0xff]  ;;  %1935 = vmatpush.msrb.mxu0 %v1100_v49  ;;  %v413_v49 = vld [vmem:[%s3298_s10 + $0x2b0] sm:$0xff] }
 0x1f0   : > { %v1228_v52 = vld [vmem:[%s3298_s10 + $0x1c28] sm:$0xff]  ;;  %1954 = vmatpush.msrb.mxu1 %v1168_v50  ;;  %v473_v50 = vld [vmem:[%s3298_s10 + $0x490] sm:$0xff] }
 0x1f1   : > { %v1296_v53 = vld [vmem:[%s3298_s10 + $0x1e48] sm:$0xff]  ;;  %1975 = vmatpush.msrb.mxu2 %v1228_v52  ;;  %v341_v52 = vld [vmem:[%s3298_s10 + $0x70] sm:$0xff] }
 0x1f2   : > { %v1096_v55 = vld [vmem:[%s3298_s10 + $0x1808] sm:$0xff]  ;;  %1994 = vmatpush.msrb.mxu3 %v1296_v53  ;;  %v409_v53 = vld [vmem:[%s3298_s10 + $0x290] sm:$0xff] }
 0x1f3   : > { %v1164_v56 = vld [vmem:[%s3298_s10 + $0x1a28] sm:$0xff]  ;;  %1936 = vmatpush.msrb.mxu0 %v1096_v55  ;;  %v537_v55 = vld [vmem:[%s3298_s10 + $0x690] sm:$0xff] }
 0x1f4   : > { %v1224_v58 = vld [vmem:[%s3298_s10 + $0x1c08] sm:$0xff]  ;;  %1955 = vmatpush.msrb.mxu1 %v1164_v56  ;;  %1937 = vmatmul.f32.vlgmr.msrb.gmra.mxu0 %v2922_v2  ;;  %v337_v56 = vld [vmem:[%s3298_s10 + $0x50] sm:$0xff] }
 0x1f5   : > { %v1292_v59 = vld [vmem:[%s3298_s10 + $0x1e28] sm:$0xff]  ;;  %1976 = vmatpush.msrb.mxu2 %v1224_v58  ;;  %2001 = vmatpush.msra.mxu0 %v389_v61  ;;  %v465_v58 = vld [vmem:[%s3298_s10 + $0x450] sm:$0xff] }
 0x1f6   : > { %1995 = vmatpush.msrb.mxu3 %v1292_v59  ;;  %v1160_v0 = vld [vmem:[%s3298_s10 + $0x1a08] sm:$0xff]  ;;  %1977 = vmatmul.f32.vlgmr.msrb.gmra.mxu2 %v2923_v3  ;;  %v533_v59 = vld [vmem:[%s3298_s10 + $0x670] sm:$0xff] }
 0x1f7   : > { %v1288_v1 = vld [vmem:[%s3298_s10 + $0x1e08] sm:$0xff]  ;;  %2041 = vmatpush.msra.mxu2 %v517_v62  ;;  %1956 = vmatpush.msrb.mxu1 %v1160_v0  ;;  %v401_v61 = vld [vmem:[%s3298_s10 + $0x250] sm:$0xff] }
 0x1f8   : > { %1996 = vmatpush.msrb.mxu3 %v1288_v1  ;;  %v2924_v10 = vld [vmem:[#allocation2 + $0x68] sm:$0xff]  ;;  %2002 = vmatpush.msra.mxu0 %v385_v4  ;;  %v461_v62 = vld [vmem:[%s3298_s10 + $0x430] sm:$0xff] }
 0x1f9   : > { %1957 = vmatmul.f32.vlgmr.msrb.gmra.mxu1 %v2924_v10  ;;  %1997 = vmatmul.f32.vlgmr.msrb.gmra.mxu3 %v2925_v11  ;;  %v329_v0 = vld [vmem:[%s3298_s10 + $0x10] sm:$0xff] }
 0x1fa   : > { %2021 = vmatpush.msra.mxu1 %v453_v5  ;;  %2042 = vmatpush.msra.mxu2 %v513_v7  ;;  %v397_v1 = vld [vmem:[%s3298_s10 + $0x230] sm:$0xff] }
 0x1fb   : > { %2061 = vmatpush.msra.mxu3 %v581_v8  ;;  %2003 = vmatpush.msra.mxu0 %v381_v12  ;;  %v457_v2 = vld [vmem:[%s3298_s10 + $0x410] sm:$0xff] }
 0x1fc   : > { %2022 = vmatpush.msra.mxu1 %v449_v13  ;;  %2043 = vmatpush.msra.mxu2 %v509_v14  ;;  %v525_v3 = vld [vmem:[%s3298_s10 + $0x630] sm:$0xff] }
 0x1fd   : > { %2062 = vmatpush.msra.mxu3 %v577_v15  ;;  %2004 = vmatpush.msra.mxu0 %v377_v16  ;;  %v645_v4 = vld [vmem:[%s3298_s10 + $0x9f0] sm:$0xff] }
 0x1fe   : > { %2023 = vmatpush.msra.mxu1 %v445_v17  ;;  %2044 = vmatpush.msra.mxu2 %v505_v18  ;;  %v773_v5 = vld [vmem:[%s3298_s10 + $0xdf0] sm:$0xff] }
 0x1ff   : > { %2063 = vmatpush.msra.mxu3 %v573_v19  ;;  %2005 = vmatpush.msra.mxu0 %v373_v20  ;;  %v393_v7 = vld [vmem:[%s3298_s10 + $0x210] sm:$0xff] }
 0x200   : > { %2024 = vmatpush.msra.mxu1 %v441_v21  ;;  %2045 = vmatpush.msra.mxu2 %v501_v22  ;;  %v521_v8 = vld [vmem:[%s3298_s10 + $0x610] sm:$0xff] }
 0x201   : > { %2064 = vmatpush.msra.mxu3 %v569_v23  ;;  %2006 = vmatpush.msra.mxu0 %v369_v24  ;;  %v641_v9 = vld [vmem:[%s3298_s10 + $0x9d0] sm:$0xff] }
 0x202   : > { %2025 = vmatpush.msra.mxu1 %v437_v25  ;;  %2046 = vmatpush.msra.mxu2 %v497_v26  ;;  %v709_v10 = vld [vmem:[%s3298_s10 + $0xbf0] sm:$0xff] }
 0x203   : > { %2065 = vmatpush.msra.mxu3 %v565_v27  ;;  %2007 = vmatpush.msra.mxu0 %v365_v28  ;;  %v769_v11 = vld [vmem:[%s3298_s10 + $0xdd0] sm:$0xff] }
 0x204   : > { %2026 = vmatpush.msra.mxu1 %v433_v29  ;;  %2047 = vmatpush.msra.mxu2 %v493_v30  ;;  %v837_v12 = vld [vmem:[%s3298_s10 + $0xff0] sm:$0xff] }
 0x205   : > { %2066 = vmatpush.msra.mxu3 %v561_v31  ;;  %2008 = vmatpush.msra.mxu0 %v361_v32  ;;  %v637_v13 = vld [vmem:[%s3298_s10 + $0x9b0] sm:$0xff] }
 0x206   : > { %2027 = vmatpush.msra.mxu1 %v429_v33  ;;  %2048 = vmatpush.msra.mxu2 %v489_v34  ;;  %v705_v14 = vld [vmem:[%s3298_s10 + $0xbd0] sm:$0xff] }
 0x207   : > { %2067 = vmatpush.msra.mxu3 %v557_v35  ;;  %2009 = vmatpush.msra.mxu0 %v357_v36  ;;  %v765_v15 = vld [vmem:[%s3298_s10 + $0xdb0] sm:$0xff] }
 0x208   : > { %2028 = vmatpush.msra.mxu1 %v425_v37  ;;  %2049 = vmatpush.msra.mxu2 %v485_v38  ;;  %v833_v16 = vld [vmem:[%s3298_s10 + $0xfd0] sm:$0xff] }
 0x209   : > { %2068 = vmatpush.msra.mxu3 %v553_v39  ;;  %2010 = vmatpush.msra.mxu0 %v353_v40  ;;  %v633_v17 = vld [vmem:[%s3298_s10 + $0x990] sm:$0xff] }
 0x20a   : > { %2029 = vmatpush.msra.mxu1 %v421_v41  ;;  %2050 = vmatpush.msra.mxu2 %v481_v42  ;;  %v701_v18 = vld [vmem:[%s3298_s10 + $0xbb0] sm:$0xff] }
 0x20b   : > { %2069 = vmatpush.msra.mxu3 %v549_v43  ;;  %2011 = vmatpush.msra.mxu0 %v349_v44  ;;  %v761_v19 = vld [vmem:[%s3298_s10 + $0xd90] sm:$0xff] }
 0x20c   : > { %2030 = vmatpush.msra.mxu1 %v417_v45  ;;  %2051 = vmatpush.msra.mxu2 %v477_v46  ;;  %v829_v20 = vld [vmem:[%s3298_s10 + $0xfb0] sm:$0xff] }
 0x20d   : > { %2070 = vmatpush.msra.mxu3 %v545_v47  ;;  %2012 = vmatpush.msra.mxu0 %v345_v48  ;;  %v629_v21 = vld [vmem:[%s3298_s10 + $0x970] sm:$0xff] }
 0x20e   : > { %2031 = vmatpush.msra.mxu1 %v413_v49  ;;  %2052 = vmatpush.msra.mxu2 %v473_v50  ;;  %v697_v22 = vld [vmem:[%s3298_s10 + $0xb90] sm:$0xff] }
 0x20f   : > { %2071 = vmatpush.msra.mxu3 %v541_v51  ;;  %2013 = vmatpush.msra.mxu0 %v341_v52  ;;  %v757_v23 = vld [vmem:[%s3298_s10 + $0xd70] sm:$0xff] }
 0x210   : > { %2032 = vmatpush.msra.mxu1 %v409_v53  ;;  %2053 = vmatpush.msra.mxu2 %v469_v54  ;;  %v825_v24 = vld [vmem:[%s3298_s10 + $0xf90] sm:$0xff] }
 0x211   : > { %2072 = vmatpush.msra.mxu3 %v537_v55  ;;  %2014 = vmatpush.msra.mxu0 %v337_v56  ;;  %v625_v25 = vld [vmem:[%s3298_s10 + $0x950] sm:$0xff] }
 0x212   : > { %2033 = vmatpush.msra.mxu1 %v405_v57  ;;  %2054 = vmatpush.msra.mxu2 %v465_v58  ;;  %v693_v26 = vld [vmem:[%s3298_s10 + $0xb70] sm:$0xff] }
 0x213   : > { %2073 = vmatpush.msra.mxu3 %v533_v59  ;;  %2015 = vmatpush.msra.mxu0 %v333_v60  ;;  %v753_v27 = vld [vmem:[%s3298_s10 + $0xd50] sm:$0xff] }
 0x214   : > { %2034 = vmatpush.msra.mxu1 %v401_v61  ;;  %2055 = vmatpush.msra.mxu2 %v461_v62  ;;  %v821_v28 = vld [vmem:[%s3298_s10 + $0xf70] sm:$0xff] }
 0x215   : > { %2074 = vmatpush.msra.mxu3 %v529_v63  ;;  %2016 = vmatpush.msra.mxu0 %v329_v0  ;;  %v621_v29 = vld [vmem:[%s3298_s10 + $0x930] sm:$0xff] }
 0x216   : > { %2035 = vmatpush.msra.mxu1 %v397_v1  ;;  %2056 = vmatpush.msra.mxu2 %v457_v2  ;;  %v689_v30 = vld [vmem:[%s3298_s10 + $0xb50] sm:$0xff] }
 0x217   : > { %2075 = vmatpush.msra.mxu3 %v525_v3  ;;  %2081 = vmatpush.msrb.mxu0 %v645_v4  ;;  %v749_v31 = vld [vmem:[%s3298_s10 + $0xd30] sm:$0xff] }
 0x218   : > { %2121 = vmatpush.msrb.mxu2 %v773_v5  ;;  %2036 = vmatpush.msra.mxu1 %v393_v7  ;;  %v817_v32 = vld [vmem:[%s3298_s10 + $0xf50] sm:$0xff] }
 0x219   : > { %2076 = vmatpush.msra.mxu3 %v521_v8  ;;  %2082 = vmatpush.msrb.mxu0 %v641_v9  ;;  %v617_v33 = vld [vmem:[%s3298_s10 + $0x910] sm:$0xff] }
 0x21a   : > { %2101 = vmatpush.msrb.mxu1 %v709_v10  ;;  %2122 = vmatpush.msrb.mxu2 %v769_v11  ;;  %v685_v34 = vld [vmem:[%s3298_s10 + $0xb30] sm:$0xff]  ;;  %v2926_v10 = vld [vmem:[#allocation2] sm:$0xff] }
 0x21b   : > { %2141 = vmatpush.msrb.mxu3 %v837_v12  ;;  %2083 = vmatpush.msrb.mxu0 %v637_v13  ;;  %v745_v35 = vld [vmem:[%s3298_s10 + $0xd10] sm:$0xff] }
 0x21c   : > { %2102 = vmatpush.msrb.mxu1 %v705_v14  ;;  %2123 = vmatpush.msrb.mxu2 %v765_v15  ;;  %v813_v36 = vld [vmem:[%s3298_s10 + $0xf30] sm:$0xff] }
 0x21d   : > { %2142 = vmatpush.msrb.mxu3 %v833_v16  ;;  %2084 = vmatpush.msrb.mxu0 %v633_v17  ;;  %v613_v37 = vld [vmem:[%s3298_s10 + $0x8f0] sm:$0xff]  ;;  %v2928_v16 = vld [vmem:[#allocation2 + $0x8] sm:$0xff]  ;;  %v2929_v17 = vld [vmem:[#allocation2 + $0x18] sm:$0xff] }
 0x21e   : > { %2103 = vmatpush.msrb.mxu1 %v701_v18  ;;  %2124 = vmatpush.msrb.mxu2 %v761_v19  ;;  %v681_v38 = vld [vmem:[%s3298_s10 + $0xb10] sm:$0xff] }
 0x21f   : > { %2143 = vmatpush.msrb.mxu3 %v829_v20  ;;  %2085 = vmatpush.msrb.mxu0 %v629_v21  ;;  %v741_v39 = vld [vmem:[%s3298_s10 + $0xcf0] sm:$0xff] }
 0x220   : > { %2104 = vmatpush.msrb.mxu1 %v697_v22  ;;  %2125 = vmatpush.msrb.mxu2 %v757_v23  ;;  %v809_v40 = vld [vmem:[%s3298_s10 + $0xf10] sm:$0xff] }
 0x221   : > { %2144 = vmatpush.msrb.mxu3 %v825_v24  ;;  %2086 = vmatpush.msrb.mxu0 %v625_v25  ;;  %v609_v41 = vld [vmem:[%s3298_s10 + $0x8d0] sm:$0xff] }
 0x222   : > { %2105 = vmatpush.msrb.mxu1 %v693_v26  ;;  %2126 = vmatpush.msrb.mxu2 %v753_v27  ;;  %v677_v42 = vld [vmem:[%s3298_s10 + $0xaf0] sm:$0xff] }
 0x223   : > { %2145 = vmatpush.msrb.mxu3 %v821_v28  ;;  %2087 = vmatpush.msrb.mxu0 %v621_v29  ;;  %v737_v43 = vld [vmem:[%s3298_s10 + $0xcd0] sm:$0xff] }
 0x224   : > { %2106 = vmatpush.msrb.mxu1 %v689_v30  ;;  %2127 = vmatpush.msrb.mxu2 %v749_v31  ;;  %v805_v44 = vld [vmem:[%s3298_s10 + $0xef0] sm:$0xff] }
 0x225   : > { %2146 = vmatpush.msrb.mxu3 %v817_v32  ;;  %2088 = vmatpush.msrb.mxu0 %v617_v33  ;;  %v605_v45 = vld [vmem:[%s3298_s10 + $0x8b0] sm:$0xff] }
 0x226   : > { %2107 = vmatpush.msrb.mxu1 %v685_v34  ;;  %2128 = vmatpush.msrb.mxu2 %v745_v35  ;;  %v673_v46 = vld [vmem:[%s3298_s10 + $0xad0] sm:$0xff]  ;;  %v2931_v34 = vld [vmem:[#allocation2 + $0x20] sm:$0xff] }
 0x227   : > { %2147 = vmatpush.msrb.mxu3 %v813_v36  ;;  %2089 = vmatpush.msrb.mxu0 %v613_v37  ;;  %v733_v47 = vld [vmem:[%s3298_s10 + $0xcb0] sm:$0xff]  ;;  %v2932_v36 = vld [vmem:[#allocation2 + $0x38] sm:$0xff] }
 0x228   : > { %2108 = vmatpush.msrb.mxu1 %v681_v38  ;;  %2129 = vmatpush.msrb.mxu2 %v741_v39  ;;  %v801_v48 = vld [vmem:[%s3298_s10 + $0xed0] sm:$0xff]  ;;  %v2933_v39 = vld [vmem:[%s3710_s24] sm:$0xf] }
 0x229   : > { %2148 = vmatpush.msrb.mxu3 %v809_v40  ;;  %2090 = vmatpush.msrb.mxu0 %v609_v41  ;;  %v601_v49 = vld [vmem:[%s3298_s10 + $0x890] sm:$0xff]  ;;  %v1354_v40 = vperm.slane %v2933_v39, 1 }
 0x22a   : > { %2109 = vmatpush.msrb.mxu1 %v677_v42  ;;  %2130 = vmatpush.msrb.mxu2 %v737_v43  ;;  %v669_v50 = vld [vmem:[%s3298_s10 + $0xab0] sm:$0xff]  ;;  %v1698_v43 = vpop.f32.mrf.mxu0 }
 0x22b   : > { %2149 = vmatpush.msrb.mxu3 %v805_v44  ;;  %2091 = vmatpush.msrb.mxu0 %v605_v45  ;;  %v729_v51 = vld [vmem:[%s3298_s10 + $0xc90] sm:$0xff]  ;;  %v2934_v44 = vld [vmem:[#allocation2 + $0x28] sm:$0xff] }
 0x22c   : > { %2110 = vmatpush.msrb.mxu1 %v673_v46  ;;  %v797_v52 = vld [vmem:[%s3298_s10 + $0xeb0] sm:$0xff]  ;;  %2131 = vmatpush.msrb.mxu2 %v733_v47 }
 0x22d   : > { %2150 = vmatpush.msrb.mxu3 %v801_v48  ;;  %v597_v53 = vld [vmem:[%s3298_s10 + $0x870] sm:$0xff]  ;;  %2092 = vmatpush.msrb.mxu0 %v601_v49 }
 0x22e   : > { %v665_v54 = vld [vmem:[%s3298_s10 + $0xa90] sm:$0xff]  ;;  %2111 = vmatpush.msrb.mxu1 %v669_v50  ;;  %2132 = vmatpush.msrb.mxu2 %v729_v51  ;;  %v1699_v51 = vadd.f32 %v1698_v43, %v1354_v40  ;;  %v2937_v40 = vld [vmem:[#allocation2 + $0x48] sm:$0xff] }
 0x22f   : > { %v725_v55 = vld [vmem:[%s3298_s10 + $0xc70] sm:$0xff]  ;;  %2151 = vmatpush.msrb.mxu3 %v797_v52  ;;  %2093 = vmatpush.msrb.mxu0 %v597_v53 }
 0x230   : > { %v793_v56 = vld [vmem:[%s3298_s10 + $0xe90] sm:$0xff]  ;;  %2112 = vmatpush.msrb.mxu1 %v665_v54  ;;  %2133 = vmatpush.msrb.mxu2 %v725_v55  ;;  %v1718_v54 = vpop.f32.mrf.mxu1 }
 0x231   : > { %v593_v57 = vld [vmem:[%s3298_s10 + $0x850] sm:$0xff]  ;;  %2152 = vmatpush.msrb.mxu3 %v793_v56  ;;  %2017 = vmatmul.f32.vlgmr.msra.gmra.mxu0 %v2926_v10 }
 0x232   : > { %v661_v58 = vld [vmem:[%s3298_s10 + $0xa70] sm:$0xff]  ;;  %2094 = vmatpush.msrb.mxu0 %v593_v57  ;;  %2037 = vmatmul.f32.vlgmr.msra.gmra.mxu1 %v2928_v16 }
 0x233   : > { %v721_v59 = vld [vmem:[%s3298_s10 + $0xc50] sm:$0xff]  ;;  %2113 = vmatpush.msrb.mxu1 %v661_v58  ;;  %2077 = vmatmul.f32.vlgmr.msra.gmra.mxu3 %v2929_v17 }
 0x234   : > { %v789_v60 = vld [vmem:[%s3298_s10 + $0xe70] sm:$0xff]  ;;  %2134 = vmatpush.msrb.mxu2 %v721_v59 }
 0x235   : > { %v589_v61 = vld [vmem:[%s3298_s10 + $0x830] sm:$0xff]  ;;  %2153 = vmatpush.msrb.mxu3 %v789_v60 }
 0x236   : > { %v657_v62 = vld [vmem:[%s3298_s10 + $0xa50] sm:$0xff]  ;;  %2095 = vmatpush.msrb.mxu0 %v589_v61  ;;  %v1719_v61 = vadd.f32 %v1718_v54, %v1699_v51 }
 0x237   : > { %v717_v63 = vld [vmem:[%s3298_s10 + $0xc30] sm:$0xff]  ;;  %2114 = vmatpush.msrb.mxu1 %v657_v62 }
 0x238   : > { %v785_v0 = vld [vmem:[%s3298_s10 + $0xe50] sm:$0xff]  ;;  %2135 = vmatpush.msrb.mxu2 %v717_v63 }
 0x239   : > { %v585_v1 = vld [vmem:[%s3298_s10 + $0x810] sm:$0xff]  ;;  %2154 = vmatpush.msrb.mxu3 %v785_v0  ;;  %v1738_v0 = vpop.f32.mrf.mxu2 }
 0x23a   : > { %v653_v2 = vld [vmem:[%s3298_s10 + $0xa30] sm:$0xff]  ;;  %2096 = vmatpush.msrb.mxu0 %v585_v1 }
 0x23b   : > { %v713_v3 = vld [vmem:[%s3298_s10 + $0xc10] sm:$0xff]  ;;  %2115 = vmatpush.msrb.mxu1 %v653_v2  ;;  %2097 = vmatmul.f32.vlgmr.msrb.gmra.mxu0 %v2931_v34 }
 0x23c   : > { %v781_v4 = vld [vmem:[%s3298_s10 + $0xe30] sm:$0xff]  ;;  %2136 = vmatpush.msrb.mxu2 %v713_v3 }
 0x23d   : > { %v901_v5 = vld [vmem:[%s3298_s10 + $0x11f0] sm:$0xff]  ;;  %2155 = vmatpush.msrb.mxu3 %v781_v4 }
 0x23e   : > { %v1029_v7 = vld [vmem:[%s3298_s10 + $0x15f0] sm:$0xff]  ;;  %2161 = vmatpush.msra.mxu0 %v901_v5 }
 0x23f   : > { %v649_v8 = vld [vmem:[%s3298_s10 + $0xa10] sm:$0xff] }
 0x240   : > { %v777_v9 = vld [vmem:[%s3298_s10 + $0xe10] sm:$0xff]  ;;  %2116 = vmatpush.msrb.mxu1 %v649_v8  ;;  %v1739_v8 = vadd.f32 %v1738_v0, %v1719_v61 }
 0x241   : > { %v2927_v11 = vld [vmem:[#allocation2 + $0x10] sm:$0xff]  ;;  %2156 = vmatpush.msrb.mxu3 %v777_v9  ;;  %2117 = vmatmul.f32.vlgmr.msrb.gmra.mxu1 %v2934_v44  ;;  %v1818_v39 = vpop.f32.mrf.mxu2 }
 0x242   : > { %2057 = vmatmul.f32.vlgmr.msra.gmra.mxu2 %v2927_v11  ;;  %v897_v12 = vld [vmem:[%s3298_s10 + $0x11d0] sm:$0xff]  ;;  %2157 = vmatmul.f32.vlgmr.msrb.gmra.mxu3 %v2932_v36  ;;  %v1758_v11 = vpop.f32.mrf.mxu3 }
 0x243   : > { %2201 = vmatpush.msra.mxu2 %v1029_v7  ;;  %v965_v13 = vld [vmem:[%s3298_s10 + $0x13f0] sm:$0xff]  ;;  %2162 = vmatpush.msra.mxu0 %v897_v12 }
 0x244   : > { %v1025_v14 = vld [vmem:[%s3298_s10 + $0x15d0] sm:$0xff]  ;;  %2181 = vmatpush.msra.mxu1 %v965_v13 }
 0x245   : > { %v1093_v15 = vld [vmem:[%s3298_s10 + $0x17f0] sm:$0xff]  ;;  %2202 = vmatpush.msra.mxu2 %v1025_v14 }
 0x246   : > { %v893_v18 = vld [vmem:[%s3298_s10 + $0x11b0] sm:$0xff]  ;;  %2221 = vmatpush.msra.mxu3 %v1093_v15 }
 0x247   : > { %v961_v19 = vld [vmem:[%s3298_s10 + $0x13d0] sm:$0xff]  ;;  %2163 = vmatpush.msra.mxu0 %v893_v18  ;;  %v1759_v18 = vadd.f32 %v1758_v11, %v1739_v8 }
 0x248   : > { %v1021_v20 = vld [vmem:[%s3298_s10 + $0x15b0] sm:$0xff]  ;;  %2182 = vmatpush.msra.mxu1 %v961_v19 }
 0x249   : > { %v1089_v21 = vld [vmem:[%s3298_s10 + $0x17d0] sm:$0xff]  ;;  %2203 = vmatpush.msra.mxu2 %v1021_v20 }
 0x24a   : > { %v889_v22 = vld [vmem:[%s3298_s10 + $0x1190] sm:$0xff]  ;;  %2222 = vmatpush.msra.mxu3 %v1089_v21  ;;  %v1778_v21 = vpop.f32.mrf.mxu0  ;;  %v1838_v51 = vpop.f32.mrf.mxu3 }
 0x24b   : > { %v957_v23 = vld [vmem:[%s3298_s10 + $0x13b0] sm:$0xff]  ;;  %2164 = vmatpush.msra.mxu0 %v889_v22 }
 0x24c   : > { %v1017_v24 = vld [vmem:[%s3298_s10 + $0x1590] sm:$0xff]  ;;  %2183 = vmatpush.msra.mxu1 %v957_v23 }
 0x24d   : > { %v1085_v25 = vld [vmem:[%s3298_s10 + $0x17b0] sm:$0xff]  ;;  %2204 = vmatpush.msra.mxu2 %v1017_v24 }
 0x24e   : > { %v885_v26 = vld [vmem:[%s3298_s10 + $0x1170] sm:$0xff]  ;;  %2223 = vmatpush.msra.mxu3 %v1085_v25 }
 0x24f   : > { %v953_v27 = vld [vmem:[%s3298_s10 + $0x1390] sm:$0xff]  ;;  %2165 = vmatpush.msra.mxu0 %v885_v26  ;;  %v1779_v26 = vadd.f32 %v1778_v21, %v1759_v18 }
 0x250   : > { %v1013_v28 = vld [vmem:[%s3298_s10 + $0x1570] sm:$0xff]  ;;  %2184 = vmatpush.msra.mxu1 %v953_v27 }
 0x251   : > { %v1081_v29 = vld [vmem:[%s3298_s10 + $0x1790] sm:$0xff]  ;;  %2205 = vmatpush.msra.mxu2 %v1013_v28 }
 0x252   : > { %v2930_v30 = vld [vmem:[#allocation2 + $0x30] sm:$0xff]  ;;  %2224 = vmatpush.msra.mxu3 %v1081_v29  ;;  %v1798_v29 = vpop.f32.mrf.mxu1 }
 0x253   : > { %2137 = vmatmul.f32.vlgmr.msrb.gmra.mxu2 %v2930_v30  ;;  %v881_v31 = vld [vmem:[%s3298_s10 + $0x1150] sm:$0xff]  ;;  %v1799_v36 = vadd.f32 %v1798_v29, %v1779_v26 }
 0x254   : > { %v949_v32 = vld [vmem:[%s3298_s10 + $0x1370] sm:$0xff]  ;;  %2166 = vmatpush.msra.mxu0 %v881_v31 }
 0x255   : > { %v1009_v33 = vld [vmem:[%s3298_s10 + $0x1550] sm:$0xff]  ;;  %2185 = vmatpush.msra.mxu1 %v949_v32  ;;  %v2935_v32 = vld [vmem:[#allocation2 + $0x40] sm:$0xff] }
 0x256   : > { %v1077_v35 = vld [vmem:[%s3298_s10 + $0x1770] sm:$0xff]  ;;  %2206 = vmatpush.msra.mxu2 %v1009_v33 }
 0x257   : > { %v877_v37 = vld [vmem:[%s3298_s10 + $0x1130] sm:$0xff]  ;;  %2225 = vmatpush.msra.mxu3 %v1077_v35 }
 0x258   : > { %v945_v38 = vld [vmem:[%s3298_s10 + $0x1350] sm:$0xff]  ;;  %2167 = vmatpush.msra.mxu0 %v877_v37 }
 0x259   : > { %v1005_v41 = vld [vmem:[%s3298_s10 + $0x1530] sm:$0xff]  ;;  %2186 = vmatpush.msra.mxu1 %v945_v38 }
 0x25a   : > { %v1073_v42 = vld [vmem:[%s3298_s10 + $0x1750] sm:$0xff]  ;;  %2207 = vmatpush.msra.mxu2 %v1005_v41  ;;  %v2938_v41 = vld [vmem:[#allocation2 + $0x58] sm:$0xff] }
 0x25b   : > { %v873_v45 = vld [vmem:[%s3298_s10 + $0x1110] sm:$0xff]  ;;  %2226 = vmatpush.msra.mxu3 %v1073_v42 }
 0x25c   : > { %v941_v46 = vld [vmem:[%s3298_s10 + $0x1330] sm:$0xff]  ;;  %2168 = vmatpush.msra.mxu0 %v873_v45 }
 0x25d   : > { %v1001_v47 = vld [vmem:[%s3298_s10 + $0x1510] sm:$0xff]  ;;  %2187 = vmatpush.msra.mxu1 %v941_v46 }
 0x25e   : > { %v1069_v48 = vld [vmem:[%s3298_s10 + $0x1730] sm:$0xff]  ;;  %2208 = vmatpush.msra.mxu2 %v1001_v47 }
 0x25f   : > { %v869_v49 = vld [vmem:[%s3298_s10 + $0x10f0] sm:$0xff]  ;;  %2227 = vmatpush.msra.mxu3 %v1069_v48  ;;  %v1819_v48 = vadd.f32 %v1818_v39, %v1799_v36 }
 0x260   : > { %v937_v50 = vld [vmem:[%s3298_s10 + $0x1310] sm:$0xff]  ;;  %2169 = vmatpush.msra.mxu0 %v869_v49 }
 0x261   : > { %v997_v52 = vld [vmem:[%s3298_s10 + $0x14f0] sm:$0xff]  ;;  %2188 = vmatpush.msra.mxu1 %v937_v50 }
 0x262   : > { %v1065_v53 = vld [vmem:[%s3298_s10 + $0x1710] sm:$0xff]  ;;  %2209 = vmatpush.msra.mxu2 %v997_v52 }
 0x263   : > { %v865_v55 = vld [vmem:[%s3298_s10 + $0x10d0] sm:$0xff]  ;;  %2228 = vmatpush.msra.mxu3 %v1065_v53 }
 0x264   : > { %v933_v56 = vld [vmem:[%s3298_s10 + $0x12f0] sm:$0xff]  ;;  %2170 = vmatpush.msra.mxu0 %v865_v55 }
 0x265   : > { %v993_v57 = vld [vmem:[%s3298_s10 + $0x14d0] sm:$0xff]  ;;  %2189 = vmatpush.msra.mxu1 %v933_v56  ;;  %v1858_v56 = vpop.f32.mrf.mxu0 }
 0x266   : > { %v1061_v58 = vld [vmem:[%s3298_s10 + $0x16f0] sm:$0xff]  ;;  %2210 = vmatpush.msra.mxu2 %v993_v57 }
 0x267   : > { %v861_v59 = vld [vmem:[%s3298_s10 + $0x10b0] sm:$0xff]  ;;  %2229 = vmatpush.msra.mxu3 %v1061_v58 }
 0x268   : > { %v929_v60 = vld [vmem:[%s3298_s10 + $0x12d0] sm:$0xff]  ;;  %2171 = vmatpush.msra.mxu0 %v861_v59  ;;  %v1839_v59 = vadd.f32 %v1838_v51, %v1819_v48 }
 0x269   : > { %v989_v62 = vld [vmem:[%s3298_s10 + $0x14b0] sm:$0xff]  ;;  %2190 = vmatpush.msra.mxu1 %v929_v60 }
 0x26a   : > { %v1057_v63 = vld [vmem:[%s3298_s10 + $0x16d0] sm:$0xff]  ;;  %2211 = vmatpush.msra.mxu2 %v989_v62  ;;  %v1859_v0 = vadd.f32 %v1858_v56, %v1839_v59 }
 0x26b   : > { %v857_v1 = vld [vmem:[%s3298_s10 + $0x1090] sm:$0xff]  ;;  %2230 = vmatpush.msra.mxu3 %v1057_v63 }
 0x26c   : > { %v925_v2 = vld [vmem:[%s3298_s10 + $0x12b0] sm:$0xff]  ;;  %2172 = vmatpush.msra.mxu0 %v857_v1 }
 0x26d   : > { %v985_v3 = vld [vmem:[%s3298_s10 + $0x1490] sm:$0xff]  ;;  %2191 = vmatpush.msra.mxu1 %v925_v2 }
 0x26e   : > { %v1053_v4 = vld [vmem:[%s3298_s10 + $0x16b0] sm:$0xff]  ;;  %2212 = vmatpush.msra.mxu2 %v985_v3  ;;  %v1878_v3 = vpop.f32.mrf.mxu1 }
 0x26f   : > { %v853_v5 = vld [vmem:[%s3298_s10 + $0x1070] sm:$0xff]  ;;  %2231 = vmatpush.msra.mxu3 %v1053_v4 }
 0x270   : > { %v921_v7 = vld [vmem:[%s3298_s10 + $0x1290] sm:$0xff]  ;;  %2173 = vmatpush.msra.mxu0 %v853_v5 }
 0x271   : > { %v981_v9 = vld [vmem:[%s3298_s10 + $0x1470] sm:$0xff]  ;;  %2192 = vmatpush.msra.mxu1 %v921_v7 }
 0x272   : > { %v1049_v10 = vld [vmem:[%s3298_s10 + $0x1690] sm:$0xff]  ;;  %2213 = vmatpush.msra.mxu2 %v981_v9  ;;  %v1898_v9 = vpop.f32.mrf.mxu2 }
 0x273   : > { %v849_v12 = vld [vmem:[%s3298_s10 + $0x1050] sm:$0xff]  ;;  %2232 = vmatpush.msra.mxu3 %v1049_v10 }
 0x274   : > { %v917_v13 = vld [vmem:[%s3298_s10 + $0x1270] sm:$0xff]  ;;  %2174 = vmatpush.msra.mxu0 %v849_v12  ;;  %v1879_v12 = vadd.f32 %v1878_v3, %v1859_v0  ;;  %v582_v0 = vld [vmem:[%s3298_s10 + $0x7f8] sm:$0xff] }
 0x275   : > { %v977_v14 = vld [vmem:[%s3298_s10 + $0x1450] sm:$0xff]  ;;  %2193 = vmatpush.msra.mxu1 %v917_v13  ;;  %v382_v3 = vld [vmem:[%s3298_s10 + $0x1b8] sm:$0xff] }
 0x276   : > { %v1045_v15 = vld [vmem:[%s3298_s10 + $0x1670] sm:$0xff]  ;;  %2214 = vmatpush.msra.mxu2 %v977_v14 }
 0x277   : > { %v845_v16 = vld [vmem:[%s3298_s10 + $0x1030] sm:$0xff]  ;;  %2233 = vmatpush.msra.mxu3 %v1045_v15 }
 0x278   : > { %v913_v17 = vld [vmem:[%s3298_s10 + $0x1250] sm:$0xff]  ;;  %2175 = vmatpush.msra.mxu0 %v845_v16 }
 0x279   : > { %v973_v19 = vld [vmem:[%s3298_s10 + $0x1430] sm:$0xff]  ;;  %2194 = vmatpush.msra.mxu1 %v913_v17  ;;  %v1899_v17 = vadd.f32 %v1898_v9, %v1879_v12  ;;  %v446_v9 = vld [vmem:[%s3298_s10 + $0x3b8] sm:$0xff] }
 0x27a   : > { %v1041_v20 = vld [vmem:[%s3298_s10 + $0x1650] sm:$0xff]  ;;  %2215 = vmatpush.msra.mxu2 %v973_v19  ;;  %v1978_v48 = vpop.f32.mrf.mxu2  ;;  %v374_v12 = vld [vmem:[%s3298_s10 + $0x178] sm:$0xff] }
 0x27b   : > { %v841_v22 = vld [vmem:[%s3298_s10 + $0x1010] sm:$0xff]  ;;  %2234 = vmatpush.msra.mxu3 %v1041_v20  ;;  %v1918_v20 = vpop.f32.mrf.mxu3 }
 0x27c   : > { %v909_v23 = vld [vmem:[%s3298_s10 + $0x1230] sm:$0xff]  ;;  %2176 = vmatpush.msra.mxu0 %v841_v22 }
 0x27d   : > { %v969_v24 = vld [vmem:[%s3298_s10 + $0x1410] sm:$0xff]  ;;  %2195 = vmatpush.msra.mxu1 %v909_v23  ;;  %2177 = vmatmul.f32.vlgmr.msra.gmra.mxu0 %v2935_v32  ;;  %v1938_v32 = vpop.f32.mrf.mxu0 }
 0x27e   : > { %v1037_v25 = vld [vmem:[%s3298_s10 + $0x1630] sm:$0xff]  ;;  %2216 = vmatpush.msra.mxu2 %v969_v24 }
 0x27f   : > { %v1157_v27 = vld [vmem:[%s3298_s10 + $0x19f0] sm:$0xff]  ;;  %2235 = vmatpush.msra.mxu3 %v1037_v25 }
 0x280   : > { %v1285_v28 = vld [vmem:[%s3298_s10 + $0x1df0] sm:$0xff]  ;;  %2241 = vmatpush.msrb.mxu0 %v1157_v27  ;;  %v1919_v27 = vadd.f32 %v1918_v20, %v1899_v17  ;;  %v438_v17 = vld [vmem:[%s3298_s10 + $0x378] sm:$0xff] }
 0x281   : > { %v905_v30 = vld [vmem:[%s3298_s10 + $0x1210] sm:$0xff]  ;;  %2281 = vmatpush.msrb.mxu2 %v1285_v28  ;;  %v366_v20 = vld [vmem:[%s3298_s10 + $0x138] sm:$0xff] }
 0x282   : > { %v1033_v31 = vld [vmem:[%s3298_s10 + $0x1610] sm:$0xff]  ;;  %2196 = vmatpush.msra.mxu1 %v905_v30 }
 0x283   : > { %v2936_v33 = vld [vmem:[#allocation2 + $0x50] sm:$0xff]  ;;  %2236 = vmatpush.msra.mxu3 %v1033_v31  ;;  %2197 = vmatmul.f32.vlgmr.msra.gmra.mxu1 %v2937_v40  ;;  %v1958_v40 = vpop.f32.mrf.mxu1 }
 0x284   : > { %2217 = vmatmul.f32.vlgmr.msra.gmra.mxu2 %v2936_v33  ;;  %v1153_v34 = vld [vmem:[%s3298_s10 + $0x19d0] sm:$0xff]  ;;  %2237 = vmatmul.f32.vlgmr.msra.gmra.mxu3 %v2938_v41 }
 0x285   : > { %v1221_v35 = vld [vmem:[%s3298_s10 + $0x1bf0] sm:$0xff]  ;;  %2242 = vmatpush.msrb.mxu0 %v1153_v34 }
 0x286   : > { %v1281_v37 = vld [vmem:[%s3298_s10 + $0x1dd0] sm:$0xff]  ;;  %2261 = vmatpush.msrb.mxu1 %v1221_v35  ;;  %v1939_v35 = vadd.f32 %v1938_v32, %v1919_v27  ;;  %v558_v27 = vld [vmem:[%s3298_s10 + $0x738] sm:$0xff] }
 0x287   : > { %v1349_v38 = vld [vmem:[%s3298_s10 + $0x1ff0] sm:$0xff]  ;;  %2282 = vmatpush.msrb.mxu2 %v1281_v37  ;;  %v354_v32 = vld [vmem:[%s3298_s10 + $0xd8] sm:$0xff] }
 0x288   : > { %v1149_v42 = vld [vmem:[%s3298_s10 + $0x19b0] sm:$0xff]  ;;  %2301 = vmatpush.msrb.mxu3 %v1349_v38 }
 0x289   : > { %v1217_v43 = vld [vmem:[%s3298_s10 + $0x1bd0] sm:$0xff]  ;;  %2243 = vmatpush.msrb.mxu0 %v1149_v42 }
 0x28a   : > { %v1277_v44 = vld [vmem:[%s3298_s10 + $0x1db0] sm:$0xff]  ;;  %2262 = vmatpush.msrb.mxu1 %v1217_v43 }
 0x28b   : > { %v1345_v45 = vld [vmem:[%s3298_s10 + $0x1fd0] sm:$0xff]  ;;  %2283 = vmatpush.msrb.mxu2 %v1277_v44 }
 0x28c   : > { %v1145_v46 = vld [vmem:[%s3298_s10 + $0x1990] sm:$0xff]  ;;  %2302 = vmatpush.msrb.mxu3 %v1345_v45  ;;  %v1959_v45 = vadd.f32 %v1958_v40, %v1939_v35  ;;  %v550_v35 = vld [vmem:[%s3298_s10 + $0x6f8] sm:$0xff] }
 0x28d   : > { %v1213_v47 = vld [vmem:[%s3298_s10 + $0x1bb0] sm:$0xff]  ;;  %2244 = vmatpush.msrb.mxu0 %v1145_v46  ;;  %v346_v40 = vld [vmem:[%s3298_s10 + $0x98] sm:$0xff] }
 0x28e   : > { %v1273_v49 = vld [vmem:[%s3298_s10 + $0x1d90] sm:$0xff]  ;;  %2263 = vmatpush.msrb.mxu1 %v1213_v47  ;;  %v1979_v51 = vadd.f32 %v1978_v48, %v1959_v45  ;;  %v410_v45 = vld [vmem:[%s3298_s10 + $0x298] sm:$0xff] }
 0x28f   : > { %v1341_v50 = vld [vmem:[%s3298_s10 + $0x1fb0] sm:$0xff]  ;;  %2284 = vmatpush.msrb.mxu2 %v1273_v49  ;;  %v338_v48 = vld [vmem:[%s3298_s10 + $0x58] sm:$0xff] }
 0x290   : > { %v1141_v52 = vld [vmem:[%s3298_s10 + $0x1970] sm:$0xff]  ;;  %2303 = vmatpush.msrb.mxu3 %v1341_v50 }
 0x291   : > { %v1209_v53 = vld [vmem:[%s3298_s10 + $0x1b90] sm:$0xff]  ;;  %2245 = vmatpush.msrb.mxu0 %v1141_v52  ;;  %v390_v52 = vld [vmem:[%s3298_s10 + $0x1f8] sm:$0xff] }
 0x292   : > { %v1269_v54 = vld [vmem:[%s3298_s10 + $0x1d70] sm:$0xff]  ;;  %2264 = vmatpush.msrb.mxu1 %v1209_v53  ;;  %v518_v53 = vld [vmem:[%s3298_s10 + $0x5f8] sm:$0xff] }
 0x293   : > { %v1337_v55 = vld [vmem:[%s3298_s10 + $0x1f90] sm:$0xff]  ;;  %2285 = vmatpush.msrb.mxu2 %v1269_v54  ;;  %v1998_v54 = vpop.f32.mrf.mxu3 }
 0x294   : > { %v1137_v57 = vld [vmem:[%s3298_s10 + $0x1950] sm:$0xff]  ;;  %2304 = vmatpush.msrb.mxu3 %v1337_v55 }
 0x295   : > { %v1205_v58 = vld [vmem:[%s3298_s10 + $0x1b70] sm:$0xff]  ;;  %2246 = vmatpush.msrb.mxu0 %v1137_v57  ;;  %v1999_v57 = vadd.f32 %v1998_v54, %v1979_v51  ;;  %v534_v51 = vld [vmem:[%s3298_s10 + $0x678] sm:$0xff] }
 0x296   : > { %v1265_v60 = vld [vmem:[%s3298_s10 + $0x1d50] sm:$0xff]  ;;  %2265 = vmatpush.msrb.mxu1 %v1205_v58  ;;  %v2939_v58 = vld [vmem:[#allocation2 + $0x60] sm:$0xff]  ;;  %v462_v54 = vld [vmem:[%s3298_s10 + $0x438] sm:$0xff] }
 0x297   : > { %v1333_v61 = vld [vmem:[%s3298_s10 + $0x1f70] sm:$0xff]  ;;  %2286 = vmatpush.msrb.mxu2 %v1265_v60  ;;  %v386_v60 = vld [vmem:[%s3298_s10 + $0x1d8] sm:$0xff] }
 0x298   : > { %v1133_v62 = vld [vmem:[%s3298_s10 + $0x1930] sm:$0xff]  ;;  %2305 = vmatpush.msrb.mxu3 %v1333_v61  ;;  %v454_v61 = vld [vmem:[%s3298_s10 + $0x3f8] sm:$0xff] }
 0x299   : > { %v1201_v63 = vld [vmem:[%s3298_s10 + $0x1b50] sm:$0xff]  ;;  %2247 = vmatpush.msrb.mxu0 %v1133_v62  ;;  %v2648_v62 = vmul.f32 %v3828_v6, %v1999_v57  ;;  %v398_v57 = vld [vmem:[%s3298_s10 + $0x238] sm:$0xff] }
 0x29a   : > { %v1261_v1 = vld [vmem:[%s3298_s10 + $0x1d30] sm:$0xff]  ;;  %2266 = vmatpush.msrb.mxu1 %v1201_v63  ;;  %v514_v63 = vld [vmem:[%s3298_s10 + $0x5d8] sm:$0xff] }
 0x29b   : > { %v1329_v2 = vld [vmem:[%s3298_s10 + $0x1f50] sm:$0xff]  ;;  %2287 = vmatpush.msrb.mxu2 %v1261_v1  ;;  %v2941_v1 = vld [vmem:[#allocation2 + $0x68] sm:$0xff]  ;;  %2652 = vst [vmem:[%s3837_s9 + $0x8] sm:$0xff] %v2648_v62  ;;  %v394_v62 = vld [vmem:[%s3298_s10 + $0x218] sm:$0xff] }
 0x29c   : > { %v1129_v4 = vld [vmem:[%s3298_s10 + $0x1910] sm:$0xff]  ;;  %2306 = vmatpush.msrb.mxu3 %v1329_v2  ;;  %v2942_v2 = vld [vmem:[#allocation2 + $0x78] sm:$0xff] }
 0x29d   : > { %v1197_v5 = vld [vmem:[%s3298_s10 + $0x1b30] sm:$0xff]  ;;  %2248 = vmatpush.msrb.mxu0 %v1129_v4  ;;  %v450_v4 = vld [vmem:[%s3298_s10 + $0x3d8] sm:$0xff] }
 0x29e   : > { %v1257_v7 = vld [vmem:[%s3298_s10 + $0x1d10] sm:$0xff]  ;;  %2267 = vmatpush.msrb.mxu1 %v1197_v5  ;;  %v510_v5 = vld [vmem:[%s3298_s10 + $0x5b8] sm:$0xff] }
 0x29f   : > { %v1325_v8 = vld [vmem:[%s3298_s10 + $0x1f30] sm:$0xff]  ;;  %2288 = vmatpush.msrb.mxu2 %v1257_v7  ;;  %v578_v7 = vld [vmem:[%s3298_s10 + $0x7d8] sm:$0xff] }
 0x2a0   : > { %v1125_v10 = vld [vmem:[%s3298_s10 + $0x18f0] sm:$0xff]  ;;  %2307 = vmatpush.msrb.mxu3 %v1325_v8  ;;  %v378_v8 = vld [vmem:[%s3298_s10 + $0x198] sm:$0xff] }
 0x2a1   : > { %v1193_v11 = vld [vmem:[%s3298_s10 + $0x1b10] sm:$0xff]  ;;  %2249 = vmatpush.msrb.mxu0 %v1125_v10  ;;  %v506_v10 = vld [vmem:[%s3298_s10 + $0x598] sm:$0xff] }
 0x2a2   : > { %v1253_v13 = vld [vmem:[%s3298_s10 + $0x1cf0] sm:$0xff]  ;;  %2268 = vmatpush.msrb.mxu1 %v1193_v11  ;;  %v574_v11 = vld [vmem:[%s3298_s10 + $0x7b8] sm:$0xff] }
 0x2a3   : > { %v1321_v14 = vld [vmem:[%s3298_s10 + $0x1f10] sm:$0xff]  ;;  %2289 = vmatpush.msrb.mxu2 %v1253_v13  ;;  %v442_v13 = vld [vmem:[%s3298_s10 + $0x398] sm:$0xff] }
 0x2a4   : > { %v1121_v15 = vld [vmem:[%s3298_s10 + $0x18d0] sm:$0xff]  ;;  %2308 = vmatpush.msrb.mxu3 %v1321_v14  ;;  %v502_v14 = vld [vmem:[%s3298_s10 + $0x578] sm:$0xff] }
 0x2a5   : > { %v1189_v16 = vld [vmem:[%s3298_s10 + $0x1af0] sm:$0xff]  ;;  %2250 = vmatpush.msrb.mxu0 %v1121_v15  ;;  %v570_v15 = vld [vmem:[%s3298_s10 + $0x798] sm:$0xff] }
 0x2a6   : > { %v1249_v18 = vld [vmem:[%s3298_s10 + $0x1cd0] sm:$0xff]  ;;  %2269 = vmatpush.msrb.mxu1 %v1189_v16  ;;  %v370_v16 = vld [vmem:[%s3298_s10 + $0x158] sm:$0xff] }
 0x2a7   : > { %v1317_v19 = vld [vmem:[%s3298_s10 + $0x1ef0] sm:$0xff]  ;;  %2290 = vmatpush.msrb.mxu2 %v1249_v18  ;;  %v498_v18 = vld [vmem:[%s3298_s10 + $0x558] sm:$0xff] }
 0x2a8   : > { %v1117_v21 = vld [vmem:[%s3298_s10 + $0x18b0] sm:$0xff]  ;;  %2309 = vmatpush.msrb.mxu3 %v1317_v19  ;;  %v566_v19 = vld [vmem:[%s3298_s10 + $0x778] sm:$0xff] }
 0x2a9   : > { %v1185_v22 = vld [vmem:[%s3298_s10 + $0x1ad0] sm:$0xff]  ;;  %2251 = vmatpush.msrb.mxu0 %v1117_v21  ;;  %v434_v21 = vld [vmem:[%s3298_s10 + $0x358] sm:$0xff] }
 0x2aa   : > { %v1245_v23 = vld [vmem:[%s3298_s10 + $0x1cb0] sm:$0xff]  ;;  %2270 = vmatpush.msrb.mxu1 %v1185_v22  ;;  %v494_v22 = vld [vmem:[%s3298_s10 + $0x538] sm:$0xff] }
 0x2ab   : > { %v1313_v24 = vld [vmem:[%s3298_s10 + $0x1ed0] sm:$0xff]  ;;  %2291 = vmatpush.msrb.mxu2 %v1245_v23  ;;  %v562_v23 = vld [vmem:[%s3298_s10 + $0x758] sm:$0xff] }
 0x2ac   : > { %v1113_v25 = vld [vmem:[%s3298_s10 + $0x1890] sm:$0xff]  ;;  %2310 = vmatpush.msrb.mxu3 %v1313_v24  ;;  %v362_v24 = vld [vmem:[%s3298_s10 + $0x118] sm:$0xff] }
 0x2ad   : > { %v1181_v26 = vld [vmem:[%s3298_s10 + $0x1ab0] sm:$0xff]  ;;  %2252 = vmatpush.msrb.mxu0 %v1113_v25  ;;  %v430_v25 = vld [vmem:[%s3298_s10 + $0x338] sm:$0xff] }
 0x2ae   : > { %v1241_v28 = vld [vmem:[%s3298_s10 + $0x1c90] sm:$0xff]  ;;  %2271 = vmatpush.msrb.mxu1 %v1181_v26  ;;  %v490_v26 = vld [vmem:[%s3298_s10 + $0x518] sm:$0xff] }
 0x2af   : > { %v1309_v29 = vld [vmem:[%s3298_s10 + $0x1eb0] sm:$0xff]  ;;  %2292 = vmatpush.msrb.mxu2 %v1241_v28  ;;  %v358_v28 = vld [vmem:[%s3298_s10 + $0xf8] sm:$0xff] }
 0x2b0   : > { %v1109_v30 = vld [vmem:[%s3298_s10 + $0x1870] sm:$0xff]  ;;  %2311 = vmatpush.msrb.mxu3 %v1309_v29  ;;  %v426_v29 = vld [vmem:[%s3298_s10 + $0x318] sm:$0xff] }
 0x2b1   : > { %v1177_v31 = vld [vmem:[%s3298_s10 + $0x1a90] sm:$0xff]  ;;  %2253 = vmatpush.msrb.mxu0 %v1109_v30  ;;  %v486_v30 = vld [vmem:[%s3298_s10 + $0x4f8] sm:$0xff] }
 0x2b2   : > { %v1237_v33 = vld [vmem:[%s3298_s10 + $0x1c70] sm:$0xff]  ;;  %2272 = vmatpush.msrb.mxu1 %v1177_v31  ;;  %v554_v31 = vld [vmem:[%s3298_s10 + $0x718] sm:$0xff] }
 0x2b3   : > { %v1305_v34 = vld [vmem:[%s3298_s10 + $0x1e90] sm:$0xff]  ;;  %2293 = vmatpush.msrb.mxu2 %v1237_v33  ;;  %v422_v33 = vld [vmem:[%s3298_s10 + $0x2f8] sm:$0xff] }
 0x2b4   : > { %v1105_v36 = vld [vmem:[%s3298_s10 + $0x1850] sm:$0xff]  ;;  %2312 = vmatpush.msrb.mxu3 %v1305_v34  ;;  %v482_v34 = vld [vmem:[%s3298_s10 + $0x4d8] sm:$0xff] }
 0x2b5   : > { %v1173_v37 = vld [vmem:[%s3298_s10 + $0x1a70] sm:$0xff]  ;;  %2254 = vmatpush.msrb.mxu0 %v1105_v36  ;;  %v350_v36 = vld [vmem:[%s3298_s10 + $0xb8] sm:$0xff] }
 0x2b6   : > { %v1233_v38 = vld [vmem:[%s3298_s10 + $0x1c50] sm:$0xff]  ;;  %2273 = vmatpush.msrb.mxu1 %v1173_v37  ;;  %v418_v37 = vld [vmem:[%s3298_s10 + $0x2d8] sm:$0xff] }
 0x2b7   : > { %v1301_v39 = vld [vmem:[%s3298_s10 + $0x1e70] sm:$0xff]  ;;  %2294 = vmatpush.msrb.mxu2 %v1233_v38  ;;  %v478_v38 = vld [vmem:[%s3298_s10 + $0x4b8] sm:$0xff] }
 0x2b8   : > { %v1101_v41 = vld [vmem:[%s3298_s10 + $0x1830] sm:$0xff]  ;;  %2313 = vmatpush.msrb.mxu3 %v1301_v39  ;;  %v546_v39 = vld [vmem:[%s3298_s10 + $0x6d8] sm:$0xff] }
 0x2b9   : > { %v1169_v42 = vld [vmem:[%s3298_s10 + $0x1a50] sm:$0xff]  ;;  %2255 = vmatpush.msrb.mxu0 %v1101_v41  ;;  %v414_v41 = vld [vmem:[%s3298_s10 + $0x2b8] sm:$0xff] }
 0x2ba   : > { %v1229_v43 = vld [vmem:[%s3298_s10 + $0x1c30] sm:$0xff]  ;;  %2274 = vmatpush.msrb.mxu1 %v1169_v42  ;;  %v474_v42 = vld [vmem:[%s3298_s10 + $0x498] sm:$0xff] }
 0x2bb   : > { %v1297_v44 = vld [vmem:[%s3298_s10 + $0x1e50] sm:$0xff]  ;;  %2295 = vmatpush.msrb.mxu2 %v1229_v43  ;;  %v542_v43 = vld [vmem:[%s3298_s10 + $0x6b8] sm:$0xff] }
 0x2bc   : > { %v1097_v46 = vld [vmem:[%s3298_s10 + $0x1810] sm:$0xff]  ;;  %2314 = vmatpush.msrb.mxu3 %v1297_v44  ;;  %v342_v44 = vld [vmem:[%s3298_s10 + $0x78] sm:$0xff] }
 0x2bd   : > { %v1165_v47 = vld [vmem:[%s3298_s10 + $0x1a30] sm:$0xff]  ;;  %2256 = vmatpush.msrb.mxu0 %v1097_v46  ;;  %v470_v46 = vld [vmem:[%s3298_s10 + $0x478] sm:$0xff] }
 0x2be   : > { %v1225_v49 = vld [vmem:[%s3298_s10 + $0x1c10] sm:$0xff]  ;;  %2275 = vmatpush.msrb.mxu1 %v1165_v47  ;;  %2257 = vmatmul.f32.vlgmr.msrb.gmra.mxu0 %v2939_v58  ;;  %v538_v47 = vld [vmem:[%s3298_s10 + $0x698] sm:$0xff] }
 0x2bf   : > { %v1293_v50 = vld [vmem:[%s3298_s10 + $0x1e30] sm:$0xff]  ;;  %2296 = vmatpush.msrb.mxu2 %v1225_v49  ;;  %2321 = vmatpush.msra.mxu0 %v390_v52  ;;  %v406_v49 = vld [vmem:[%s3298_s10 + $0x278] sm:$0xff] }
 0x2c0   : > { %2315 = vmatpush.msrb.mxu3 %v1293_v50  ;;  %v1161_v55 = vld [vmem:[%s3298_s10 + $0x1a10] sm:$0xff]  ;;  %v466_v50 = vld [vmem:[%s3298_s10 + $0x458] sm:$0xff] }
 0x2c1   : > { %v1289_v56 = vld [vmem:[%s3298_s10 + $0x1e10] sm:$0xff]  ;;  %2361 = vmatpush.msra.mxu2 %v518_v53  ;;  %2276 = vmatpush.msrb.mxu1 %v1161_v55  ;;  %v334_v52 = vld [vmem:[%s3298_s10 + $0x38] sm:$0xff] }
 0x2c2   : > { %v2940_v59 = vld [vmem:[#allocation2 + $0x70] sm:$0xff]  ;;  %2316 = vmatpush.msrb.mxu3 %v1289_v56  ;;  %2277 = vmatmul.f32.vlgmr.msrb.gmra.mxu1 %v2941_v1  ;;  %v402_v53 = vld [vmem:[%s3298_s10 + $0x258] sm:$0xff] }
 0x2c3   : > { %2297 = vmatmul.f32.vlgmr.msrb.gmra.mxu2 %v2940_v59  ;;  %2317 = vmatmul.f32.vlgmr.msrb.gmra.mxu3 %v2942_v2  ;;  %v530_v55 = vld [vmem:[%s3298_s10 + $0x658] sm:$0xff] }
 0x2c4   : > { %2322 = vmatpush.msra.mxu0 %v386_v60  ;;  %2341 = vmatpush.msra.mxu1 %v454_v61  ;;  %v330_v56 = vld [vmem:[%s3298_s10 + $0x18] sm:$0xff] }
 0x2c5   : > { %2362 = vmatpush.msra.mxu2 %v514_v63  ;;  %2381 = vmatpush.msra.mxu3 %v582_v0  ;;  %v458_v58 = vld [vmem:[%s3298_s10 + $0x418] sm:$0xff] }
 0x2c6   : > { %2323 = vmatpush.msra.mxu0 %v382_v3  ;;  %2342 = vmatpush.msra.mxu1 %v450_v4  ;;  %v526_v59 = vld [vmem:[%s3298_s10 + $0x638] sm:$0xff] }
 0x2c7   : > { %2363 = vmatpush.msra.mxu2 %v510_v5  ;;  %2382 = vmatpush.msra.mxu3 %v578_v7  ;;  %v646_v60 = vld [vmem:[%s3298_s10 + $0x9f8] sm:$0xff] }
 0x2c8   : > { %2324 = vmatpush.msra.mxu0 %v378_v8  ;;  %2343 = vmatpush.msra.mxu1 %v446_v9  ;;  %v774_v61 = vld [vmem:[%s3298_s10 + $0xdf8] sm:$0xff] }
 0x2c9   : > { %2364 = vmatpush.msra.mxu2 %v506_v10  ;;  %2383 = vmatpush.msra.mxu3 %v574_v11  ;;  %v522_v63 = vld [vmem:[%s3298_s10 + $0x618] sm:$0xff] }
 0x2ca   : > { %2325 = vmatpush.msra.mxu0 %v374_v12  ;;  %2344 = vmatpush.msra.mxu1 %v442_v13  ;;  %v642_v0 = vld [vmem:[%s3298_s10 + $0x9d8] sm:$0xff] }
 0x2cb   : > { %2365 = vmatpush.msra.mxu2 %v502_v14  ;;  %2384 = vmatpush.msra.mxu3 %v570_v15  ;;  %v710_v1 = vld [vmem:[%s3298_s10 + $0xbf8] sm:$0xff] }
 0x2cc   : > { %2326 = vmatpush.msra.mxu0 %v370_v16  ;;  %2345 = vmatpush.msra.mxu1 %v438_v17  ;;  %v770_v2 = vld [vmem:[%s3298_s10 + $0xdd8] sm:$0xff] }
 0x2cd   : > { %2366 = vmatpush.msra.mxu2 %v498_v18  ;;  %2385 = vmatpush.msra.mxu3 %v566_v19  ;;  %v838_v3 = vld [vmem:[%s3298_s10 + $0xff8] sm:$0xff] }
 0x2ce   : > { %2327 = vmatpush.msra.mxu0 %v366_v20  ;;  %2346 = vmatpush.msra.mxu1 %v434_v21  ;;  %v638_v4 = vld [vmem:[%s3298_s10 + $0x9b8] sm:$0xff] }
 0x2cf   : > { %2367 = vmatpush.msra.mxu2 %v494_v22  ;;  %2386 = vmatpush.msra.mxu3 %v562_v23  ;;  %v706_v5 = vld [vmem:[%s3298_s10 + $0xbd8] sm:$0xff] }
 0x2d0   : > { %2328 = vmatpush.msra.mxu0 %v362_v24  ;;  %2347 = vmatpush.msra.mxu1 %v430_v25  ;;  %v766_v7 = vld [vmem:[%s3298_s10 + $0xdb8] sm:$0xff] }
 0x2d1   : > { %2368 = vmatpush.msra.mxu2 %v490_v26  ;;  %2387 = vmatpush.msra.mxu3 %v558_v27  ;;  %v834_v8 = vld [vmem:[%s3298_s10 + $0xfd8] sm:$0xff] }
 0x2d2   : > { %2329 = vmatpush.msra.mxu0 %v358_v28  ;;  %2348 = vmatpush.msra.mxu1 %v426_v29  ;;  %v634_v9 = vld [vmem:[%s3298_s10 + $0x998] sm:$0xff] }
 0x2d3   : > { %2369 = vmatpush.msra.mxu2 %v486_v30  ;;  %2388 = vmatpush.msra.mxu3 %v554_v31  ;;  %v702_v10 = vld [vmem:[%s3298_s10 + $0xbb8] sm:$0xff] }
 0x2d4   : > { %2330 = vmatpush.msra.mxu0 %v354_v32  ;;  %2349 = vmatpush.msra.mxu1 %v422_v33  ;;  %v762_v11 = vld [vmem:[%s3298_s10 + $0xd98] sm:$0xff] }
 0x2d5   : > { %2370 = vmatpush.msra.mxu2 %v482_v34  ;;  %2389 = vmatpush.msra.mxu3 %v550_v35  ;;  %v830_v12 = vld [vmem:[%s3298_s10 + $0xfb8] sm:$0xff] }
 0x2d6   : > { %2331 = vmatpush.msra.mxu0 %v350_v36  ;;  %2350 = vmatpush.msra.mxu1 %v418_v37  ;;  %v630_v13 = vld [vmem:[%s3298_s10 + $0x978] sm:$0xff] }
 0x2d7   : > { %2371 = vmatpush.msra.mxu2 %v478_v38  ;;  %2390 = vmatpush.msra.mxu3 %v546_v39  ;;  %v698_v14 = vld [vmem:[%s3298_s10 + $0xb98] sm:$0xff] }
 0x2d8   : > { %2332 = vmatpush.msra.mxu0 %v346_v40  ;;  %2351 = vmatpush.msra.mxu1 %v414_v41  ;;  %v758_v15 = vld [vmem:[%s3298_s10 + $0xd78] sm:$0xff] }
 0x2d9   : > { %2372 = vmatpush.msra.mxu2 %v474_v42  ;;  %2391 = vmatpush.msra.mxu3 %v542_v43  ;;  %v826_v16 = vld [vmem:[%s3298_s10 + $0xf98] sm:$0xff] }
 0x2da   : > { %2333 = vmatpush.msra.mxu0 %v342_v44  ;;  %2352 = vmatpush.msra.mxu1 %v410_v45  ;;  %v626_v17 = vld [vmem:[%s3298_s10 + $0x958] sm:$0xff] }
 0x2db   : > { %2373 = vmatpush.msra.mxu2 %v470_v46  ;;  %2392 = vmatpush.msra.mxu3 %v538_v47  ;;  %v694_v18 = vld [vmem:[%s3298_s10 + $0xb78] sm:$0xff] }
 0x2dc   : > { %2334 = vmatpush.msra.mxu0 %v338_v48  ;;  %2353 = vmatpush.msra.mxu1 %v406_v49  ;;  %v754_v19 = vld [vmem:[%s3298_s10 + $0xd58] sm:$0xff] }
 0x2dd   : > { %2374 = vmatpush.msra.mxu2 %v466_v50  ;;  %2393 = vmatpush.msra.mxu3 %v534_v51  ;;  %v822_v20 = vld [vmem:[%s3298_s10 + $0xf78] sm:$0xff] }
 0x2de   : > { %2335 = vmatpush.msra.mxu0 %v334_v52  ;;  %2354 = vmatpush.msra.mxu1 %v402_v53  ;;  %v622_v21 = vld [vmem:[%s3298_s10 + $0x938] sm:$0xff] }
 0x2df   : > { %2375 = vmatpush.msra.mxu2 %v462_v54  ;;  %2394 = vmatpush.msra.mxu3 %v530_v55  ;;  %v690_v22 = vld [vmem:[%s3298_s10 + $0xb58] sm:$0xff] }
 0x2e0   : > { %2336 = vmatpush.msra.mxu0 %v330_v56  ;;  %2355 = vmatpush.msra.mxu1 %v398_v57  ;;  %v750_v23 = vld [vmem:[%s3298_s10 + $0xd38] sm:$0xff] }
 0x2e1   : > { %2376 = vmatpush.msra.mxu2 %v458_v58  ;;  %2395 = vmatpush.msra.mxu3 %v526_v59  ;;  %v818_v24 = vld [vmem:[%s3298_s10 + $0xf58] sm:$0xff] }
 0x2e2   : > { %2401 = vmatpush.msrb.mxu0 %v646_v60  ;;  %2356 = vmatpush.msra.mxu1 %v394_v62  ;;  %v618_v25 = vld [vmem:[%s3298_s10 + $0x918] sm:$0xff] }
 0x2e3   : > { %2441 = vmatpush.msrb.mxu2 %v774_v61  ;;  %2396 = vmatpush.msra.mxu3 %v522_v63  ;;  %v686_v26 = vld [vmem:[%s3298_s10 + $0xb38] sm:$0xff] }
 0x2e4   : > { %2402 = vmatpush.msrb.mxu0 %v642_v0  ;;  %2421 = vmatpush.msrb.mxu1 %v710_v1  ;;  %v746_v27 = vld [vmem:[%s3298_s10 + $0xd18] sm:$0xff]  ;;  %v2943_v1 = vld [vmem:[#allocation2] sm:$0xff] }
 0x2e5   : > { %2442 = vmatpush.msrb.mxu2 %v770_v2  ;;  %2461 = vmatpush.msrb.mxu3 %v838_v3  ;;  %v814_v28 = vld [vmem:[%s3298_s10 + $0xf38] sm:$0xff]  ;;  %v2944_v2 = vld [vmem:[#allocation2 + $0x10] sm:$0xff] }
 0x2e6   : > { %2403 = vmatpush.msrb.mxu0 %v638_v4  ;;  %2422 = vmatpush.msrb.mxu1 %v706_v5  ;;  %v614_v29 = vld [vmem:[%s3298_s10 + $0x8f8] sm:$0xff] }
 0x2e7   : > { %2443 = vmatpush.msrb.mxu2 %v766_v7  ;;  %2462 = vmatpush.msrb.mxu3 %v834_v8  ;;  %v682_v30 = vld [vmem:[%s3298_s10 + $0xb18] sm:$0xff]  ;;  %v2945_v8 = vld [vmem:[#allocation2 + $0x8] sm:$0xff] }
 0x2e8   : > { %2404 = vmatpush.msrb.mxu0 %v634_v9  ;;  %2423 = vmatpush.msrb.mxu1 %v702_v10  ;;  %v742_v31 = vld [vmem:[%s3298_s10 + $0xcf8] sm:$0xff] }
 0x2e9   : > { %2444 = vmatpush.msrb.mxu2 %v762_v11  ;;  %2463 = vmatpush.msrb.mxu3 %v830_v12  ;;  %v810_v32 = vld [vmem:[%s3298_s10 + $0xf18] sm:$0xff] }
 0x2ea   : > { %2405 = vmatpush.msrb.mxu0 %v630_v13  ;;  %2424 = vmatpush.msrb.mxu1 %v698_v14  ;;  %v610_v33 = vld [vmem:[%s3298_s10 + $0x8d8] sm:$0xff] }
 0x2eb   : > { %2445 = vmatpush.msrb.mxu2 %v758_v15  ;;  %2464 = vmatpush.msrb.mxu3 %v826_v16  ;;  %v678_v34 = vld [vmem:[%s3298_s10 + $0xaf8] sm:$0xff] }
 0x2ec   : > { %2406 = vmatpush.msrb.mxu0 %v626_v17  ;;  %2425 = vmatpush.msrb.mxu1 %v694_v18  ;;  %v738_v35 = vld [vmem:[%s3298_s10 + $0xcd8] sm:$0xff] }
 0x2ed   : > { %2446 = vmatpush.msrb.mxu2 %v754_v19  ;;  %2465 = vmatpush.msrb.mxu3 %v822_v20  ;;  %v806_v36 = vld [vmem:[%s3298_s10 + $0xef8] sm:$0xff] }
 0x2ee   : > { %2407 = vmatpush.msrb.mxu0 %v622_v21  ;;  %2426 = vmatpush.msrb.mxu1 %v690_v22  ;;  %v606_v37 = vld [vmem:[%s3298_s10 + $0x8b8] sm:$0xff]  ;;  %v2947_v22 = vld [vmem:[#allocation2 + $0x30] sm:$0xff] }
 0x2ef   : > { %2447 = vmatpush.msrb.mxu2 %v750_v23  ;;  %2466 = vmatpush.msrb.mxu3 %v818_v24  ;;  %v674_v38 = vld [vmem:[%s3298_s10 + $0xad8] sm:$0xff] }
 0x2f0   : > { %2408 = vmatpush.msrb.mxu0 %v618_v25  ;;  %2427 = vmatpush.msrb.mxu1 %v686_v26  ;;  %v734_v39 = vld [vmem:[%s3298_s10 + $0xcb8] sm:$0xff]  ;;  %v2948_v26 = vld [vmem:[#allocation2 + $0x20] sm:$0xff] }
 0x2f1   : > { %2448 = vmatpush.msrb.mxu2 %v746_v27  ;;  %2467 = vmatpush.msrb.mxu3 %v814_v28  ;;  %v802_v40 = vld [vmem:[%s3298_s10 + $0xed8] sm:$0xff] }
 0x2f2   : > { %2409 = vmatpush.msrb.mxu0 %v614_v29  ;;  %2428 = vmatpush.msrb.mxu1 %v682_v30  ;;  %v602_v41 = vld [vmem:[%s3298_s10 + $0x898] sm:$0xff] }
 0x2f3   : > { %2449 = vmatpush.msrb.mxu2 %v742_v31  ;;  %2468 = vmatpush.msrb.mxu3 %v810_v32  ;;  %v670_v42 = vld [vmem:[%s3298_s10 + $0xab8] sm:$0xff]  ;;  %v4242_v31 = vld [vmem:[%s3710_s24] sm:$0xf] }
 0x2f4   : > { %2410 = vmatpush.msrb.mxu0 %v610_v33  ;;  %2429 = vmatpush.msrb.mxu1 %v678_v34  ;;  %v730_v43 = vld [vmem:[%s3298_s10 + $0xc98] sm:$0xff]  ;;  %v1355_v32 = vperm.slane %v4242_v31, 2 }
 0x2f5   : > { %2450 = vmatpush.msrb.mxu2 %v738_v35  ;;  %2469 = vmatpush.msrb.mxu3 %v806_v36  ;;  %v798_v44 = vld [vmem:[%s3298_s10 + $0xeb8] sm:$0xff]  ;;  %v2018_v35 = vpop.f32.mrf.mxu0  ;;  %v2951_v36 = vld [vmem:[#allocation2 + $0x28] sm:$0xff] }
 0x2f6   : > { %2411 = vmatpush.msrb.mxu0 %v606_v37  ;;  %2430 = vmatpush.msrb.mxu1 %v674_v38  ;;  %v598_v45 = vld [vmem:[%s3298_s10 + $0x878] sm:$0xff] }
 0x2f7   : > { %2451 = vmatpush.msrb.mxu2 %v734_v39  ;;  %2470 = vmatpush.msrb.mxu3 %v802_v40  ;;  %v666_v46 = vld [vmem:[%s3298_s10 + $0xa98] sm:$0xff] }
 0x2f8   : > { %2412 = vmatpush.msrb.mxu0 %v602_v41  ;;  %2431 = vmatpush.msrb.mxu1 %v670_v42  ;;  %v726_v47 = vld [vmem:[%s3298_s10 + $0xc78] sm:$0xff] }
 0x2f9   : > { %v794_v48 = vld [vmem:[%s3298_s10 + $0xe98] sm:$0xff]  ;;  %2452 = vmatpush.msrb.mxu2 %v730_v43  ;;  %2471 = vmatpush.msrb.mxu3 %v798_v44  ;;  %v2019_v43 = vadd.f32 %v2018_v35, %v1355_v32 }
 0x2fa   : > { %v594_v49 = vld [vmem:[%s3298_s10 + $0x858] sm:$0xff]  ;;  %2413 = vmatpush.msrb.mxu0 %v598_v45  ;;  %2432 = vmatpush.msrb.mxu1 %v666_v46  ;;  %v2038_v46 = vpop.f32.mrf.mxu1 }
 0x2fb   : > { %v662_v50 = vld [vmem:[%s3298_s10 + $0xa78] sm:$0xff]  ;;  %2453 = vmatpush.msrb.mxu2 %v726_v47  ;;  %2472 = vmatpush.msrb.mxu3 %v794_v48 }
 0x2fc   : > { %v722_v51 = vld [vmem:[%s3298_s10 + $0xc58] sm:$0xff]  ;;  %2414 = vmatpush.msrb.mxu0 %v594_v49  ;;  %2433 = vmatpush.msrb.mxu1 %v662_v50 }
 0x2fd   : > { %v790_v52 = vld [vmem:[%s3298_s10 + $0xe78] sm:$0xff]  ;;  %2454 = vmatpush.msrb.mxu2 %v722_v51  ;;  %2337 = vmatmul.f32.vlgmr.msra.gmra.mxu0 %v2943_v1 }
 0x2fe   : > { %v590_v53 = vld [vmem:[%s3298_s10 + $0x838] sm:$0xff]  ;;  %2473 = vmatpush.msrb.mxu3 %v790_v52  ;;  %2377 = vmatmul.f32.vlgmr.msra.gmra.mxu2 %v2944_v2  ;;  %v2078_v2 = vpop.f32.mrf.mxu3 }
 0x2ff   : > { %v658_v54 = vld [vmem:[%s3298_s10 + $0xa58] sm:$0xff]  ;;  %2415 = vmatpush.msrb.mxu0 %v590_v53  ;;  %2357 = vmatmul.f32.vlgmr.msra.gmra.mxu1 %v2945_v8  ;;  %v2039_v53 = vadd.f32 %v2038_v46, %v2019_v43 }
 0x300   : > { %v718_v55 = vld [vmem:[%s3298_s10 + $0xc38] sm:$0xff]  ;;  %2434 = vmatpush.msrb.mxu1 %v658_v54 }
 0x301   : > { %v786_v56 = vld [vmem:[%s3298_s10 + $0xe58] sm:$0xff]  ;;  %2455 = vmatpush.msrb.mxu2 %v718_v55 }
 0x302   : > { %v586_v57 = vld [vmem:[%s3298_s10 + $0x818] sm:$0xff]  ;;  %2474 = vmatpush.msrb.mxu3 %v786_v56  ;;  %v2058_v56 = vpop.f32.mrf.mxu2 }
 0x303   : > { %v654_v58 = vld [vmem:[%s3298_s10 + $0xa38] sm:$0xff]  ;;  %2416 = vmatpush.msrb.mxu0 %v586_v57 }
 0x304   : > { %v714_v59 = vld [vmem:[%s3298_s10 + $0xc18] sm:$0xff]  ;;  %2435 = vmatpush.msrb.mxu1 %v654_v58 }
 0x305   : > { %v782_v60 = vld [vmem:[%s3298_s10 + $0xe38] sm:$0xff]  ;;  %2456 = vmatpush.msrb.mxu2 %v714_v59  ;;  %2417 = vmatmul.f32.vlgmr.msrb.gmra.mxu0 %v2948_v26 }
 0x306   : > { %v902_v61 = vld [vmem:[%s3298_s10 + $0x11f8] sm:$0xff]  ;;  %2475 = vmatpush.msrb.mxu3 %v782_v60  ;;  %2457 = vmatmul.f32.vlgmr.msrb.gmra.mxu2 %v2947_v22 }
 0x307   : > { %v1030_v62 = vld [vmem:[%s3298_s10 + $0x15f8] sm:$0xff]  ;;  %2481 = vmatpush.msra.mxu0 %v902_v61 }
 0x308   : > { %v650_v63 = vld [vmem:[%s3298_s10 + $0xa18] sm:$0xff]  ;;  %2521 = vmatpush.msra.mxu2 %v1030_v62 }
 0x309   : > { %v778_v0 = vld [vmem:[%s3298_s10 + $0xe18] sm:$0xff]  ;;  %2436 = vmatpush.msrb.mxu1 %v650_v63  ;;  %v2059_v63 = vadd.f32 %v2058_v56, %v2039_v53 }
 0x30a   : > { %v898_v3 = vld [vmem:[%s3298_s10 + $0x11d8] sm:$0xff]  ;;  %2476 = vmatpush.msrb.mxu3 %v778_v0  ;;  %2437 = vmatmul.f32.vlgmr.msrb.gmra.mxu1 %v2951_v36  ;;  %v2138_v32 = vpop.f32.mrf.mxu2 }
 0x30b   : > { %v966_v4 = vld [vmem:[%s3298_s10 + $0x13f8] sm:$0xff]  ;;  %2482 = vmatpush.msra.mxu0 %v898_v3 }
 0x30c   : > { %v1026_v5 = vld [vmem:[%s3298_s10 + $0x15d8] sm:$0xff]  ;;  %2501 = vmatpush.msra.mxu1 %v966_v4 }
 0x30d   : > { %v1094_v7 = vld [vmem:[%s3298_s10 + $0x17f8] sm:$0xff]  ;;  %2522 = vmatpush.msra.mxu2 %v1026_v5 }
 0x30e   : > { %v2946_v9 = vld [vmem:[#allocation2 + $0x18] sm:$0xff] }
 0x30f   : > { %2397 = vmatmul.f32.vlgmr.msra.gmra.mxu3 %v2946_v9  ;;  %v894_v10 = vld [vmem:[%s3298_s10 + $0x11b8] sm:$0xff] }
 0x310   : > { %v962_v11 = vld [vmem:[%s3298_s10 + $0x13d8] sm:$0xff]  ;;  %2541 = vmatpush.msra.mxu3 %v1094_v7  ;;  %2483 = vmatpush.msra.mxu0 %v894_v10  ;;  %v2079_v10 = vadd.f32 %v2078_v2, %v2059_v63 }
 0x311   : > { %v1022_v12 = vld [vmem:[%s3298_s10 + $0x15b8] sm:$0xff]  ;;  %2502 = vmatpush.msra.mxu1 %v962_v11 }
 0x312   : > { %v1090_v13 = vld [vmem:[%s3298_s10 + $0x17d8] sm:$0xff]  ;;  %2523 = vmatpush.msra.mxu2 %v1022_v12 }
 0x313   : > { %v890_v14 = vld [vmem:[%s3298_s10 + $0x1198] sm:$0xff]  ;;  %2542 = vmatpush.msra.mxu3 %v1090_v13  ;;  %v2098_v13 = vpop.f32.mrf.mxu0 }
 0x314   : > { %v958_v15 = vld [vmem:[%s3298_s10 + $0x13b8] sm:$0xff]  ;;  %2484 = vmatpush.msra.mxu0 %v890_v14 }
 0x315   : > { %v1018_v16 = vld [vmem:[%s3298_s10 + $0x1598] sm:$0xff]  ;;  %2503 = vmatpush.msra.mxu1 %v958_v15 }
 0x316   : > { %v1086_v17 = vld [vmem:[%s3298_s10 + $0x17b8] sm:$0xff]  ;;  %2524 = vmatpush.msra.mxu2 %v1018_v16 }
 0x317   : > { %v886_v18 = vld [vmem:[%s3298_s10 + $0x1178] sm:$0xff]  ;;  %2543 = vmatpush.msra.mxu3 %v1086_v17 }
 0x318   : > { %v954_v19 = vld [vmem:[%s3298_s10 + $0x1398] sm:$0xff]  ;;  %2485 = vmatpush.msra.mxu0 %v886_v18  ;;  %v2099_v18 = vadd.f32 %v2098_v13, %v2079_v10 }
 0x319   : > { %v1014_v20 = vld [vmem:[%s3298_s10 + $0x1578] sm:$0xff]  ;;  %2504 = vmatpush.msra.mxu1 %v954_v19 }
 0x31a   : > { %v1082_v21 = vld [vmem:[%s3298_s10 + $0x1798] sm:$0xff]  ;;  %2525 = vmatpush.msra.mxu2 %v1014_v20 }
 0x31b   : > { %v882_v23 = vld [vmem:[%s3298_s10 + $0x1158] sm:$0xff]  ;;  %2544 = vmatpush.msra.mxu3 %v1082_v21  ;;  %v2118_v21 = vpop.f32.mrf.mxu1 }
 0x31c   : > { %v950_v24 = vld [vmem:[%s3298_s10 + $0x1378] sm:$0xff]  ;;  %2486 = vmatpush.msra.mxu0 %v882_v23 }
 0x31d   : > { %v1010_v25 = vld [vmem:[%s3298_s10 + $0x1558] sm:$0xff]  ;;  %2505 = vmatpush.msra.mxu1 %v950_v24  ;;  %v2952_v24 = vld [vmem:[#allocation2 + $0x40] sm:$0xff] }
 0x31e   : > { %v1078_v27 = vld [vmem:[%s3298_s10 + $0x1778] sm:$0xff]  ;;  %2526 = vmatpush.msra.mxu2 %v1010_v25  ;;  %v2953_v25 = vld [vmem:[#allocation2 + $0x50] sm:$0xff] }
 0x31f   : > { %v2949_v28 = vld [vmem:[#allocation2 + $0x38] sm:$0xff]  ;;  %2545 = vmatpush.msra.mxu3 %v1078_v27 }
 0x320   : > { %2477 = vmatmul.f32.vlgmr.msrb.gmra.mxu3 %v2949_v28  ;;  %v878_v29 = vld [vmem:[%s3298_s10 + $0x1138] sm:$0xff]  ;;  %v2119_v28 = vadd.f32 %v2118_v21, %v2099_v18 }
 0x321   : > { %v946_v30 = vld [vmem:[%s3298_s10 + $0x1358] sm:$0xff]  ;;  %2487 = vmatpush.msra.mxu0 %v878_v29 }
 0x322   : > { %v1006_v33 = vld [vmem:[%s3298_s10 + $0x1538] sm:$0xff]  ;;  %2506 = vmatpush.msra.mxu1 %v946_v30 }
 0x323   : > { %v1074_v34 = vld [vmem:[%s3298_s10 + $0x1758] sm:$0xff]  ;;  %2527 = vmatpush.msra.mxu2 %v1006_v33  ;;  %v2954_v33 = vld [vmem:[#allocation2 + $0x48] sm:$0xff] }
 0x324   : > { %v874_v37 = vld [vmem:[%s3298_s10 + $0x1118] sm:$0xff]  ;;  %2546 = vmatpush.msra.mxu3 %v1074_v34 }
 0x325   : > { %v942_v38 = vld [vmem:[%s3298_s10 + $0x1338] sm:$0xff]  ;;  %2488 = vmatpush.msra.mxu0 %v874_v37 }
 0x326   : > { %v1002_v39 = vld [vmem:[%s3298_s10 + $0x1518] sm:$0xff]  ;;  %2507 = vmatpush.msra.mxu1 %v942_v38 }
 0x327   : > { %v1070_v40 = vld [vmem:[%s3298_s10 + $0x1738] sm:$0xff]  ;;  %2528 = vmatpush.msra.mxu2 %v1002_v39 }
 0x328   : > { %v870_v41 = vld [vmem:[%s3298_s10 + $0x10f8] sm:$0xff]  ;;  %2547 = vmatpush.msra.mxu3 %v1070_v40 }
 0x329   : > { %v938_v42 = vld [vmem:[%s3298_s10 + $0x1318] sm:$0xff]  ;;  %2489 = vmatpush.msra.mxu0 %v870_v41  ;;  %v2139_v41 = vadd.f32 %v2138_v32, %v2119_v28 }
 0x32a   : > { %v998_v44 = vld [vmem:[%s3298_s10 + $0x14f8] sm:$0xff]  ;;  %2508 = vmatpush.msra.mxu1 %v938_v42 }
 0x32b   : > { %v1066_v45 = vld [vmem:[%s3298_s10 + $0x1718] sm:$0xff]  ;;  %2529 = vmatpush.msra.mxu2 %v998_v44  ;;  %v2158_v44 = vpop.f32.mrf.mxu3 }
 0x32c   : > { %v866_v47 = vld [vmem:[%s3298_s10 + $0x10d8] sm:$0xff]  ;;  %2548 = vmatpush.msra.mxu3 %v1066_v45 }
 0x32d   : > { %v934_v48 = vld [vmem:[%s3298_s10 + $0x12f8] sm:$0xff]  ;;  %2490 = vmatpush.msra.mxu0 %v866_v47 }
 0x32e   : > { %v994_v49 = vld [vmem:[%s3298_s10 + $0x14d8] sm:$0xff]  ;;  %2509 = vmatpush.msra.mxu1 %v934_v48 }
 0x32f   : > { %v1062_v50 = vld [vmem:[%s3298_s10 + $0x16f8] sm:$0xff]  ;;  %2530 = vmatpush.msra.mxu2 %v994_v49  ;;  %v2178_v49 = vpop.f32.mrf.mxu0 }
 0x330   : > { %v862_v51 = vld [vmem:[%s3298_s10 + $0x10b8] sm:$0xff]  ;;  %2549 = vmatpush.msra.mxu3 %v1062_v50 }
 0x331   : > { %v930_v52 = vld [vmem:[%s3298_s10 + $0x12d8] sm:$0xff]  ;;  %2491 = vmatpush.msra.mxu0 %v862_v51 }
 0x332   : > { %v990_v54 = vld [vmem:[%s3298_s10 + $0x14b8] sm:$0xff]  ;;  %2510 = vmatpush.msra.mxu1 %v930_v52  ;;  %v2159_v52 = vadd.f32 %v2158_v44, %v2139_v41 }
 0x333   : > { %v1058_v55 = vld [vmem:[%s3298_s10 + $0x16d8] sm:$0xff]  ;;  %2531 = vmatpush.msra.mxu2 %v990_v54  ;;  %v2238_v13 = vpop.f32.mrf.mxu3 }
 0x334   : > { %v858_v57 = vld [vmem:[%s3298_s10 + $0x1098] sm:$0xff]  ;;  %2550 = vmatpush.msra.mxu3 %v1058_v55 }
 0x335   : > { %v926_v58 = vld [vmem:[%s3298_s10 + $0x12b8] sm:$0xff]  ;;  %2492 = vmatpush.msra.mxu0 %v858_v57  ;;  %v2179_v57 = vadd.f32 %v2178_v49, %v2159_v52 }
 0x336   : > { %v986_v59 = vld [vmem:[%s3298_s10 + $0x1498] sm:$0xff]  ;;  %2511 = vmatpush.msra.mxu1 %v926_v58 }
 0x337   : > { %v1054_v60 = vld [vmem:[%s3298_s10 + $0x16b8] sm:$0xff]  ;;  %2532 = vmatpush.msra.mxu2 %v986_v59 }
 0x338   : > { %v854_v61 = vld [vmem:[%s3298_s10 + $0x1078] sm:$0xff]  ;;  %2551 = vmatpush.msra.mxu3 %v1054_v60  ;;  %v2198_v60 = vpop.f32.mrf.mxu1 }
 0x339   : > { %v922_v62 = vld [vmem:[%s3298_s10 + $0x1298] sm:$0xff]  ;;  %2493 = vmatpush.msra.mxu0 %v854_v61 }
 0x33a   : > { %v982_v0 = vld [vmem:[%s3298_s10 + $0x1478] sm:$0xff]  ;;  %2512 = vmatpush.msra.mxu1 %v922_v62 }
 0x33b   : > { %v1050_v1 = vld [vmem:[%s3298_s10 + $0x1698] sm:$0xff]  ;;  %2533 = vmatpush.msra.mxu2 %v982_v0 }
 0x33c   : > { %v850_v3 = vld [vmem:[%s3298_s10 + $0x1058] sm:$0xff]  ;;  %2552 = vmatpush.msra.mxu3 %v1050_v1  ;;  %v2218_v1 = vpop.f32.mrf.mxu2 }
 0x33d   : > { %v918_v4 = vld [vmem:[%s3298_s10 + $0x1278] sm:$0xff]  ;;  %2494 = vmatpush.msra.mxu0 %v850_v3 }
 0x33e   : > { %v978_v5 = vld [vmem:[%s3298_s10 + $0x1458] sm:$0xff]  ;;  %2513 = vmatpush.msra.mxu1 %v918_v4  ;;  %v2199_v4 = vadd.f32 %v2198_v60, %v2179_v57 }
 0x33f   : > { %v1046_v7 = vld [vmem:[%s3298_s10 + $0x1678] sm:$0xff]  ;;  %2534 = vmatpush.msra.mxu2 %v978_v5 }
 0x340   : > { %v846_v8 = vld [vmem:[%s3298_s10 + $0x1038] sm:$0xff]  ;;  %2553 = vmatpush.msra.mxu3 %v1046_v7  ;;  %v2219_v10 = vadd.f32 %v2218_v1, %v2199_v4 }
 0x341   : > { %v914_v9 = vld [vmem:[%s3298_s10 + $0x1258] sm:$0xff]  ;;  %2495 = vmatpush.msra.mxu0 %v846_v8 }
 0x342   : > { %v974_v11 = vld [vmem:[%s3298_s10 + $0x1438] sm:$0xff]  ;;  %2514 = vmatpush.msra.mxu1 %v914_v9 }
 0x343   : > { %v1042_v12 = vld [vmem:[%s3298_s10 + $0x1658] sm:$0xff]  ;;  %2535 = vmatpush.msra.mxu2 %v974_v11 }
 0x344   : > { %v842_v14 = vld [vmem:[%s3298_s10 + $0x1018] sm:$0xff]  ;;  %2554 = vmatpush.msra.mxu3 %v1042_v12 }
 0x345   : > { %v910_v15 = vld [vmem:[%s3298_s10 + $0x1238] sm:$0xff]  ;;  %2496 = vmatpush.msra.mxu0 %v842_v14 }
 0x346   : > { %v970_v16 = vld [vmem:[%s3298_s10 + $0x1418] sm:$0xff]  ;;  %2515 = vmatpush.msra.mxu1 %v910_v15  ;;  %2497 = vmatmul.f32.vlgmr.msra.gmra.mxu0 %v2952_v24 }
 0x347   : > { %v1038_v17 = vld [vmem:[%s3298_s10 + $0x1638] sm:$0xff]  ;;  %2536 = vmatpush.msra.mxu2 %v970_v16 }
 0x348   : > { %v1158_v19 = vld [vmem:[%s3298_s10 + $0x19f8] sm:$0xff]  ;;  %2555 = vmatpush.msra.mxu3 %v1038_v17  ;;  %2537 = vmatmul.f32.vlgmr.msra.gmra.mxu2 %v2953_v25  ;;  %v2258_v25 = vpop.f32.mrf.mxu0 }
 0x349   : > { %v1286_v20 = vld [vmem:[%s3298_s10 + $0x1df8] sm:$0xff]  ;;  %2561 = vmatpush.msrb.mxu0 %v1158_v19 }
 0x34a   : > { %v906_v22 = vld [vmem:[%s3298_s10 + $0x1218] sm:$0xff]  ;;  %2601 = vmatpush.msrb.mxu2 %v1286_v20  ;;  %v2239_v20 = vadd.f32 %v2238_v13, %v2219_v10 }
 0x34b   : > { %v1034_v23 = vld [vmem:[%s3298_s10 + $0x1618] sm:$0xff]  ;;  %2516 = vmatpush.msra.mxu1 %v906_v22 }
 0x34c   : > { %v1154_v26 = vld [vmem:[%s3298_s10 + $0x19d8] sm:$0xff]  ;;  %2556 = vmatpush.msra.mxu3 %v1034_v23  ;;  %2517 = vmatmul.f32.vlgmr.msra.gmra.mxu1 %v2954_v33  ;;  %v2259_v28 = vadd.f32 %v2258_v25, %v2239_v20 }
 0x34d   : > { %v1222_v27 = vld [vmem:[%s3298_s10 + $0x1bf8] sm:$0xff]  ;;  %2562 = vmatpush.msrb.mxu0 %v1154_v26 }
 0x34e   : > { %v1282_v29 = vld [vmem:[%s3298_s10 + $0x1dd8] sm:$0xff]  ;;  %2581 = vmatpush.msrb.mxu1 %v1222_v27 }
 0x34f   : > { %v1350_v30 = vld [vmem:[%s3298_s10 + $0x1ff8] sm:$0xff]  ;;  %2602 = vmatpush.msrb.mxu2 %v1282_v29 }
 0x350   : > { %v2955_v34 = vld [vmem:[#allocation2 + $0x58] sm:$0xff]  ;;  %2621 = vmatpush.msrb.mxu3 %v1350_v30 }
 0x351   : > { %2557 = vmatmul.f32.vlgmr.msra.gmra.mxu3 %v2955_v34  ;;  %v1150_v35 = vld [vmem:[%s3298_s10 + $0x19b8] sm:$0xff]  ;;  %v2278_v34 = vpop.f32.mrf.mxu1 }
 0x352   : > { %v1218_v36 = vld [vmem:[%s3298_s10 + $0x1bd8] sm:$0xff]  ;;  %2563 = vmatpush.msrb.mxu0 %v1150_v35 }
 0x353   : > { %v1278_v37 = vld [vmem:[%s3298_s10 + $0x1db8] sm:$0xff]  ;;  %2582 = vmatpush.msrb.mxu1 %v1218_v36 }
 0x354   : > { %v1346_v38 = vld [vmem:[%s3298_s10 + $0x1fd8] sm:$0xff]  ;;  %2603 = vmatpush.msrb.mxu2 %v1278_v37 }
 0x355   : > { %v1146_v39 = vld [vmem:[%s3298_s10 + $0x1998] sm:$0xff]  ;;  %2622 = vmatpush.msrb.mxu3 %v1346_v38 }
 0x356   : > { %v1214_v40 = vld [vmem:[%s3298_s10 + $0x1bb8] sm:$0xff]  ;;  %2564 = vmatpush.msrb.mxu0 %v1146_v39  ;;  %v2279_v39 = vadd.f32 %v2278_v34, %v2259_v28 }
 0x357   : > { %v1274_v42 = vld [vmem:[%s3298_s10 + $0x1d98] sm:$0xff]  ;;  %2583 = vmatpush.msrb.mxu1 %v1214_v40 }
 0x358   : > { %v1342_v43 = vld [vmem:[%s3298_s10 + $0x1fb8] sm:$0xff]  ;;  %2604 = vmatpush.msrb.mxu2 %v1274_v42  ;;  %v2298_v42 = vpop.f32.mrf.mxu2 }
 0x359   : > { %v1142_v45 = vld [vmem:[%s3298_s10 + $0x1978] sm:$0xff]  ;;  %2623 = vmatpush.msrb.mxu3 %v1342_v43 }
 0x35a   : > { %v1210_v46 = vld [vmem:[%s3298_s10 + $0x1b98] sm:$0xff]  ;;  %2565 = vmatpush.msrb.mxu0 %v1142_v45  ;;  %v2299_v45 = vadd.f32 %v2298_v42, %v2279_v39 }
 0x35b   : > { %v1270_v47 = vld [vmem:[%s3298_s10 + $0x1d78] sm:$0xff]  ;;  %2584 = vmatpush.msrb.mxu1 %v1210_v46 }
 0x35c   : > { %v1338_v48 = vld [vmem:[%s3298_s10 + $0x1f98] sm:$0xff]  ;;  %2605 = vmatpush.msrb.mxu2 %v1270_v47 }
 0x35d   : > { %v1138_v50 = vld [vmem:[%s3298_s10 + $0x1958] sm:$0xff]  ;;  %2624 = vmatpush.msrb.mxu3 %v1338_v48  ;;  %v2318_v48 = vpop.f32.mrf.mxu3 }
 0x35e   : > { %v1206_v51 = vld [vmem:[%s3298_s10 + $0x1b78] sm:$0xff]  ;;  %2566 = vmatpush.msrb.mxu0 %v1138_v50  ;;  %v2319_v49 = vadd.f32 %v2318_v48, %v2299_v45  ;;  %v2956_v50 = vld [vmem:[#allocation2 + $0x60] sm:$0xff] }
 0x35f   : > { %v1266_v53 = vld [vmem:[%s3298_s10 + $0x1d58] sm:$0xff]  ;;  %2585 = vmatpush.msrb.mxu1 %v1206_v51  ;;  %v2957_v51 = vld [vmem:[#allocation2 + $0x70] sm:$0xff] }
 0x360   : > { %v1334_v54 = vld [vmem:[%s3298_s10 + $0x1f78] sm:$0xff]  ;;  %2606 = vmatpush.msrb.mxu2 %v1266_v53  ;;  %v2649_v52 = vmul.f32 %v3828_v6, %v2319_v49  ;;  %v2958_v53 = vld [vmem:[#allocation2 + $0x68] sm:$0xff] }
 0x361   : > { %v1134_v55 = vld [vmem:[%s3298_s10 + $0x1938] sm:$0xff]  ;;  %2625 = vmatpush.msrb.mxu3 %v1334_v54 }
 0x362   : > { %v1202_v56 = vld [vmem:[%s3298_s10 + $0x1b58] sm:$0xff]  ;;  %2567 = vmatpush.msrb.mxu0 %v1134_v55  ;;  %2653 = vst [vmem:[%s3837_s9 + $0x10] sm:$0xff] %v2649_v52  ;;  %v1356_v55 = vperm.slane %v4242_v31, 3 }
 0x363   : > { %v1262_v58 = vld [vmem:[%s3298_s10 + $0x1d38] sm:$0xff]  ;;  %2586 = vmatpush.msrb.mxu1 %v1202_v56 }
 0x364   : > { %v1330_v59 = vld [vmem:[%s3298_s10 + $0x1f58] sm:$0xff]  ;;  %2607 = vmatpush.msrb.mxu2 %v1262_v58 }
 0x365   : > { %v1130_v61 = vld [vmem:[%s3298_s10 + $0x1918] sm:$0xff]  ;;  %2626 = vmatpush.msrb.mxu3 %v1330_v59 }
 0x366   : > { %v1198_v62 = vld [vmem:[%s3298_s10 + $0x1b38] sm:$0xff]  ;;  %2568 = vmatpush.msrb.mxu0 %v1130_v61 }
 0x367   : > { %v1258_v63 = vld [vmem:[%s3298_s10 + $0x1d18] sm:$0xff]  ;;  %2587 = vmatpush.msrb.mxu1 %v1198_v62 }
 0x368   : > { %v1326_v0 = vld [vmem:[%s3298_s10 + $0x1f38] sm:$0xff]  ;;  %2608 = vmatpush.msrb.mxu2 %v1258_v63 }
 0x369   : > { %v1126_v2 = vld [vmem:[%s3298_s10 + $0x18f8] sm:$0xff]  ;;  %2627 = vmatpush.msrb.mxu3 %v1326_v0 }
 0x36a   : > { %v1194_v3 = vld [vmem:[%s3298_s10 + $0x1b18] sm:$0xff]  ;;  %2569 = vmatpush.msrb.mxu0 %v1126_v2 }
 0x36b   : > { %v1254_v5 = vld [vmem:[%s3298_s10 + $0x1cf8] sm:$0xff]  ;;  %2588 = vmatpush.msrb.mxu1 %v1194_v3 }
 0x36c   : > { %v1322_v7 = vld [vmem:[%s3298_s10 + $0x1f18] sm:$0xff]  ;;  %2609 = vmatpush.msrb.mxu2 %v1254_v5 }
 0x36d   : > { %v1122_v8 = vld [vmem:[%s3298_s10 + $0x18d8] sm:$0xff]  ;;  %2628 = vmatpush.msrb.mxu3 %v1322_v7 }
 0x36e   : > { %v1190_v9 = vld [vmem:[%s3298_s10 + $0x1af8] sm:$0xff]  ;;  %2570 = vmatpush.msrb.mxu0 %v1122_v8 }
 0x36f   : > { %v1250_v11 = vld [vmem:[%s3298_s10 + $0x1cd8] sm:$0xff]  ;;  %2589 = vmatpush.msrb.mxu1 %v1190_v9 }
 0x370   : > { %v1318_v12 = vld [vmem:[%s3298_s10 + $0x1ef8] sm:$0xff]  ;;  %2610 = vmatpush.msrb.mxu2 %v1250_v11 }
 0x371   : > { %v1118_v14 = vld [vmem:[%s3298_s10 + $0x18b8] sm:$0xff]  ;;  %2629 = vmatpush.msrb.mxu3 %v1318_v12 }
 0x372   : > { %v1186_v15 = vld [vmem:[%s3298_s10 + $0x1ad8] sm:$0xff]  ;;  %2571 = vmatpush.msrb.mxu0 %v1118_v14 }
 0x373   : > { %v1246_v16 = vld [vmem:[%s3298_s10 + $0x1cb8] sm:$0xff]  ;;  %2590 = vmatpush.msrb.mxu1 %v1186_v15 }
 0x374   : > { %v1314_v17 = vld [vmem:[%s3298_s10 + $0x1ed8] sm:$0xff]  ;;  %2611 = vmatpush.msrb.mxu2 %v1246_v16 }
 0x375   : > { %v1114_v18 = vld [vmem:[%s3298_s10 + $0x1898] sm:$0xff]  ;;  %2630 = vmatpush.msrb.mxu3 %v1314_v17 }
 0x376   : > { %v1182_v19 = vld [vmem:[%s3298_s10 + $0x1ab8] sm:$0xff]  ;;  %2572 = vmatpush.msrb.mxu0 %v1114_v18 }
 0x377   : > { %v1242_v21 = vld [vmem:[%s3298_s10 + $0x1c98] sm:$0xff]  ;;  %2591 = vmatpush.msrb.mxu1 %v1182_v19 }
 0x378   : > { %v1310_v22 = vld [vmem:[%s3298_s10 + $0x1eb8] sm:$0xff]  ;;  %2612 = vmatpush.msrb.mxu2 %v1242_v21 }
 0x379   : > { %v1110_v23 = vld [vmem:[%s3298_s10 + $0x1878] sm:$0xff]  ;;  %2631 = vmatpush.msrb.mxu3 %v1310_v22 }
 0x37a   : > { %v1178_v24 = vld [vmem:[%s3298_s10 + $0x1a98] sm:$0xff]  ;;  %2573 = vmatpush.msrb.mxu0 %v1110_v23  ;;  %v2338_v56 = vpop.f32.mrf.mxu0 }
 0x37b   : > { %v1238_v26 = vld [vmem:[%s3298_s10 + $0x1c78] sm:$0xff]  ;;  %2592 = vmatpush.msrb.mxu1 %v1178_v24  ;;  %v2339_v57 = vadd.f32 %v2338_v56, %v1356_v55 }
 0x37c   : > { %v1306_v27 = vld [vmem:[%s3298_s10 + $0x1e98] sm:$0xff]  ;;  %2613 = vmatpush.msrb.mxu2 %v1238_v26  ;;  %v2358_v58 = vpop.f32.mrf.mxu1 }
 0x37d   : > { %v1106_v29 = vld [vmem:[%s3298_s10 + $0x1858] sm:$0xff]  ;;  %2632 = vmatpush.msrb.mxu3 %v1306_v27  ;;  %v2359_v59 = vadd.f32 %v2358_v58, %v2339_v57 }
 0x37e   : > { %v1174_v30 = vld [vmem:[%s3298_s10 + $0x1a78] sm:$0xff]  ;;  %2574 = vmatpush.msrb.mxu0 %v1106_v29 }
 0x37f   : > { %v1234_v32 = vld [vmem:[%s3298_s10 + $0x1c58] sm:$0xff]  ;;  %2593 = vmatpush.msrb.mxu1 %v1174_v30 }
 0x380   : > { %v1302_v33 = vld [vmem:[%s3298_s10 + $0x1e78] sm:$0xff]  ;;  %2614 = vmatpush.msrb.mxu2 %v1234_v32 }
 0x381   : > { %v1102_v35 = vld [vmem:[%s3298_s10 + $0x1838] sm:$0xff]  ;;  %2633 = vmatpush.msrb.mxu3 %v1302_v33  ;;  %v2378_v60 = vpop.f32.mrf.mxu2 }
 0x382   : > { %v1170_v36 = vld [vmem:[%s3298_s10 + $0x1a58] sm:$0xff]  ;;  %2575 = vmatpush.msrb.mxu0 %v1102_v35  ;;  %v2379_v61 = vadd.f32 %v2378_v60, %v2359_v59  ;;  %v2418_v0 = vpop.f32.mrf.mxu0 }
 0x383   : > { %v1230_v37 = vld [vmem:[%s3298_s10 + $0x1c38] sm:$0xff]  ;;  %2594 = vmatpush.msrb.mxu1 %v1170_v36 }
 0x384   : > { %v1298_v38 = vld [vmem:[%s3298_s10 + $0x1e58] sm:$0xff]  ;;  %2615 = vmatpush.msrb.mxu2 %v1230_v37 }
 0x385   : > { %v1098_v40 = vld [vmem:[%s3298_s10 + $0x1818] sm:$0xff]  ;;  %2634 = vmatpush.msrb.mxu3 %v1298_v38 }
 0x386   : > { %v1166_v41 = vld [vmem:[%s3298_s10 + $0x1a38] sm:$0xff]  ;;  %2576 = vmatpush.msrb.mxu0 %v1098_v40 }
 0x387   : > { %v1226_v43 = vld [vmem:[%s3298_s10 + $0x1c18] sm:$0xff]  ;;  %2595 = vmatpush.msrb.mxu1 %v1166_v41  ;;  %2577 = vmatmul.f32.vlgmr.msrb.gmra.mxu0 %v2956_v50  ;;  %v2438_v2 = vpop.f32.mrf.mxu1 }
 0x388   : > { %v1294_v44 = vld [vmem:[%s3298_s10 + $0x1e38] sm:$0xff]  ;;  %2616 = vmatpush.msrb.mxu2 %v1226_v43 }
 0x389   : > { %v1162_v46 = vld [vmem:[%s3298_s10 + $0x1a18] sm:$0xff]  ;;  %2635 = vmatpush.msrb.mxu3 %v1294_v44  ;;  %2617 = vmatmul.f32.vlgmr.msrb.gmra.mxu2 %v2957_v51  ;;  %v2458_v4 = vpop.f32.mrf.mxu2 }
 0x38a   : > { %v1290_v47 = vld [vmem:[%s3298_s10 + $0x1e18] sm:$0xff]  ;;  %2596 = vmatpush.msrb.mxu1 %v1162_v46 }
 0x38b   : > { %2636 = vmatpush.msrb.mxu3 %v1290_v47  ;;  %2597 = vmatmul.f32.vlgmr.msrb.gmra.mxu1 %v2958_v53  ;;  %v2959_v54 = vld [vmem:[#allocation2 + $0x78] sm:$0xff] }
 0x38c   : > { %2637 = vmatmul.f32.vlgmr.msrb.gmra.mxu3 %v2959_v54 }
 0x392   : > { %v2398_v62 = vpop.f32.mrf.mxu3 }
 0x393   : > { %v2399_v63 = vadd.f32 %v2398_v62, %v2379_v61 }
 0x395   : > { %v2419_v1 = vadd.f32 %v2418_v0, %v2399_v63 }
 0x397   : > { %v2439_v3 = vadd.f32 %v2438_v2, %v2419_v1 }
 0x399   : > { %v2459_v5 = vadd.f32 %v2458_v4, %v2439_v3 }
 0x3a3   : > { %v2478_v7 = vpop.f32.mrf.mxu3 }
 0x3a4   : > { %v2479_v9 = vadd.f32 %v2478_v7, %v2459_v5 }
 0x3c3   : > { %v2498_v8 = vpop.f32.mrf.mxu0 }
 0x3c4   : > { %v2499_v10 = vadd.f32 %v2498_v8, %v2479_v9 }
 0x3c9   : > { %v2518_v31 = vpop.f32.mrf.mxu1 }
 0x3ca   : > { %v2519_v12 = vadd.f32 %v2518_v31, %v2499_v10 }
 0x3cb   : > { %v2538_v11 = vpop.f32.mrf.mxu2 }
 0x3cc   : > { %v2539_v13 = vadd.f32 %v2538_v11, %v2519_v12 }
 0x3d4   : > { %v2558_v14 = vpop.f32.mrf.mxu3 }
 0x3d5   : > { %v2559_v15 = vadd.f32 %v2558_v14, %v2539_v13 }
 0x404   : > { %v2578_v16 = vpop.f32.mrf.mxu0 }
 0x405   : > { %v2579_v17 = vadd.f32 %v2578_v16, %v2559_v15 }
 0x408   : > { %v2598_v18 = vpop.f32.mrf.mxu1 }
 0x409   : > { %v2599_v19 = vadd.f32 %v2598_v18, %v2579_v17 }
 0x40c   : > { %v2618_v20 = vpop.f32.mrf.mxu2 }
 0x40d   : > { %v2619_v21 = vadd.f32 %v2618_v20, %v2599_v19 }
 0x40f   : > { %v2638_v22 = vpop.f32.mrf.mxu3 }
 0x410   : > { %v2639_v23 = vadd.f32 %v2638_v22, %v2619_v21 }
 0x412   : > { %v2650_v24 = vmul.f32 %v3828_v6, %v2639_v23 }
 0x414   : > { %2654 = vst [vmem:[%s3837_s9 + $0x18] sm:$0xff] %v2650_v24 }
 0x415   : > { %3077 = shalt.err (!%p3074_p13)
}
 0x416   : > { %2835 = dma.vmem_to_hbm [thread:$0]  (%p3258_p0), %s2672_s29, 512, %s2674_s30, %s2656_s26  }
 0x417 PF: > { %s2685_s7 = sand.u32 1, %s3116_s15   ;;  %p2849_p4 = pnand %p2809_p3, %p3262_p2 }
 0x418   : > { %s2686_s24 = scalar_lea.sflag [#allocation4], %s2685_s7 }
 0x419   : > { %p2850_p5 = pneg %p2849_p4 }
 0x41b   : > { %3111 = dma.done.wait (%p2850_p5), %s2686_s24, 512  }
 0x41c   : > { %3113 = vsyncadd (%p2850_p5), %s2686_s24, 4294966784  ;;  %s21_s20 = sadd.s32 1, %s3136_s20   ;;  %s4406_s15 = smov %s3120_s16 }
 0x41d   : > { %p18_p1 = scmp.ge.s32.totalorder %s21_s20, 4   ;;  %s4407_s16 = smov %s3124_s17 }
 0x41e   : > { %s4408_s17 = smov %s3220_s28  ;;  %s4409_s18 = smov %s3132_s19 }
 0x41f   : > { %s4410_s19 = smov %s4412_s21  ;;  %20 = sbr.rel (!%p18_p1) target bundleno = 9 (0x9), region = 101 }
 0x424   :  { %2692 = vsyncpa [#allocation3], 1 }
 0x425   :  { %2694 = vsyncpa [#allocation3 + $0x1], 1 }
 0x426   :  { %2695 = vsyncpa [#allocation6], 1 }
 0x427   :  { %2697 = vsyncpa [#allocation6 + $0x1], 1 }
 0x428   :  { %2698 = vsyncpa [#allocation4], 1 }
 0x429   :  { %2700 = vsyncpa [#allocation4 + $0x1], 1 }

</bundles_post_ra>
